<compile_context>
chip_gen: v6e
topology: v6e:2x2x1
jax: 0.10.0
libtpu: 0.0.40
codegen_flags: <defaults>
</compile_context>

<pallas_src>
import jax
import jax.numpy as jnp
from jax.experimental import pallas as pl
from jax.experimental.pallas import tpu as pltpu
import numpy as np


# ----------------------------- recurrent core kernel -------------------------------
# Single launch: pre-loop loop-invariant GEMMs + the full time recurrence.

def decoder_core_kernel(
    enc_ref, emb_ref,
    uw_ref, ub_ref, ww_ref, wb_ref, aw_ref, ab_ref,
    wlstm_ref, blstm_ref, ihicw_ref, ihicb_ref,
    h_all_ref, alpha_ref,
):
    B, N, E = enc_ref.shape
    T = emb_ref.shape[0]
    D = h_all_ref.shape[2]
    A = uw_ref.shape[1]

    enc = enc_ref[...]                                            # (B, N, E)

    # ---------- pre-loop, loop-invariant GEMMs (folded into this kernel) ----------
    # attention image projection: (B*N, E) @ (E, A)
    u_hs = (jnp.dot(enc.reshape(B * N, E), uw_ref[...],
                    preferred_element_type=jnp.float32)
            + ub_ref[...]).reshape(B, N, A)                       # (B, N, A)

    # initial state: mean-pooled image through concatenated [ih_w | ic_w]
    mean_enc = jnp.sum(enc, axis=1) * (1.0 / N)                   # (B, E)
    hc0 = (jnp.dot(mean_enc, ihicw_ref[...],
                   preferred_element_type=jnp.float32) + ihicb_ref[...])   # (B, 2D)
    h0 = hc0[:, 0:D]
    c0 = hc0[:, D:2 * D]

    ww = ww_ref[...]            # (D, A)
    wb = wb_ref[...]            # (1, A)
    aw = aw_ref[...]            # (1, A)
    ab = ab_ref[...]            # (1, 1)
    wlstm = wlstm_ref[...]      # (EMB+E+D, 4D) = [w_ih ; w_hh]
    blstm = blstm_ref[...]      # (1, 4D)       = b_ih + b_hh

    # ------------------------------- time recurrence -------------------------------
    def step(t, carry):
        h, c, _ = carry

        # attention (u_hs hoisted; only the h-dependent part per step)
        w_ah = jnp.dot(h, ww, preferred_element_type=jnp.float32) + wb      # (B, A)
        combined = jnp.tanh(u_hs + w_ah[:, None, :])                        # (B, N, A)
        score = jnp.sum(combined * aw, axis=2) + ab                         # (B, N)
        score = score - jnp.max(score, axis=1, keepdims=True)
        es = jnp.exp(score)
        alpha = es / jnp.sum(es, axis=1, keepdims=True)                     # (B, N)
        context = jnp.sum(enc * alpha[:, :, None], axis=1)                  # (B, E)

        # LSTM cell: ONE fused gate matmul  [embed | context | h] @ [w_ih ; w_hh]
        lstm_in = jnp.concatenate([emb_ref[t], context, h], axis=1)         # (B, EMB+E+D)
        gates = jnp.dot(lstm_in, wlstm, preferred_element_type=jnp.float32) + blstm
        ig = jax.nn.sigmoid(gates[:, 0:D])
        fg = jax.nn.sigmoid(gates[:, D:2 * D])
        gg = jnp.tanh(gates[:, 2 * D:3 * D])
        og = jax.nn.sigmoid(gates[:, 3 * D:4 * D])
        c_new = fg * c + ig * gg
        h_new = og * jnp.tanh(c_new)

        # hidden state emitted; vocab projection deferred to a single batched GEMM
        h_all_ref[t] = h_new
        return h_new, c_new, alpha

    init = (h0, c0, jnp.zeros((B, N), jnp.float32))
    # full unroll at small T (LLO visibility); partial unroll if T grows (vreg pressure)
    unroll = True if T <= 16 else 4
    _, _, alpha_last = jax.lax.fori_loop(0, T, step, init, unroll=unroll)
    alpha_ref[...] = alpha_last     # written exactly once


# ----------------------- deferred vocab projection (V-tiled) -----------------------

def _proj_kernel(x_ref, w_ref, b_ref, o_ref):
    o_ref[...] = (jnp.dot(x_ref[...], w_ref[...],
                          preferred_element_type=jnp.float32) + b_ref[...])


# ------------------------------------ wrapper ---------------------------------------

def decoder_forward(params, encoded_image, captions):
    B, N, E = encoded_image.shape
    S = captions.shape[1]
    T = S - 1
    V, EMB = params["embedding"].shape
    D = params["w_hh"].shape[0]
    A = params["u_w"].shape[1]

    # ---- glue ops (cheap XLA, once per call): gather + weight stacking ----
    embeds_t = jnp.transpose(params["embedding"][captions[:, :T]], (1, 0, 2))   # (T, B, EMB)
    w_lstm = jnp.concatenate([params["w_ih"], params["w_hh"]], axis=0)          # (EMB+E+D, 4D)
    b_lstm = params["b_ih"] + params["b_hh"]                                    # (1, 4D)
    ihic_w = jnp.concatenate([params["ih_w"], params["ic_w"]], axis=1)          # (E, 2D)
    ihic_b = jnp.concatenate([params["ih_b"], params["ic_b"]], axis=1)          # (1, 2D)

    full2d = lambda i: (0, 0)
    full3d = lambda i: (0, 0, 0)

    # ---- launch 1: recurrent core (precomputes + recurrence, single pallas_call) ----
    h_all, alpha = pl.pallas_call(
        decoder_core_kernel,
        out_shape=[
            jax.ShapeDtypeStruct((T, B, D), jnp.float32),
            jax.ShapeDtypeStruct((B, N), jnp.float32),
        ],
        grid=(1,),
        in_specs=[
            pl.BlockSpec((B, N, E), full3d),            # encoded image
            pl.BlockSpec((T, B, EMB), full3d),          # time-major embeddings
            pl.BlockSpec((E, A), full2d),               # attention.u weight
            pl.BlockSpec((1, A), full2d),               # attention.u bias
            pl.BlockSpec((D, A), full2d),               # attention.w weight
            pl.BlockSpec((1, A), full2d),               # attention.w bias
            pl.BlockSpec((1, A), full2d),               # attention.a weight
            pl.BlockSpec((1, 1), full2d),               # attention.a bias
            pl.BlockSpec((EMB + E + D, 4 * D), full2d),  # stacked [w_ih ; w_hh]
            pl.BlockSpec((1, 4 * D), full2d),           # folded b_ih + b_hh
            pl.BlockSpec((E, 2 * D), full2d),           # [ih_w | ic_w]
            pl.BlockSpec((1, 2 * D), full2d),           # [ih_b | ic_b]
        ],
        out_specs=[
            pl.BlockSpec((T, B, D), full3d),            # all hidden states
            pl.BlockSpec((B, N), full2d),               # final alpha
        ],
        compiler_params=pltpu.CompilerParams(
            dimension_semantics=("arbitrary",),
            vmem_limit_bytes=32 * 1024 * 1024),
    )(
        encoded_image, embeds_t,
        params["u_w"], params["u_b"], params["w_w"], params["w_b"],
        params["a_w"], params["a_b"],
        w_lstm, b_lstm, ihic_w, ihic_b,
    )

    # ---- launch 2: deferred output projection, lane-dense (V padded to 128) & V-tiled ----
    Vpad = ((V + 127) // 128) * 128
    lin_w_pad = jnp.pad(params["lin_w"], ((0, 0), (0, Vpad - V)))
    lin_b_pad = jnp.pad(params["lin_b"], ((0, 0), (0, Vpad - V)))
    M = T * B
    x2d = h_all.reshape(M, D)
    TV = min(512, Vpad)                                   # V-chunk; "parallel" axis for v7x TCs
    grid_v = pl.cdiv(Vpad, TV)
    preds_pad = pl.pallas_call(
        _proj_kernel,
        out_shape=jax.ShapeDtypeStruct((M, Vpad), jnp.float32),
        grid=(grid_v,),
        in_specs=[
            pl.BlockSpec((M, D), lambda j: (0, 0)),
            pl.BlockSpec((D, TV), lambda j: (0, j)),
            pl.BlockSpec((1, TV), lambda j: (0, j)),
        ],
        out_specs=pl.BlockSpec((M, TV), lambda j: (0, j)),
        compiler_params=pltpu.CompilerParams(
            dimension_semantics=("parallel",),
            vmem_limit_bytes=32 * 1024 * 1024),
    )(x2d, lin_w_pad, lin_b_pad)

    predictions = jnp.transpose(preds_pad[:, :V].reshape(T, B, V), (1, 0, 2))   # (B, T, V)
    return predictions, alpha


# --------------------------- pure-JAX reference -------------------------------

def reference_forward(p, enc, captions):
    B, N, E = enc.shape
    T = captions.shape[1] - 1
    D = p["w_hh"].shape[0]
    embeds = p["embedding"][captions]
    mean_enc = enc.mean(axis=1)
    h = mean_enc @ p["ih_w"] + p["ih_b"][0]
    c = mean_enc @ p["ic_w"] + p["ic_b"][0]
    preds = []
    alpha = None
    for i in range(T):
        u_hs = jnp.einsum("bne,ea->bna", enc, p["u_w"]) + p["u_b"][0]
        w_ah = h @ p["w_w"] + p["w_b"][0]
        combined = jnp.tanh(u_hs + w_ah[:, None, :])
        score = jnp.sum(combined * p["a_w"], axis=2) + p["a_b"][0, 0]
        alpha = jax.nn.softmax(score, axis=1)
        context = jnp.sum(enc * alpha[:, :, None], axis=1)
        lstm_in = jnp.concatenate([embeds[:, i], context], axis=1)
        gates = lstm_in @ p["w_ih"] + p["b_ih"][0] + h @ p["w_hh"] + p["b_hh"][0]
        ig = jax.nn.sigmoid(gates[:, :D])
        fg = jax.nn.sigmoid(gates[:, D:2 * D])
        gg = jnp.tanh(gates[:, 2 * D:3 * D])
        og = jax.nn.sigmoid(gates[:, 3 * D:4 * D])
        c = fg * c + ig * gg
        h = og * jnp.tanh(c)
        preds.append(h @ p["lin_w"] + p["lin_b"][0])
    return jnp.stack(preds, axis=1), alpha


# --------------------------------- main ---------------------------------------

def make_params(key, *, vocab, embed, enc_dim, dec_dim, attn_dim):
    ks = jax.random.split(key, 20)
    s = 0.1
    n = lambda k, shape: (s * jax.random.normal(k, shape)).astype(jnp.float32)
    return {
        "embedding": n(ks[0], (vocab, embed)),
        "u_w": n(ks[1], (enc_dim, attn_dim)), "u_b": n(ks[2], (1, attn_dim)),
        "w_w": n(ks[3], (dec_dim, attn_dim)), "w_b": n(ks[4], (1, attn_dim)),
        "a_w": n(ks[5], (1, attn_dim)),       "a_b": n(ks[6], (1, 1)),
        "w_ih": n(ks[7], (embed + enc_dim, 4 * dec_dim)), "b_ih": n(ks[8], (1, 4 * dec_dim)),
        "w_hh": n(ks[9], (dec_dim, 4 * dec_dim)),         "b_hh": n(ks[10], (1, 4 * dec_dim)),
        "lin_w": n(ks[11], (dec_dim, vocab)), "lin_b": n(ks[12], (1, vocab)),
        "ih_w": n(ks[13], (enc_dim, dec_dim)), "ih_b": n(ks[14], (1, dec_dim)),
        "ic_w": n(ks[15], (enc_dim, dec_dim)), "ic_b": n(ks[16], (1, dec_dim)),
    }


if __name__ == "__main__":
    # parameter_dict
    VOCAB, ATTN, ENC, DEC, EMB = 64, 32, 32, 32, 32
    B, N, S = 2, 16, 8   # batch, num image features, caption length (seq_length = S-1)

    key = jax.random.PRNGKey(0)
    kp, ke, kc = jax.random.split(key, 3)
    params = make_params(kp, vocab=VOCAB, embed=EMB, enc_dim=ENC, dec_dim=DEC, attn_dim=ATTN)

    encoded_image = jax.random.normal(ke, (B, N, ENC), dtype=jnp.float32)
    captions = jax.random.randint(kc, (B, S), 0, VOCAB, dtype=jnp.int32)

    preds, alpha = jax.jit(decoder_forward)(params, encoded_image, captions)
    preds = jax.block_until_ready(preds)
    alpha = jax.block_until_ready(alpha)

    ref_preds, ref_alpha = reference_forward(params, encoded_image, captions)

    assert preds.shape == (B, S - 1, VOCAB) and alpha.shape == (B, N)
    np.testing.assert_allclose(np.asarray(preds), np.asarray(ref_preds), rtol=1e-4, atol=1e-4)
    np.testing.assert_allclose(np.asarray(alpha), np.asarray(ref_alpha), rtol=1e-4, atol=1e-4)
    print("KERNEL_OK")
</pallas_src>

<mosaic_0001>
module attributes {stable_mosaic.version = 11 : i64} {
  func.func @_proj_kernel(%arg0: i32, %arg1: memref<14x32xf32, #tpu.memory_space<vmem>>, %arg2: memref<32x128xf32, #tpu.memory_space<vmem>>, %arg3: memref<1x128xf32, #tpu.memory_space<vmem>>, %arg4: memref<14x128xf32, #tpu.memory_space<vmem>>) attributes {dimension_semantics = [#tpu.dimension_semantics<parallel>], iteration_bounds = array<i64: 1>, scalar_prefetch = 0 : i64, scratch_operands = 0 : i64, tpu.core_type = #tpu.core_type<tc>, window_params = [{pipeline_mode = #tpu.pipeline_mode<synchronous>, transform_indices = @transform_0, window_bounds = array<i64: 14, 32>}, {transform_indices = @transform_1, window_bounds = array<i64: 32, 128>}, {transform_indices = @transform_2, window_bounds = array<i64: 1, 128>}, {transform_indices = @transform_3, window_bounds = array<i64: 14, 128>}]} {
    %c0 = arith.constant 0 : index
    %c0_0 = arith.constant 0 : index
    %0 = vector.load %arg1[%c0, %c0_0] : memref<14x32xf32, #tpu.memory_space<vmem>>, vector<14x32xf32>
    %c0_1 = arith.constant 0 : index
    %c0_2 = arith.constant 0 : index
    %1 = vector.load %arg2[%c0_1, %c0_2] : memref<32x128xf32, #tpu.memory_space<vmem>>, vector<32x128xf32>
    %cst = arith.constant dense<0.000000e+00> : vector<14x128xf32>
    %2 = tpu.matmul %0, %1, %cst {dimension_numbers = #tpu.dot_dimension_numbers<[1], [0], [0], [1], [0, 0, 1, 1], [], []>} : vector<14x32xf32>, vector<32x128xf32>, vector<14x128xf32> -> vector<14x128xf32>
    %c0_3 = arith.constant 0 : index
    %c0_4 = arith.constant 0 : index
    %3 = vector.load %arg3[%c0_3, %c0_4] : memref<1x128xf32, #tpu.memory_space<vmem>>, vector<1x128xf32>
    %4 = vector.broadcast %3 : vector<1x128xf32> to vector<14x128xf32>
    %5 = arith.addf %2, %4 : vector<14x128xf32>
    %c0_5 = arith.constant 0 : index
    %c0_6 = arith.constant 0 : index
    %6 = vector.load %arg4[%c0_5, %c0_6] : memref<14x128xf32, #tpu.memory_space<vmem>>, vector<14x128xf32>
    tpu.vector_store %arg4[%c0_5, %c0_6], %5 {strides = array<i32>} : memref<14x128xf32, #tpu.memory_space<vmem>>, vector<14x128xf32>,
    return
  }
  func.func @transform_0(%arg0: i32) -> (i32, i32) {
    %c0_i32 = arith.constant 0 : i32
    %c0_i32_0 = arith.constant 0 : i32
    %c0_i32_1 = arith.constant 0 : i32
    return %c0_i32, %c0_i32_0 : i32, i32
  }
  func.func @transform_1(%arg0: i32) -> (i32, i32) {
    %c0_i32 = arith.constant 0 : i32
    %c0_i32_0 = arith.constant 0 : i32
    return %c0_i32, %arg0 : i32, i32
  }
  func.func @transform_2(%arg0: i32) -> (i32, i32) {
    %c0_i32 = arith.constant 0 : i32
    %c0_i32_0 = arith.constant 0 : i32
    return %c0_i32, %arg0 : i32, i32
  }
  func.func @transform_3(%arg0: i32) -> (i32, i32) {
    %c0_i32 = arith.constant 0 : i32
    %c0_i32_0 = arith.constant 0 : i32
    return %c0_i32, %arg0 : i32, i32
  }
}

module attributes {stable_mosaic.version = 11 : i64} {
  func.func @decoder_core_kernel(%arg0: i32, %arg1: memref<2x16x32xf32, #tpu.memory_space<vmem>>, %arg2: memref<7x2x32xf32, #tpu.memory_space<vmem>>, %arg3: memref<32x32xf32, #tpu.memory_space<vmem>>, %arg4: memref<1x32xf32, #tpu.memory_space<vmem>>, %arg5: memref<32x32xf32, #tpu.memory_space<vmem>>, %arg6: memref<1x32xf32, #tpu.memory_space<vmem>>, %arg7: memref<1x32xf32, #tpu.memory_space<vmem>>, %arg8: memref<1x1xf32, #tpu.memory_space<vmem>>, %arg9: memref<96x128xf32, #tpu.memory_space<vmem>>, %arg10: memref<1x128xf32, #tpu.memory_space<vmem>>, %arg11: memref<32x64xf32, #tpu.memory_space<vmem>>, %arg12: memref<1x64xf32, #tpu.memory_space<vmem>>, %arg13: memref<7x2x32xf32, #tpu.memory_space<vmem>>, %arg14: memref<2x16xf32, #tpu.memory_space<vmem>>) attributes {dimension_semantics = [#tpu.dimension_semantics<arbitrary>], iteration_bounds = array<i64: 1>, scalar_prefetch = 0 : i64, scratch_operands = 0 : i64, tpu.core_type = #tpu.core_type<tc>, window_params = [{pipeline_mode = #tpu.pipeline_mode<synchronous>, transform_indices = @transform_0, window_bounds = array<i64: 2, 16, 32>}, {pipeline_mode = #tpu.pipeline_mode<synchronous>, transform_indices = @transform_1, window_bounds = array<i64: 7, 2, 32>}, {pipeline_mode = #tpu.pipeline_mode<synchronous>, transform_indices = @transform_2, window_bounds = array<i64: 32, 32>}, {pipeline_mode = #tpu.pipeline_mode<synchronous>, transform_indices = @transform_3, window_bounds = array<i64: 1, 32>}, {pipeline_mode = #tpu.pipeline_mode<synchronous>, transform_indices = @transform_4, window_bounds = array<i64: 32, 32>}, {pipeline_mode = #tpu.pipeline_mode<synchronous>, transform_indices = @transform_5, window_bounds = array<i64: 1, 32>}, {pipeline_mode = #tpu.pipeline_mode<synchronous>, transform_indices = @transform_6, window_bounds = array<i64: 1, 32>}, {pipeline_mode = #tpu.pipeline_mode<synchronous>, transform_indices = @transform_7, window_bounds = array<i64: 1, 1>}, {pipeline_mode = #tpu.pipeline_mode<synchronous>, transform_indices = @transform_8, window_bounds = array<i64: 96, 128>}, {pipeline_mode = #tpu.pipeline_mode<synchronous>, transform_indices = @transform_9, window_bounds = array<i64: 1, 128>}, {pipeline_mode = #tpu.pipeline_mode<synchronous>, transform_indices = @transform_10, window_bounds = array<i64: 32, 64>}, {pipeline_mode = #tpu.pipeline_mode<synchronous>, transform_indices = @transform_11, window_bounds = array<i64: 1, 64>}, {pipeline_mode = #tpu.pipeline_mode<synchronous>, transform_indices = @transform_12, window_bounds = array<i64: 7, 2, 32>}, {pipeline_mode = #tpu.pipeline_mode<synchronous>, transform_indices = @transform_13, window_bounds = array<i64: 2, 16>}]} {
    %c0 = arith.constant 0 : index
    %c0_0 = arith.constant 0 : index
    %c0_1 = arith.constant 0 : index
    %0 = vector.load %arg1[%c0, %c0_0, %c0_1] : memref<2x16x32xf32, #tpu.memory_space<vmem>>, vector<2x16x32xf32>
    %1 = vector.shape_cast %0 : vector<2x16x32xf32> to vector<32x32xf32>
    %c0_2 = arith.constant 0 : index
    %c0_3 = arith.constant 0 : index
    %2 = vector.load %arg3[%c0_2, %c0_3] : memref<32x32xf32, #tpu.memory_space<vmem>>, vector<32x32xf32>
    %cst = arith.constant dense<0.000000e+00> : vector<32x32xf32>
    %3 = tpu.matmul %1, %2, %cst {dimension_numbers = #tpu.dot_dimension_numbers<[1], [0], [0], [1], [0, 0, 1, 1], [], []>} : vector<32x32xf32>, vector<32x32xf32>, vector<32x32xf32> -> vector<32x32xf32>
    %c0_4 = arith.constant 0 : index
    %c0_5 = arith.constant 0 : index
    %4 = vector.load %arg4[%c0_4, %c0_5] : memref<1x32xf32, #tpu.memory_space<vmem>>, vector<1x32xf32>
    %5 = vector.broadcast %4 : vector<1x32xf32> to vector<32x32xf32>
    %6 = arith.addf %3, %5 : vector<32x32xf32>
    %7 = vector.shape_cast %6 : vector<32x32xf32> to vector<2x16x32xf32>
    %cst_6 = arith.constant dense<0.000000e+00> : vector<2x32xf32>
    %8 = vector.multi_reduction <add>, %0, %cst_6 [1] : vector<2x16x32xf32> to vector<2x32xf32>
    %cst_7 = arith.constant 6.250000e-02 : f32
    %9 = vector.broadcast %cst_7 : f32 to vector<2x32xf32>
    %10 = arith.mulf %8, %9 : vector<2x32xf32>
    %c0_8 = arith.constant 0 : index
    %c0_9 = arith.constant 0 : index
    %11 = vector.load %arg11[%c0_8, %c0_9] : memref<32x64xf32, #tpu.memory_space<vmem>>, vector<32x64xf32>
    %cst_10 = arith.constant dense<0.000000e+00> : vector<2x64xf32>
    %12 = tpu.matmul %10, %11, %cst_10 {dimension_numbers = #tpu.dot_dimension_numbers<[1], [0], [0], [1], [0, 0, 1, 1], [], []>} : vector<2x32xf32>, vector<32x64xf32>, vector<2x64xf32> -> vector<2x64xf32>
    %c0_11 = arith.constant 0 : index
    %c0_12 = arith.constant 0 : index
    %13 = vector.load %arg12[%c0_11, %c0_12] : memref<1x64xf32, #tpu.memory_space<vmem>>, vector<1x64xf32>
    %14 = vector.broadcast %13 : vector<1x64xf32> to vector<2x64xf32>
    %15 = arith.addf %12, %14 : vector<2x64xf32>
    %16 = vector.extract_strided_slice %15 {offsets = [0, 0], sizes = [2, 32], strides = [1, 1]} : vector<2x64xf32> to vector<2x32xf32>
    %17 = vector.extract_strided_slice %15 {offsets = [0, 32], sizes = [2, 32], strides = [1, 1]} : vector<2x64xf32> to vector<2x32xf32>
    %c0_13 = arith.constant 0 : index
    %c0_14 = arith.constant 0 : index
    %18 = vector.load %arg5[%c0_13, %c0_14] : memref<32x32xf32, #tpu.memory_space<vmem>>, vector<32x32xf32>
    %c0_15 = arith.constant 0 : index
    %c0_16 = arith.constant 0 : index
    %19 = vector.load %arg6[%c0_15, %c0_16] : memref<1x32xf32, #tpu.memory_space<vmem>>, vector<1x32xf32>
    %c0_17 = arith.constant 0 : index
    %c0_18 = arith.constant 0 : index
    %20 = vector.load %arg7[%c0_17, %c0_18] : memref<1x32xf32, #tpu.memory_space<vmem>>, vector<1x32xf32>
    %c0_19 = arith.constant 0 : index
    %c0_20 = arith.constant 0 : index
    %21 = vector.load %arg8[%c0_19, %c0_20] : memref<1x1xf32, #tpu.memory_space<vmem>>, vector<1x1xf32>
    %c0_21 = arith.constant 0 : index
    %c0_22 = arith.constant 0 : index
    %22 = vector.load %arg9[%c0_21, %c0_22] : memref<96x128xf32, #tpu.memory_space<vmem>>, vector<96x128xf32>
    %c0_23 = arith.constant 0 : index
    %c0_24 = arith.constant 0 : index
    %23 = vector.load %arg10[%c0_23, %c0_24] : memref<1x128xf32, #tpu.memory_space<vmem>>, vector<1x128xf32>
    %cst_25 = arith.constant 0.000000e+00 : f32
    %24 = vector.broadcast %cst_25 : f32 to vector<2x16xf32>
    %c0_i32 = arith.constant 0 : i32
    %cst_26 = arith.constant dense<0.000000e+00> : vector<2x32xf32>
    %25 = tpu.matmul %16, %18, %cst_26 {dimension_numbers = #tpu.dot_dimension_numbers<[1], [0], [0], [1], [0, 0, 1, 1], [], []>} : vector<2x32xf32>, vector<32x32xf32>, vector<2x32xf32> -> vector<2x32xf32>
    %26 = vector.broadcast %19 : vector<1x32xf32> to vector<2x32xf32>
    %27 = arith.addf %25, %26 : vector<2x32xf32>
    %28 = vector.shape_cast %27 : vector<2x32xf32> to vector<2x1x32xf32>
    %29 = vector.broadcast %28 : vector<2x1x32xf32> to vector<2x16x32xf32>
    %30 = arith.addf %7, %29 : vector<2x16x32xf32>
    %31 = math.tanh %30 : vector<2x16x32xf32>
    %32 = vector.shape_cast %20 : vector<1x32xf32> to vector<1x1x32xf32>
    %33 = vector.broadcast %32 : vector<1x1x32xf32> to vector<2x16x32xf32>
    %34 = arith.mulf %31, %33 : vector<2x16x32xf32>
    %cst_27 = arith.constant dense<0.000000e+00> : vector<2x16xf32>
    %35 = vector.multi_reduction <add>, %34, %cst_27 [2] : vector<2x16x32xf32> to vector<2x16xf32>
    %36 = vector.broadcast %21 : vector<1x1xf32> to vector<2x16xf32>
    %37 = arith.addf %35, %36 : vector<2x16xf32>
    %cst_28 = arith.constant dense<0xFF800000> : vector<2xf32>
    %38 = vector.multi_reduction <maximumf>, %37, %cst_28 [1] : vector<2x16xf32> to vector<2xf32>
    %39 = vector.shape_cast %38 : vector<2xf32> to vector<2x1xf32>
    %40 = vector.broadcast %39 : vector<2x1xf32> to vector<2x16xf32>
    %41 = arith.subf %37, %40 : vector<2x16xf32>
    %42 = math.exp %41 : vector<2x16xf32>
    %cst_29 = arith.constant dense<0.000000e+00> : vector<2xf32>
    %43 = vector.multi_reduction <add>, %42, %cst_29 [1] : vector<2x16xf32> to vector<2xf32>
    %44 = vector.shape_cast %43 : vector<2xf32> to vector<2x1xf32>
    %45 = vector.broadcast %44 : vector<2x1xf32> to vector<2x16xf32>
    %46 = arith.divf %42, %45 : vector<2x16xf32>
    %47 = vector.shape_cast %46 : vector<2x16xf32> to vector<2x16x1xf32>
    %48 = vector.broadcast %47 : vector<2x16x1xf32> to vector<2x16x32xf32>
    %49 = arith.mulf %0, %48 : vector<2x16x32xf32>
    %cst_30 = arith.constant dense<0.000000e+00> : vector<2x32xf32>
    %50 = vector.multi_reduction <add>, %49, %cst_30 [1] : vector<2x16x32xf32> to vector<2x32xf32>
    %51 = arith.index_cast %c0_i32 : i32 to index
    %c0_31 = arith.constant 0 : index
    %c0_32 = arith.constant 0 : index
    %52 = vector.load %arg2[%51, %c0_31, %c0_32] : memref<7x2x32xf32, #tpu.memory_space<vmem>>, vector<1x2x32xf32>
    %53 = vector.shape_cast %52 : vector<1x2x32xf32> to vector<2x32xf32>
    %54 = tpu.concatenate %53, %50, %16 in 1 : vector<2x32xf32>, vector<2x32xf32>, vector<2x32xf32> -> vector<2x96xf32>
    %cst_33 = arith.constant dense<0.000000e+00> : vector<2x128xf32>
    %55 = tpu.matmul %54, %22, %cst_33 {dimension_numbers = #tpu.dot_dimension_numbers<[1], [0], [0], [1], [0, 0, 1, 1], [], []>} : vector<2x96xf32>, vector<96x128xf32>, vector<2x128xf32> -> vector<2x128xf32>
    %56 = vector.broadcast %23 : vector<1x128xf32> to vector<2x128xf32>
    %57 = arith.addf %55, %56 : vector<2x128xf32>
    %58 = vector.extract_strided_slice %57 {offsets = [0, 0], sizes = [2, 32], strides = [1, 1]} : vector<2x128xf32> to vector<2x32xf32>
    %59 = arith.negf %58 : vector<2x32xf32>
    %60 = math.exp %59 : vector<2x32xf32>
    %cst_34 = arith.constant 1.000000e+00 : f32
    %61 = vector.broadcast %cst_34 : f32 to vector<2x32xf32>
    %62 = arith.addf %61, %60 : vector<2x32xf32>
    %63 = arith.divf %61, %62 : vector<2x32xf32>
    %64 = vector.extract_strided_slice %57 {offsets = [0, 32], sizes = [2, 32], strides = [1, 1]} : vector<2x128xf32> to vector<2x32xf32>
    %65 = arith.negf %64 : vector<2x32xf32>
    %66 = math.exp %65 : vector<2x32xf32>
    %cst_35 = arith.constant 1.000000e+00 : f32
    %67 = vector.broadcast %cst_35 : f32 to vector<2x32xf32>
    %68 = arith.addf %67, %66 : vector<2x32xf32>
    %69 = arith.divf %67, %68 : vector<2x32xf32>
    %70 = vector.extract_strided_slice %57 {offsets = [0, 64], sizes = [2, 32], strides = [1, 1]} : vector<2x128xf32> to vector<2x32xf32>
    %71 = math.tanh %70 : vector<2x32xf32>
    %72 = vector.extract_strided_slice %57 {offsets = [0, 96], sizes = [2, 32], strides = [1, 1]} : vector<2x128xf32> to vector<2x32xf32>
    %73 = arith.negf %72 : vector<2x32xf32>
    %74 = math.exp %73 : vector<2x32xf32>
    %cst_36 = arith.constant 1.000000e+00 : f32
    %75 = vector.broadcast %cst_36 : f32 to vector<2x32xf32>
    %76 = arith.addf %75, %74 : vector<2x32xf32>
    %77 = arith.divf %75, %76 : vector<2x32xf32>
    %78 = arith.mulf %69, %17 : vector<2x32xf32>
    %79 = arith.mulf %63, %71 : vector<2x32xf32>
    %80 = arith.addf %78, %79 : vector<2x32xf32>
    %81 = math.tanh %80 : vector<2x32xf32>
    %82 = arith.mulf %77, %81 : vector<2x32xf32>
    %83 = arith.index_cast %c0_i32 : i32 to index
    %c0_37 = arith.constant 0 : index
    %c0_38 = arith.constant 0 : index
    %84 = vector.load %arg13[%83, %c0_37, %c0_38] : memref<7x2x32xf32, #tpu.memory_space<vmem>>, vector<1x2x32xf32>
    %85 = vector.shape_cast %84 : vector<1x2x32xf32> to vector<2x32xf32>
    %86 = vector.shape_cast %82 : vector<2x32xf32> to vector<1x2x32xf32>
    tpu.vector_store %arg13[%83, %c0_37, %c0_38], %86 {strides = array<i32>} : memref<7x2x32xf32, #tpu.memory_space<vmem>>, vector<1x2x32xf32>,
    %c1_i32 = arith.constant 1 : i32
    %cst_39 = arith.constant dense<0.000000e+00> : vector<2x32xf32>
    %87 = tpu.matmul %82, %18, %cst_39 {dimension_numbers = #tpu.dot_dimension_numbers<[1], [0], [0], [1], [0, 0, 1, 1], [], []>} : vector<2x32xf32>, vector<32x32xf32>, vector<2x32xf32> -> vector<2x32xf32>
    %88 = vector.broadcast %19 : vector<1x32xf32> to vector<2x32xf32>
    %89 = arith.addf %87, %88 : vector<2x32xf32>
    %90 = vector.shape_cast %89 : vector<2x32xf32> to vector<2x1x32xf32>
    %91 = vector.broadcast %90 : vector<2x1x32xf32> to vector<2x16x32xf32>
    %92 = arith.addf %7, %91 : vector<2x16x32xf32>
    %93 = math.tanh %92 : vector<2x16x32xf32>
    %94 = vector.shape_cast %20 : vector<1x32xf32> to vector<1x1x32xf32>
    %95 = vector.broadcast %94 : vector<1x1x32xf32> to vector<2x16x32xf32>
    %96 = arith.mulf %93, %95 : vector<2x16x32xf32>
    %cst_40 = arith.constant dense<0.000000e+00> : vector<2x16xf32>
    %97 = vector.multi_reduction <add>, %96, %cst_40 [2] : vector<2x16x32xf32> to vector<2x16xf32>
    %98 = vector.broadcast %21 : vector<1x1xf32> to vector<2x16xf32>
    %99 = arith.addf %97, %98 : vector<2x16xf32>
    %cst_41 = arith.constant dense<0xFF800000> : vector<2xf32>
    %100 = vector.multi_reduction <maximumf>, %99, %cst_41 [1] : vector<2x16xf32> to vector<2xf32>
    %101 = vector.shape_cast %100 : vector<2xf32> to vector<2x1xf32>
    %102 = vector.broadcast %101 : vector<2x1xf32> to vector<2x16xf32>
    %103 = arith.subf %99, %102 : vector<2x16xf32>
    %104 = math.exp %103 : vector<2x16xf32>
    %cst_42 = arith.constant dense<0.000000e+00> : vector<2xf32>
    %105 = vector.multi_reduction <add>, %104, %cst_42 [1] : vector<2x16xf32> to vector<2xf32>
    %106 = vector.shape_cast %105 : vector<2xf32> to vector<2x1xf32>
    %107 = vector.broadcast %106 : vector<2x1xf32> to vector<2x16xf32>
    %108 = arith.divf %104, %107 : vector<2x16xf32>
    %109 = vector.shape_cast %108 : vector<2x16xf32> to vector<2x16x1xf32>
    %110 = vector.broadcast %109 : vector<2x16x1xf32> to vector<2x16x32xf32>
    %111 = arith.mulf %0, %110 : vector<2x16x32xf32>
    %cst_43 = arith.constant dense<0.000000e+00> : vector<2x32xf32>
    %112 = vector.multi_reduction <add>, %111, %cst_43 [1] : vector<2x16x32xf32> to vector<2x32xf32>
    %113 = arith.index_cast %c1_i32 : i32 to index
    %c0_44 = arith.constant 0 : index
    %c0_45 = arith.constant 0 : index
    %114 = vector.load %arg2[%113, %c0_44, %c0_45] : memref<7x2x32xf32, #tpu.memory_space<vmem>>, vector<1x2x32xf32>
    %115 = vector.shape_cast %114 : vector<1x2x32xf32> to vector<2x32xf32>
    %116 = tpu.concatenate %115, %112, %82 in 1 : vector<2x32xf32>, vector<2x32xf32>, vector<2x32xf32> -> vector<2x96xf32>
    %cst_46 = arith.constant dense<0.000000e+00> : vector<2x128xf32>
    %117 = tpu.matmul %116, %22, %cst_46 {dimension_numbers = #tpu.dot_dimension_numbers<[1], [0], [0], [1], [0, 0, 1, 1], [], []>} : vector<2x96xf32>, vector<96x128xf32>, vector<2x128xf32> -> vector<2x128xf32>
    %118 = vector.broadcast %23 : vector<1x128xf32> to vector<2x128xf32>
    %119 = arith.addf %117, %118 : vector<2x128xf32>
    %120 = vector.extract_strided_slice %119 {offsets = [0, 0], sizes = [2, 32], strides = [1, 1]} : vector<2x128xf32> to vector<2x32xf32>
    %121 = arith.negf %120 : vector<2x32xf32>
    %122 = math.exp %121 : vector<2x32xf32>
    %cst_47 = arith.constant 1.000000e+00 : f32
    %123 = vector.broadcast %cst_47 : f32 to vector<2x32xf32>
    %124 = arith.addf %123, %122 : vector<2x32xf32>
    %125 = arith.divf %123, %124 : vector<2x32xf32>
    %126 = vector.extract_strided_slice %119 {offsets = [0, 32], sizes = [2, 32], strides = [1, 1]} : vector<2x128xf32> to vector<2x32xf32>
    %127 = arith.negf %126 : vector<2x32xf32>
    %128 = math.exp %127 : vector<2x32xf32>
    %cst_48 = arith.constant 1.000000e+00 : f32
    %129 = vector.broadcast %cst_48 : f32 to vector<2x32xf32>
    %130 = arith.addf %129, %128 : vector<2x32xf32>
    %131 = arith.divf %129, %130 : vector<2x32xf32>
    %132 = vector.extract_strided_slice %119 {offsets = [0, 64], sizes = [2, 32], strides = [1, 1]} : vector<2x128xf32> to vector<2x32xf32>
    %133 = math.tanh %132 : vector<2x32xf32>
    %134 = vector.extract_strided_slice %119 {offsets = [0, 96], sizes = [2, 32], strides = [1, 1]} : vector<2x128xf32> to vector<2x32xf32>
    %135 = arith.negf %134 : vector<2x32xf32>
    %136 = math.exp %135 : vector<2x32xf32>
    %cst_49 = arith.constant 1.000000e+00 : f32
    %137 = vector.broadcast %cst_49 : f32 to vector<2x32xf32>
    %138 = arith.addf %137, %136 : vector<2x32xf32>
    %139 = arith.divf %137, %138 : vector<2x32xf32>
    %140 = arith.mulf %131, %80 : vector<2x32xf32>
    %141 = arith.mulf %125, %133 : vector<2x32xf32>
    %142 = arith.addf %140, %141 : vector<2x32xf32>
    %143 = math.tanh %142 : vector<2x32xf32>
    %144 = arith.mulf %139, %143 : vector<2x32xf32>
    %145 = arith.index_cast %c1_i32 : i32 to index
    %c0_50 = arith.constant 0 : index
    %c0_51 = arith.constant 0 : index
    %146 = vector.load %arg13[%145, %c0_50, %c0_51] : memref<7x2x32xf32, #tpu.memory_space<vmem>>, vector<1x2x32xf32>
    %147 = vector.shape_cast %146 : vector<1x2x32xf32> to vector<2x32xf32>
    %148 = vector.shape_cast %144 : vector<2x32xf32> to vector<1x2x32xf32>
    tpu.vector_store %arg13[%145, %c0_50, %c0_51], %148 {strides = array<i32>} : memref<7x2x32xf32, #tpu.memory_space<vmem>>, vector<1x2x32xf32>,
    %c2_i32 = arith.constant 2 : i32
    %cst_52 = arith.constant dense<0.000000e+00> : vector<2x32xf32>
    %149 = tpu.matmul %144, %18, %cst_52 {dimension_numbers = #tpu.dot_dimension_numbers<[1], [0], [0], [1], [0, 0, 1, 1], [], []>} : vector<2x32xf32>, vector<32x32xf32>, vector<2x32xf32> -> vector<2x32xf32>
    %150 = vector.broadcast %19 : vector<1x32xf32> to vector<2x32xf32>
    %151 = arith.addf %149, %150 : vector<2x32xf32>
    %152 = vector.shape_cast %151 : vector<2x32xf32> to vector<2x1x32xf32>
    %153 = vector.broadcast %152 : vector<2x1x32xf32> to vector<2x16x32xf32>
    %154 = arith.addf %7, %153 : vector<2x16x32xf32>
    %155 = math.tanh %154 : vector<2x16x32xf32>
    %156 = vector.shape_cast %20 : vector<1x32xf32> to vector<1x1x32xf32>
    %157 = vector.broadcast %156 : vector<1x1x32xf32> to vector<2x16x32xf32>
    %158 = arith.mulf %155, %157 : vector<2x16x32xf32>
    %cst_53 = arith.constant dense<0.000000e+00> : vector<2x16xf32>
    %159 = vector.multi_reduction <add>, %158, %cst_53 [2] : vector<2x16x32xf32> to vector<2x16xf32>
    %160 = vector.broadcast %21 : vector<1x1xf32> to vector<2x16xf32>
    %161 = arith.addf %159, %160 : vector<2x16xf32>
    %cst_54 = arith.constant dense<0xFF800000> : vector<2xf32>
    %162 = vector.multi_reduction <maximumf>, %161, %cst_54 [1] : vector<2x16xf32> to vector<2xf32>
    %163 = vector.shape_cast %162 : vector<2xf32> to vector<2x1xf32>
    %164 = vector.broadcast %163 : vector<2x1xf32> to vector<2x16xf32>
    %165 = arith.subf %161, %164 : vector<2x16xf32>
    %166 = math.exp %165 : vector<2x16xf32>
    %cst_55 = arith.constant dense<0.000000e+00> : vector<2xf32>
    %167 = vector.multi_reduction <add>, %166, %cst_55 [1] : vector<2x16xf32> to vector<2xf32>
    %168 = vector.shape_cast %167 : vector<2xf32> to vector<2x1xf32>
    %169 = vector.broadcast %168 : vector<2x1xf32> to vector<2x16xf32>
    %170 = arith.divf %166, %169 : vector<2x16xf32>
    %171 = vector.shape_cast %170 : vector<2x16xf32> to vector<2x16x1xf32>
    %172 = vector.broadcast %171 : vector<2x16x1xf32> to vector<2x16x32xf32>
    %173 = arith.mulf %0, %172 : vector<2x16x32xf32>
    %cst_56 = arith.constant dense<0.000000e+00> : vector<2x32xf32>
    %174 = vector.multi_reduction <add>, %173, %cst_56 [1] : vector<2x16x32xf32> to vector<2x32xf32>
    %175 = arith.index_cast %c2_i32 : i32 to index
    %c0_57 = arith.constant 0 : index
    %c0_58 = arith.constant 0 : index
    %176 = vector.load %arg2[%175, %c0_57, %c0_58] : memref<7x2x32xf32, #tpu.memory_space<vmem>>, vector<1x2x32xf32>
    %177 = vector.shape_cast %176 : vector<1x2x32xf32> to vector<2x32xf32>
    %178 = tpu.concatenate %177, %174, %144 in 1 : vector<2x32xf32>, vector<2x32xf32>, vector<2x32xf32> -> vector<2x96xf32>
    %cst_59 = arith.constant dense<0.000000e+00> : vector<2x128xf32>
    %179 = tpu.matmul %178, %22, %cst_59 {dimension_numbers = #tpu.dot_dimension_numbers<[1], [0], [0], [1], [0, 0, 1, 1], [], []>} : vector<2x96xf32>, vector<96x128xf32>, vector<2x128xf32> -> vector<2x128xf32>
    %180 = vector.broadcast %23 : vector<1x128xf32> to vector<2x128xf32>
    %181 = arith.addf %179, %180 : vector<2x128xf32>
    %182 = vector.extract_strided_slice %181 {offsets = [0, 0], sizes = [2, 32], strides = [1, 1]} : vector<2x128xf32> to vector<2x32xf32>
    %183 = arith.negf %182 : vector<2x32xf32>
    %184 = math.exp %183 : vector<2x32xf32>
    %cst_60 = arith.constant 1.000000e+00 : f32
    %185 = vector.broadcast %cst_60 : f32 to vector<2x32xf32>
    %186 = arith.addf %185, %184 : vector<2x32xf32>
    %187 = arith.divf %185, %186 : vector<2x32xf32>
    %188 = vector.extract_strided_slice %181 {offsets = [0, 32], sizes = [2, 32], strides = [1, 1]} : vector<2x128xf32> to vector<2x32xf32>
    %189 = arith.negf %188 : vector<2x32xf32>
    %190 = math.exp %189 : vector<2x32xf32>
    %cst_61 = arith.constant 1.000000e+00 : f32
    %191 = vector.broadcast %cst_61 : f32 to vector<2x32xf32>
    %192 = arith.addf %191, %190 : vector<2x32xf32>
    %193 = arith.divf %191, %192 : vector<2x32xf32>
    %194 = vector.extract_strided_slice %181 {offsets = [0, 64], sizes = [2, 32], strides = [1, 1]} : vector<2x128xf32> to vector<2x32xf32>
    %195 = math.tanh %194 : vector<2x32xf32>
    %196 = vector.extract_strided_slice %181 {offsets = [0, 96], sizes = [2, 32], strides = [1, 1]} : vector<2x128xf32> to vector<2x32xf32>
    %197 = arith.negf %196 : vector<2x32xf32>
    %198 = math.exp %197 : vector<2x32xf32>
    %cst_62 = arith.constant 1.000000e+00 : f32
    %199 = vector.broadcast %cst_62 : f32 to vector<2x32xf32>
    %200 = arith.addf %199, %198 : vector<2x32xf32>
    %201 = arith.divf %199, %200 : vector<2x32xf32>
    %202 = arith.mulf %193, %142 : vector<2x32xf32>
    %203 = arith.mulf %187, %195 : vector<2x32xf32>
    %204 = arith.addf %202, %203 : vector<2x32xf32>
    %205 = math.tanh %204 : vector<2x32xf32>
    %206 = arith.mulf %201, %205 : vector<2x32xf32>
    %207 = arith.index_cast %c2_i32 : i32 to index
    %c0_63 = arith.constant 0 : index
    %c0_64 = arith.constant 0 : index
    %208 = vector.load %arg13[%207, %c0_63, %c0_64] : memref<7x2x32xf32, #tpu.memory_space<vmem>>, vector<1x2x32xf32>
    %209 = vector.shape_cast %208 : vector<1x2x32xf32> to vector<2x32xf32>
    %210 = vector.shape_cast %206 : vector<2x32xf32> to vector<1x2x32xf32>
    tpu.vector_store %arg13[%207, %c0_63, %c0_64], %210 {strides = array<i32>} : memref<7x2x32xf32, #tpu.memory_space<vmem>>, vector<1x2x32xf32>,
    %c3_i32 = arith.constant 3 : i32
    %cst_65 = arith.constant dense<0.000000e+00> : vector<2x32xf32>
    %211 = tpu.matmul %206, %18, %cst_65 {dimension_numbers = #tpu.dot_dimension_numbers<[1], [0], [0], [1], [0, 0, 1, 1], [], []>} : vector<2x32xf32>, vector<32x32xf32>, vector<2x32xf32> -> vector<2x32xf32>
    %212 = vector.broadcast %19 : vector<1x32xf32> to vector<2x32xf32>
    %213 = arith.addf %211, %212 : vector<2x32xf32>
    %214 = vector.shape_cast %213 : vector<2x32xf32> to vector<2x1x32xf32>
    %215 = vector.broadcast %214 : vector<2x1x32xf32> to vector<2x16x32xf32>
    %216 = arith.addf %7, %215 : vector<2x16x32xf32>
    %217 = math.tanh %216 : vector<2x16x32xf32>
    %218 = vector.shape_cast %20 : vector<1x32xf32> to vector<1x1x32xf32>
    %219 = vector.broadcast %218 : vector<1x1x32xf32> to vector<2x16x32xf32>
    %220 = arith.mulf %217, %219 : vector<2x16x32xf32>
    %cst_66 = arith.constant dense<0.000000e+00> : vector<2x16xf32>
    %221 = vector.multi_reduction <add>, %220, %cst_66 [2] : vector<2x16x32xf32> to vector<2x16xf32>
    %222 = vector.broadcast %21 : vector<1x1xf32> to vector<2x16xf32>
    %223 = arith.addf %221, %222 : vector<2x16xf32>
    %cst_67 = arith.constant dense<0xFF800000> : vector<2xf32>
    %224 = vector.multi_reduction <maximumf>, %223, %cst_67 [1] : vector<2x16xf32> to vector<2xf32>
    %225 = vector.shape_cast %224 : vector<2xf32> to vector<2x1xf32>
    %226 = vector.broadcast %225 : vector<2x1xf32> to vector<2x16xf32>
    %227 = arith.subf %223, %226 : vector<2x16xf32>
    %228 = math.exp %227 : vector<2x16xf32>
    %cst_68 = arith.constant dense<0.000000e+00> : vector<2xf32>
    %229 = vector.multi_reduction <add>, %228, %cst_68 [1] : vector<2x16xf32> to vector<2xf32>
    %230 = vector.shape_cast %229 : vector<2xf32> to vector<2x1xf32>
    %231 = vector.broadcast %230 : vector<2x1xf32> to vector<2x16xf32>
    %232 = arith.divf %228, %231 : vector<2x16xf32>
    %233 = vector.shape_cast %232 : vector<2x16xf32> to vector<2x16x1xf32>
    %234 = vector.broadcast %233 : vector<2x16x1xf32> to vector<2x16x32xf32>
    %235 = arith.mulf %0, %234 : vector<2x16x32xf32>
    %cst_69 = arith.constant dense<0.000000e+00> : vector<2x32xf32>
    %236 = vector.multi_reduction <add>, %235, %cst_69 [1] : vector<2x16x32xf32> to vector<2x32xf32>
    %237 = arith.index_cast %c3_i32 : i32 to index
    %c0_70 = arith.constant 0 : index
    %c0_71 = arith.constant 0 : index
    %238 = vector.load %arg2[%237, %c0_70, %c0_71] : memref<7x2x32xf32, #tpu.memory_space<vmem>>, vector<1x2x32xf32>
    %239 = vector.shape_cast %238 : vector<1x2x32xf32> to vector<2x32xf32>
    %240 = tpu.concatenate %239, %236, %206 in 1 : vector<2x32xf32>, vector<2x32xf32>, vector<2x32xf32> -> vector<2x96xf32>
    %cst_72 = arith.constant dense<0.000000e+00> : vector<2x128xf32>
    %241 = tpu.matmul %240, %22, %cst_72 {dimension_numbers = #tpu.dot_dimension_numbers<[1], [0], [0], [1], [0, 0, 1, 1], [], []>} : vector<2x96xf32>, vector<96x128xf32>, vector<2x128xf32> -> vector<2x128xf32>
    %242 = vector.broadcast %23 : vector<1x128xf32> to vector<2x128xf32>
    %243 = arith.addf %241, %242 : vector<2x128xf32>
    %244 = vector.extract_strided_slice %243 {offsets = [0, 0], sizes = [2, 32], strides = [1, 1]} : vector<2x128xf32> to vector<2x32xf32>
    %245 = arith.negf %244 : vector<2x32xf32>
    %246 = math.exp %245 : vector<2x32xf32>
    %cst_73 = arith.constant 1.000000e+00 : f32
    %247 = vector.broadcast %cst_73 : f32 to vector<2x32xf32>
    %248 = arith.addf %247, %246 : vector<2x32xf32>
    %249 = arith.divf %247, %248 : vector<2x32xf32>
    %250 = vector.extract_strided_slice %243 {offsets = [0, 32], sizes = [2, 32], strides = [1, 1]} : vector<2x128xf32> to vector<2x32xf32>
    %251 = arith.negf %250 : vector<2x32xf32>
    %252 = math.exp %251 : vector<2x32xf32>
    %cst_74 = arith.constant 1.000000e+00 : f32
    %253 = vector.broadcast %cst_74 : f32 to vector<2x32xf32>
    %254 = arith.addf %253, %252 : vector<2x32xf32>
    %255 = arith.divf %253, %254 : vector<2x32xf32>
    %256 = vector.extract_strided_slice %243 {offsets = [0, 64], sizes = [2, 32], strides = [1, 1]} : vector<2x128xf32> to vector<2x32xf32>
    %257 = math.tanh %256 : vector<2x32xf32>
    %258 = vector.extract_strided_slice %243 {offsets = [0, 96], sizes = [2, 32], strides = [1, 1]} : vector<2x128xf32> to vector<2x32xf32>
    %259 = arith.negf %258 : vector<2x32xf32>
    %260 = math.exp %259 : vector<2x32xf32>
    %cst_75 = arith.constant 1.000000e+00 : f32
    %261 = vector.broadcast %cst_75 : f32 to vector<2x32xf32>
    %262 = arith.addf %261, %260 : vector<2x32xf32>
    %263 = arith.divf %261, %262 : vector<2x32xf32>
    %264 = arith.mulf %255, %204 : vector<2x32xf32>
    %265 = arith.mulf %249, %257 : vector<2x32xf32>
    %266 = arith.addf %264, %265 : vector<2x32xf32>
    %267 = math.tanh %266 : vector<2x32xf32>
    %268 = arith.mulf %263, %267 : vector<2x32xf32>
    %269 = arith.index_cast %c3_i32 : i32 to index
    %c0_76 = arith.constant 0 : index
    %c0_77 = arith.constant 0 : index
    %270 = vector.load %arg13[%269, %c0_76, %c0_77] : memref<7x2x32xf32, #tpu.memory_space<vmem>>, vector<1x2x32xf32>
    %271 = vector.shape_cast %270 : vector<1x2x32xf32> to vector<2x32xf32>
    %272 = vector.shape_cast %268 : vector<2x32xf32> to vector<1x2x32xf32>
    tpu.vector_store %arg13[%269, %c0_76, %c0_77], %272 {strides = array<i32>} : memref<7x2x32xf32, #tpu.memory_space<vmem>>, vector<1x2x32xf32>,
    %c4_i32 = arith.constant 4 : i32
    %cst_78 = arith.constant dense<0.000000e+00> : vector<2x32xf32>
    %273 = tpu.matmul %268, %18, %cst_78 {dimension_numbers = #tpu.dot_dimension_numbers<[1], [0], [0], [1], [0, 0, 1, 1], [], []>} : vector<2x32xf32>, vector<32x32xf32>, vector<2x32xf32> -> vector<2x32xf32>
    %274 = vector.broadcast %19 : vector<1x32xf32> to vector<2x32xf32>
    %275 = arith.addf %273, %274 : vector<2x32xf32>
    %276 = vector.shape_cast %275 : vector<2x32xf32> to vector<2x1x32xf32>
    %277 = vector.broadcast %276 : vector<2x1x32xf32> to vector<2x16x32xf32>
    %278 = arith.addf %7, %277 : vector<2x16x32xf32>
    %279 = math.tanh %278 : vector<2x16x32xf32>
    %280 = vector.shape_cast %20 : vector<1x32xf32> to vector<1x1x32xf32>
    %281 = vector.broadcast %280 : vector<1x1x32xf32> to vector<2x16x32xf32>
    %282 = arith.mulf %279, %281 : vector<2x16x32xf32>
    %cst_79 = arith.constant dense<0.000000e+00> : vector<2x16xf32>
    %283 = vector.multi_reduction <add>, %282, %cst_79 [2] : vector<2x16x32xf32> to vector<2x16xf32>
    %284 = vector.broadcast %21 : vector<1x1xf32> to vector<2x16xf32>
    %285 = arith.addf %283, %284 : vector<2x16xf32>
    %cst_80 = arith.constant dense<0xFF800000> : vector<2xf32>
    %286 = vector.multi_reduction <maximumf>, %285, %cst_80 [1] : vector<2x16xf32> to vector<2xf32>
    %287 = vector.shape_cast %286 : vector<2xf32> to vector<2x1xf32>
    %288 = vector.broadcast %287 : vector<2x1xf32> to vector<2x16xf32>
    %289 = arith.subf %285, %288 : vector<2x16xf32>
    %290 = math.exp %289 : vector<2x16xf32>
    %cst_81 = arith.constant dense<0.000000e+00> : vector<2xf32>
    %291 = vector.multi_reduction <add>, %290, %cst_81 [1] : vector<2x16xf32> to vector<2xf32>
    %292 = vector.shape_cast %291 : vector<2xf32> to vector<2x1xf32>
    %293 = vector.broadcast %292 : vector<2x1xf32> to vector<2x16xf32>
    %294 = arith.divf %290, %293 : vector<2x16xf32>
    %295 = vector.shape_cast %294 : vector<2x16xf32> to vector<2x16x1xf32>
    %296 = vector.broadcast %295 : vector<2x16x1xf32> to vector<2x16x32xf32>
    %297 = arith.mulf %0, %296 : vector<2x16x32xf32>
    %cst_82 = arith.constant dense<0.000000e+00> : vector<2x32xf32>
    %298 = vector.multi_reduction <add>, %297, %cst_82 [1] : vector<2x16x32xf32> to vector<2x32xf32>
    %299 = arith.index_cast %c4_i32 : i32 to index
    %c0_83 = arith.constant 0 : index
    %c0_84 = arith.constant 0 : index
    %300 = vector.load %arg2[%299, %c0_83, %c0_84] : memref<7x2x32xf32, #tpu.memory_space<vmem>>, vector<1x2x32xf32>
    %301 = vector.shape_cast %300 : vector<1x2x32xf32> to vector<2x32xf32>
    %302 = tpu.concatenate %301, %298, %268 in 1 : vector<2x32xf32>, vector<2x32xf32>, vector<2x32xf32> -> vector<2x96xf32>
    %cst_85 = arith.constant dense<0.000000e+00> : vector<2x128xf32>
    %303 = tpu.matmul %302, %22, %cst_85 {dimension_numbers = #tpu.dot_dimension_numbers<[1], [0], [0], [1], [0, 0, 1, 1], [], []>} : vector<2x96xf32>, vector<96x128xf32>, vector<2x128xf32> -> vector<2x128xf32>
    %304 = vector.broadcast %23 : vector<1x128xf32> to vector<2x128xf32>
    %305 = arith.addf %303, %304 : vector<2x128xf32>
    %306 = vector.extract_strided_slice %305 {offsets = [0, 0], sizes = [2, 32], strides = [1, 1]} : vector<2x128xf32> to vector<2x32xf32>
    %307 = arith.negf %306 : vector<2x32xf32>
    %308 = math.exp %307 : vector<2x32xf32>
    %cst_86 = arith.constant 1.000000e+00 : f32
    %309 = vector.broadcast %cst_86 : f32 to vector<2x32xf32>
    %310 = arith.addf %309, %308 : vector<2x32xf32>
    %311 = arith.divf %309, %310 : vector<2x32xf32>
    %312 = vector.extract_strided_slice %305 {offsets = [0, 32], sizes = [2, 32], strides = [1, 1]} : vector<2x128xf32> to vector<2x32xf32>
    %313 = arith.negf %312 : vector<2x32xf32>
    %314 = math.exp %313 : vector<2x32xf32>
    %cst_87 = arith.constant 1.000000e+00 : f32
    %315 = vector.broadcast %cst_87 : f32 to vector<2x32xf32>
    %316 = arith.addf %315, %314 : vector<2x32xf32>
    %317 = arith.divf %315, %316 : vector<2x32xf32>
    %318 = vector.extract_strided_slice %305 {offsets = [0, 64], sizes = [2, 32], strides = [1, 1]} : vector<2x128xf32> to vector<2x32xf32>
    %319 = math.tanh %318 : vector<2x32xf32>
    %320 = vector.extract_strided_slice %305 {offsets = [0, 96], sizes = [2, 32], strides = [1, 1]} : vector<2x128xf32> to vector<2x32xf32>
    %321 = arith.negf %320 : vector<2x32xf32>
    %322 = math.exp %321 : vector<2x32xf32>
    %cst_88 = arith.constant 1.000000e+00 : f32
    %323 = vector.broadcast %cst_88 : f32 to vector<2x32xf32>
    %324 = arith.addf %323, %322 : vector<2x32xf32>
    %325 = arith.divf %323, %324 : vector<2x32xf32>
    %326 = arith.mulf %317, %266 : vector<2x32xf32>
    %327 = arith.mulf %311, %319 : vector<2x32xf32>
    %328 = arith.addf %326, %327 : vector<2x32xf32>
    %329 = math.tanh %328 : vector<2x32xf32>
    %330 = arith.mulf %325, %329 : vector<2x32xf32>
    %331 = arith.index_cast %c4_i32 : i32 to index
    %c0_89 = arith.constant 0 : index
    %c0_90 = arith.constant 0 : index
    %332 = vector.load %arg13[%331, %c0_89, %c0_90] : memref<7x2x32xf32, #tpu.memory_space<vmem>>, vector<1x2x32xf32>
    %333 = vector.shape_cast %332 : vector<1x2x32xf32> to vector<2x32xf32>
    %334 = vector.shape_cast %330 : vector<2x32xf32> to vector<1x2x32xf32>
    tpu.vector_store %arg13[%331, %c0_89, %c0_90], %334 {strides = array<i32>} : memref<7x2x32xf32, #tpu.memory_space<vmem>>, vector<1x2x32xf32>,
    %c5_i32 = arith.constant 5 : i32
    %cst_91 = arith.constant dense<0.000000e+00> : vector<2x32xf32>
    %335 = tpu.matmul %330, %18, %cst_91 {dimension_numbers = #tpu.dot_dimension_numbers<[1], [0], [0], [1], [0, 0, 1, 1], [], []>} : vector<2x32xf32>, vector<32x32xf32>, vector<2x32xf32> -> vector<2x32xf32>
    %336 = vector.broadcast %19 : vector<1x32xf32> to vector<2x32xf32>
    %337 = arith.addf %335, %336 : vector<2x32xf32>
    %338 = vector.shape_cast %337 : vector<2x32xf32> to vector<2x1x32xf32>
    %339 = vector.broadcast %338 : vector<2x1x32xf32> to vector<2x16x32xf32>
    %340 = arith.addf %7, %339 : vector<2x16x32xf32>
    %341 = math.tanh %340 : vector<2x16x32xf32>
    %342 = vector.shape_cast %20 : vector<1x32xf32> to vector<1x1x32xf32>
    %343 = vector.broadcast %342 : vector<1x1x32xf32> to vector<2x16x32xf32>
    %344 = arith.mulf %341, %343 : vector<2x16x32xf32>
    %cst_92 = arith.constant dense<0.000000e+00> : vector<2x16xf32>
    %345 = vector.multi_reduction <add>, %344, %cst_92 [2] : vector<2x16x32xf32> to vector<2x16xf32>
    %346 = vector.broadcast %21 : vector<1x1xf32> to vector<2x16xf32>
    %347 = arith.addf %345, %346 : vector<2x16xf32>
    %cst_93 = arith.constant dense<0xFF800000> : vector<2xf32>
    %348 = vector.multi_reduction <maximumf>, %347, %cst_93 [1] : vector<2x16xf32> to vector<2xf32>
    %349 = vector.shape_cast %348 : vector<2xf32> to vector<2x1xf32>
    %350 = vector.broadcast %349 : vector<2x1xf32> to vector<2x16xf32>
    %351 = arith.subf %347, %350 : vector<2x16xf32>
    %352 = math.exp %351 : vector<2x16xf32>
    %cst_94 = arith.constant dense<0.000000e+00> : vector<2xf32>
    %353 = vector.multi_reduction <add>, %352, %cst_94 [1] : vector<2x16xf32> to vector<2xf32>
    %354 = vector.shape_cast %353 : vector<2xf32> to vector<2x1xf32>
    %355 = vector.broadcast %354 : vector<2x1xf32> to vector<2x16xf32>
    %356 = arith.divf %352, %355 : vector<2x16xf32>
    %357 = vector.shape_cast %356 : vector<2x16xf32> to vector<2x16x1xf32>
    %358 = vector.broadcast %357 : vector<2x16x1xf32> to vector<2x16x32xf32>
    %359 = arith.mulf %0, %358 : vector<2x16x32xf32>
    %cst_95 = arith.constant dense<0.000000e+00> : vector<2x32xf32>
    %360 = vector.multi_reduction <add>, %359, %cst_95 [1] : vector<2x16x32xf32> to vector<2x32xf32>
    %361 = arith.index_cast %c5_i32 : i32 to index
    %c0_96 = arith.constant 0 : index
    %c0_97 = arith.constant 0 : index
    %362 = vector.load %arg2[%361, %c0_96, %c0_97] : memref<7x2x32xf32, #tpu.memory_space<vmem>>, vector<1x2x32xf32>
    %363 = vector.shape_cast %362 : vector<1x2x32xf32> to vector<2x32xf32>
    %364 = tpu.concatenate %363, %360, %330 in 1 : vector<2x32xf32>, vector<2x32xf32>, vector<2x32xf32> -> vector<2x96xf32>
    %cst_98 = arith.constant dense<0.000000e+00> : vector<2x128xf32>
    %365 = tpu.matmul %364, %22, %cst_98 {dimension_numbers = #tpu.dot_dimension_numbers<[1], [0], [0], [1], [0, 0, 1, 1], [], []>} : vector<2x96xf32>, vector<96x128xf32>, vector<2x128xf32> -> vector<2x128xf32>
    %366 = vector.broadcast %23 : vector<1x128xf32> to vector<2x128xf32>
    %367 = arith.addf %365, %366 : vector<2x128xf32>
    %368 = vector.extract_strided_slice %367 {offsets = [0, 0], sizes = [2, 32], strides = [1, 1]} : vector<2x128xf32> to vector<2x32xf32>
    %369 = arith.negf %368 : vector<2x32xf32>
    %370 = math.exp %369 : vector<2x32xf32>
    %cst_99 = arith.constant 1.000000e+00 : f32
    %371 = vector.broadcast %cst_99 : f32 to vector<2x32xf32>
    %372 = arith.addf %371, %370 : vector<2x32xf32>
    %373 = arith.divf %371, %372 : vector<2x32xf32>
    %374 = vector.extract_strided_slice %367 {offsets = [0, 32], sizes = [2, 32], strides = [1, 1]} : vector<2x128xf32> to vector<2x32xf32>
    %375 = arith.negf %374 : vector<2x32xf32>
    %376 = math.exp %375 : vector<2x32xf32>
    %cst_100 = arith.constant 1.000000e+00 : f32
    %377 = vector.broadcast %cst_100 : f32 to vector<2x32xf32>
    %378 = arith.addf %377, %376 : vector<2x32xf32>
    %379 = arith.divf %377, %378 : vector<2x32xf32>
    %380 = vector.extract_strided_slice %367 {offsets = [0, 64], sizes = [2, 32], strides = [1, 1]} : vector<2x128xf32> to vector<2x32xf32>
    %381 = math.tanh %380 : vector<2x32xf32>
    %382 = vector.extract_strided_slice %367 {offsets = [0, 96], sizes = [2, 32], strides = [1, 1]} : vector<2x128xf32> to vector<2x32xf32>
    %383 = arith.negf %382 : vector<2x32xf32>
    %384 = math.exp %383 : vector<2x32xf32>
    %cst_101 = arith.constant 1.000000e+00 : f32
    %385 = vector.broadcast %cst_101 : f32 to vector<2x32xf32>
    %386 = arith.addf %385, %384 : vector<2x32xf32>
    %387 = arith.divf %385, %386 : vector<2x32xf32>
    %388 = arith.mulf %379, %328 : vector<2x32xf32>
    %389 = arith.mulf %373, %381 : vector<2x32xf32>
    %390 = arith.addf %388, %389 : vector<2x32xf32>
    %391 = math.tanh %390 : vector<2x32xf32>
    %392 = arith.mulf %387, %391 : vector<2x32xf32>
    %393 = arith.index_cast %c5_i32 : i32 to index
    %c0_102 = arith.constant 0 : index
    %c0_103 = arith.constant 0 : index
    %394 = vector.load %arg13[%393, %c0_102, %c0_103] : memref<7x2x32xf32, #tpu.memory_space<vmem>>, vector<1x2x32xf32>
    %395 = vector.shape_cast %394 : vector<1x2x32xf32> to vector<2x32xf32>
    %396 = vector.shape_cast %392 : vector<2x32xf32> to vector<1x2x32xf32>
    tpu.vector_store %arg13[%393, %c0_102, %c0_103], %396 {strides = array<i32>} : memref<7x2x32xf32, #tpu.memory_space<vmem>>, vector<1x2x32xf32>,
    %c6_i32 = arith.constant 6 : i32
    %cst_104 = arith.constant dense<0.000000e+00> : vector<2x32xf32>
    %397 = tpu.matmul %392, %18, %cst_104 {dimension_numbers = #tpu.dot_dimension_numbers<[1], [0], [0], [1], [0, 0, 1, 1], [], []>} : vector<2x32xf32>, vector<32x32xf32>, vector<2x32xf32> -> vector<2x32xf32>
    %398 = vector.broadcast %19 : vector<1x32xf32> to vector<2x32xf32>
    %399 = arith.addf %397, %398 : vector<2x32xf32>
    %400 = vector.shape_cast %399 : vector<2x32xf32> to vector<2x1x32xf32>
    %401 = vector.broadcast %400 : vector<2x1x32xf32> to vector<2x16x32xf32>
    %402 = arith.addf %7, %401 : vector<2x16x32xf32>
    %403 = math.tanh %402 : vector<2x16x32xf32>
    %404 = vector.shape_cast %20 : vector<1x32xf32> to vector<1x1x32xf32>
    %405 = vector.broadcast %404 : vector<1x1x32xf32> to vector<2x16x32xf32>
    %406 = arith.mulf %403, %405 : vector<2x16x32xf32>
    %cst_105 = arith.constant dense<0.000000e+00> : vector<2x16xf32>
    %407 = vector.multi_reduction <add>, %406, %cst_105 [2] : vector<2x16x32xf32> to vector<2x16xf32>
    %408 = vector.broadcast %21 : vector<1x1xf32> to vector<2x16xf32>
    %409 = arith.addf %407, %408 : vector<2x16xf32>
    %cst_106 = arith.constant dense<0xFF800000> : vector<2xf32>
    %410 = vector.multi_reduction <maximumf>, %409, %cst_106 [1] : vector<2x16xf32> to vector<2xf32>
    %411 = vector.shape_cast %410 : vector<2xf32> to vector<2x1xf32>
    %412 = vector.broadcast %411 : vector<2x1xf32> to vector<2x16xf32>
    %413 = arith.subf %409, %412 : vector<2x16xf32>
    %414 = math.exp %413 : vector<2x16xf32>
    %cst_107 = arith.constant dense<0.000000e+00> : vector<2xf32>
    %415 = vector.multi_reduction <add>, %414, %cst_107 [1] : vector<2x16xf32> to vector<2xf32>
    %416 = vector.shape_cast %415 : vector<2xf32> to vector<2x1xf32>
    %417 = vector.broadcast %416 : vector<2x1xf32> to vector<2x16xf32>
    %418 = arith.divf %414, %417 : vector<2x16xf32>
    %419 = vector.shape_cast %418 : vector<2x16xf32> to vector<2x16x1xf32>
    %420 = vector.broadcast %419 : vector<2x16x1xf32> to vector<2x16x32xf32>
    %421 = arith.mulf %0, %420 : vector<2x16x32xf32>
    %cst_108 = arith.constant dense<0.000000e+00> : vector<2x32xf32>
    %422 = vector.multi_reduction <add>, %421, %cst_108 [1] : vector<2x16x32xf32> to vector<2x32xf32>
    %423 = arith.index_cast %c6_i32 : i32 to index
    %c0_109 = arith.constant 0 : index
    %c0_110 = arith.constant 0 : index
    %424 = vector.load %arg2[%423, %c0_109, %c0_110] : memref<7x2x32xf32, #tpu.memory_space<vmem>>, vector<1x2x32xf32>
    %425 = vector.shape_cast %424 : vector<1x2x32xf32> to vector<2x32xf32>
    %426 = tpu.concatenate %425, %422, %392 in 1 : vector<2x32xf32>, vector<2x32xf32>, vector<2x32xf32> -> vector<2x96xf32>
    %cst_111 = arith.constant dense<0.000000e+00> : vector<2x128xf32>
    %427 = tpu.matmul %426, %22, %cst_111 {dimension_numbers = #tpu.dot_dimension_numbers<[1], [0], [0], [1], [0, 0, 1, 1], [], []>} : vector<2x96xf32>, vector<96x128xf32>, vector<2x128xf32> -> vector<2x128xf32>
    %428 = vector.broadcast %23 : vector<1x128xf32> to vector<2x128xf32>
    %429 = arith.addf %427, %428 : vector<2x128xf32>
    %430 = vector.extract_strided_slice %429 {offsets = [0, 0], sizes = [2, 32], strides = [1, 1]} : vector<2x128xf32> to vector<2x32xf32>
    %431 = arith.negf %430 : vector<2x32xf32>
    %432 = math.exp %431 : vector<2x32xf32>
    %cst_112 = arith.constant 1.000000e+00 : f32
    %433 = vector.broadcast %cst_112 : f32 to vector<2x32xf32>
    %434 = arith.addf %433, %432 : vector<2x32xf32>
    %435 = arith.divf %433, %434 : vector<2x32xf32>
    %436 = vector.extract_strided_slice %429 {offsets = [0, 32], sizes = [2, 32], strides = [1, 1]} : vector<2x128xf32> to vector<2x32xf32>
    %437 = arith.negf %436 : vector<2x32xf32>
    %438 = math.exp %437 : vector<2x32xf32>
    %cst_113 = arith.constant 1.000000e+00 : f32
    %439 = vector.broadcast %cst_113 : f32 to vector<2x32xf32>
    %440 = arith.addf %439, %438 : vector<2x32xf32>
    %441 = arith.divf %439, %440 : vector<2x32xf32>
    %442 = vector.extract_strided_slice %429 {offsets = [0, 64], sizes = [2, 32], strides = [1, 1]} : vector<2x128xf32> to vector<2x32xf32>
    %443 = math.tanh %442 : vector<2x32xf32>
    %444 = vector.extract_strided_slice %429 {offsets = [0, 96], sizes = [2, 32], strides = [1, 1]} : vector<2x128xf32> to vector<2x32xf32>
    %445 = arith.negf %444 : vector<2x32xf32>
    %446 = math.exp %445 : vector<2x32xf32>
    %cst_114 = arith.constant 1.000000e+00 : f32
    %447 = vector.broadcast %cst_114 : f32 to vector<2x32xf32>
    %448 = arith.addf %447, %446 : vector<2x32xf32>
    %449 = arith.divf %447, %448 : vector<2x32xf32>
    %450 = arith.mulf %441, %390 : vector<2x32xf32>
    %451 = arith.mulf %435, %443 : vector<2x32xf32>
    %452 = arith.addf %450, %451 : vector<2x32xf32>
    %453 = math.tanh %452 : vector<2x32xf32>
    %454 = arith.mulf %449, %453 : vector<2x32xf32>
    %455 = arith.index_cast %c6_i32 : i32 to index
    %c0_115 = arith.constant 0 : index
    %c0_116 = arith.constant 0 : index
    %456 = vector.load %arg13[%455, %c0_115, %c0_116] : memref<7x2x32xf32, #tpu.memory_space<vmem>>, vector<1x2x32xf32>
    %457 = vector.shape_cast %456 : vector<1x2x32xf32> to vector<2x32xf32>
    %458 = vector.shape_cast %454 : vector<2x32xf32> to vector<1x2x32xf32>
    tpu.vector_store %arg13[%455, %c0_115, %c0_116], %458 {strides = array<i32>} : memref<7x2x32xf32, #tpu.memory_space<vmem>>, vector<1x2x32xf32>,
    %c7_i32 = arith.constant 7 : i32
    %c0_117 = arith.constant 0 : index
    %c0_118 = arith.constant 0 : index
    %459 = vector.load %arg14[%c0_117, %c0_118] : memref<2x16xf32, #tpu.memory_space<vmem>>, vector<2x16xf32>
    tpu.vector_store %arg14[%c0_117, %c0_118], %418 {strides = array<i32>} : memref<2x16xf32, #tpu.memory_space<vmem>>, vector<2x16xf32>,
    return
  }
  func.func @transform_0(%arg0: i32) -> (i32, i32, i32) {
    %c0_i32 = arith.constant 0 : i32
    %c0_i32_0 = arith.constant 0 : i32
    %c0_i32_1 = arith.constant 0 : i32
    %c0_i32_2 = arith.constant 0 : i32
    return %c0_i32, %c0_i32_0, %c0_i32_1 : i32, i32, i32
  }
  func.func @transform_1(%arg0: i32) -> (i32, i32, i32) {
    %c0_i32 = arith.constant 0 : i32
    %c0_i32_0 = arith.constant 0 : i32
    %c0_i32_1 = arith.constant 0 : i32
    %c0_i32_2 = arith.constant 0 : i32
    return %c0_i32, %c0_i32_0, %c0_i32_1 : i32, i32, i32
  }
  func.func @transform_2(%arg0: i32) -> (i32, i32) {
    %c0_i32 = arith.constant 0 : i32
    %c0_i32_0 = arith.constant 0 : i32
    %c0_i32_1 = arith.constant 0 : i32
    return %c0_i32, %c0_i32_0 : i32, i32
  }
  func.func @transform_3(%arg0: i32) -> (i32, i32) {
    %c0_i32 = arith.constant 0 : i32
    %c0_i32_0 = arith.constant 0 : i32
    %c0_i32_1 = arith.constant 0 : i32
    return %c0_i32, %c0_i32_0 : i32, i32
  }
  func.func @transform_4(%arg0: i32) -> (i32, i32) {
    %c0_i32 = arith.constant 0 : i32
    %c0_i32_0 = arith.constant 0 : i32
    %c0_i32_1 = arith.constant 0 : i32
    return %c0_i32, %c0_i32_0 : i32, i32
  }
  func.func @transform_5(%arg0: i32) -> (i32, i32) {
    %c0_i32 = arith.constant 0 : i32
    %c0_i32_0 = arith.constant 0 : i32
    %c0_i32_1 = arith.constant 0 : i32
    return %c0_i32, %c0_i32_0 : i32, i32
  }
  func.func @transform_6(%arg0: i32) -> (i32, i32) {
    %c0_i32 = arith.constant 0 : i32
    %c0_i32_0 = arith.constant 0 : i32
    %c0_i32_1 = arith.constant 0 : i32
    return %c0_i32, %c0_i32_0 : i32, i32
  }
  func.func @transform_7(%arg0: i32) -> (i32, i32) {
    %c0_i32 = arith.constant 0 : i32
    %c0_i32_0 = arith.constant 0 : i32
    %c0_i32_1 = arith.constant 0 : i32
    return %c0_i32, %c0_i32_0 : i32, i32
  }
  func.func @transform_8(%arg0: i32) -> (i32, i32) {
    %c0_i32 = arith.constant 0 : i32
    %c0_i32_0 = arith.constant 0 : i32
    %c0_i32_1 = arith.constant 0 : i32
    return %c0_i32, %c0_i32_0 : i32, i32
  }
  func.func @transform_9(%arg0: i32) -> (i32, i32) {
    %c0_i32 = arith.constant 0 : i32
    %c0_i32_0 = arith.constant 0 : i32
    %c0_i32_1 = arith.constant 0 : i32
    return %c0_i32, %c0_i32_0 : i32, i32
  }
  func.func @transform_10(%arg0: i32) -> (i32, i32) {
    %c0_i32 = arith.constant 0 : i32
    %c0_i32_0 = arith.constant 0 : i32
    %c0_i32_1 = arith.constant 0 : i32
    return %c0_i32, %c0_i32_0 : i32, i32
  }
  func.func @transform_11(%arg0: i32) -> (i32, i32) {
    %c0_i32 = arith.constant 0 : i32
    %c0_i32_0 = arith.constant 0 : i32
    %c0_i32_1 = arith.constant 0 : i32
    return %c0_i32, %c0_i32_0 : i32, i32
  }
  func.func @transform_12(%arg0: i32) -> (i32, i32, i32) {
    %c0_i32 = arith.constant 0 : i32
    %c0_i32_0 = arith.constant 0 : i32
    %c0_i32_1 = arith.constant 0 : i32
    %c0_i32_2 = arith.constant 0 : i32
    return %c0_i32, %c0_i32_0, %c0_i32_1 : i32, i32, i32
  }
  func.func @transform_13(%arg0: i32) -> (i32, i32) {
    %c0_i32 = arith.constant 0 : i32
    %c0_i32_0 = arith.constant 0 : i32
    %c0_i32_1 = arith.constant 0 : i32
    return %c0_i32, %c0_i32_0 : i32, i32
  }
}

</mosaic_0001>

<bundles_post_ra>
// kernel: decoder_forward.3
= control target key start
LH: loop header
LB: loop body
LE: loop exit
PB: predicated region body
PF: predicated region fallthrough
CT: control target
= control target key end

     0   :  { %vm27_vm0 = vcmask 261120   ;;  %s184_s1 = inlined_call_operand.vmem [shape: f32[32,128], index: 1, kind: input, shape index: {}]   ;;  %s185_s0 = inlined_call_operand.vmem [shape: f32[14,32], index: 0, kind: input, shape index: {}]   ;;  %s186_s2 = inlined_call_operand.vmem [shape: f32[1,128], index: 2, kind: input, shape index: {}]   ;;  %s187_s3 = inlined_call_operand.vmem [shape: f32[14,128], index: 3, kind: output, shape index: {}]  }
   0x1   :  { %v19_v0 = vld [vmem:[%s184_s1 + $0x18] sm:$0xff]  ;;  %v18_v1 = vld [vmem:[%s184_s1 + $0x10] sm:$0xff]  ;;  %v14_v2 = vld [vmem:[%s185_s0] sm:$0xff] }
   0x2   :  { %124 = vmatprep.subr.mxu0 %v19_v0  ;;  %v17_v3 = vld [vmem:[%s184_s1 + $0x8] sm:$0xff]  ;;  %132 = vmatprep.mubr.msk.f32.mxu0 %vm27_vm0, %v14_v2  ;;  %v16_v4 = vld [vmem:[%s184_s1] sm:$0xff] }
   0x3   :  { %125 = vmatpush3.msra.mxu0 %v19_v0  ;;  %v15_v5 = vld [vmem:[%s185_s0 + $0x8] sm:$0x3f]  ;;  %v115_v6 = vld [vmem:[%s186_s2] ss:$0 sm:$0xff] }
   0x4   :  { %126 = vmatprep.subr.mxu0 %v18_v1 }
   0x5   :  { %127 = vmatpush3.msra.mxu0 %v18_v1 }
   0x6   :  { %128 = vmatprep.subr.mxu0 %v17_v3 }
   0x7   :  { %129 = vmatpush3.msra.mxu0 %v17_v3 }
   0x8   :  { %130 = vmatprep.subr.mxu0 %v16_v4 }
   0x9   :  { %131 = vmatpush3.msra.mxu0 %v16_v4 }
   0xa   :  { %133 = vmatmul.mubr.msk.f32.vlgmr.msra.gmra.mxu0 %vm27_vm0, %v15_v5 }
  0xca   :  { %v134_v7 = vpop.f32.mrf.mxu0 }
  0xcb   :  { %v106_v8 = vadd.f32 %v134_v7, %v115_v6 }
  0xcc   :  { %v100_v9 = vpop.f32.mrf.mxu0 }
  0xcd   :  { %110 = vst [vmem:[%s187_s3 + $0x8] sm:$0x3f] %v106_v8  ;;  %v101_v10 = vadd.f32 %v115_v6, %v100_v9 }
  0xcf   :  { %109 = vst [vmem:[%s187_s3] sm:$0xff] %v101_v10 }

// kernel: decoder_forward.2
= control target key start
LH: loop header
LB: loop body
LE: loop exit
PB: predicated region body
PF: predicated region fallthrough
CT: control target
= control target key end

     0   :  { %s5084_s0 = inlined_call_operand.vmem [shape: f32[2,16,32], index: 0, kind: input, shape index: {}]   ;;  %s5085_s1 = inlined_call_operand.vmem [shape: f32[7,2,32], index: 1, kind: input, shape index: {}]   ;;  %s5086_s2 = inlined_call_operand.vmem [shape: f32[32,32], index: 2, kind: input, shape index: {}]   ;;  %s5087_s3 = inlined_call_operand.vmem [shape: f32[1,32], index: 3, kind: input, shape index: {}]   ;;  %s5088_s4 = inlined_call_operand.vmem [shape: f32[32,32], index: 4, kind: input, shape index: {}]   ;;  %s5089_s5 = inlined_call_operand.vmem [shape: f32[1,32], index: 5, kind: input, shape index: {}]   ;;  %s5090_s6 = inlined_call_operand.vmem [shape: f32[1,32], index: 6, kind: input, shape index: {}]   ;;  %s5091_s7 = inlined_call_operand.<no memory space> [shape: f32[1,1], index: 7, kind: input, shape index: {}]   ;;  %s5092_s8 = inlined_call_operand.vmem [shape: f32[96,128], index: 8, kind: input, shape index: {}]   ;;  %s5093_s9 = inlined_call_operand.vmem [shape: f32[1,128], index: 9, kind: input, shape index: {}]   ;;  %s5094_s10 = inlined_call_operand.vmem [shape: f32[32,64], index: 10, kind: input, shape index: {}]   ;;  %s5095_s11 = inlined_call_operand.vmem [shape: f32[1,64], index: 11, kind: input, shape index: {}]   ;;  %s5096_s12 = inlined_call_operand.vmem [shape: f32[7,2,32], index: 12, kind: output, shape index: {0}]   ;;  %s5097_s13 = inlined_call_operand.hbm [shape: f32[2,16], index: 13, kind: output, shape index: {1}]  }
   0x1   :  { %v19_v0 = vstv %s5091_s7 }
   0x2   :  { %20 = vst [vmem:[#allocation2] sm:$0x1] %v19_v0 }
   0x3   :  { %v53_v1 = vld [vmem:[%s5086_s2 + $0x18] sm:$0xff]  ;;  %v52_v2 = vld [vmem:[%s5086_s2 + $0x10] sm:$0xff]  ;;  %vm61_vm0 = vcmask 261120   ;;  %v3960_v3 = vld [vmem:[%s5084_s0] sm:$0xff]  ;;  %v3870_v5 = vmov 0.0   ;;  %vm3871_vm1 = vmmov 0  }
   0x4   :  { %3321 = vmatprep.subr.mxu0 %v53_v1  ;;  %v3965_v4 = vld [vmem:[%s5084_s0 + $0x8] sm:$0xff]  ;;  %3357 = vmatprep.subr.mxu1 %v3870_v5  ;;  %v3976_v7 = vld [vmem:[%s5084_s0 + $0x10] sm:$0xff]  ;;  %v3981_v8 = vld [vmem:[%s5084_s0 + $0x18] sm:$0xff]  ;;  %v159_v9 = vsel %vm61_vm0, %v3960_v3, 0.0 }
   0x5   :  { %3322 = vmatpush3.msra.mxu0 %v53_v1  ;;  %v51_v6 = vld [vmem:[%s5086_s2 + $0x8] sm:$0xff]  ;;  %3329 = vmatprep.mubr.msk.f32.mxu0 %vm61_vm0, %v3960_v3  ;;  %v160_v10 = vsel %vm61_vm0, %v3965_v4, 0.0  ;;  %v168_v12 = vsel %vm61_vm0, %v3976_v7, 0.0  ;;  %v169_v13 = vsel %vm61_vm0, %v3981_v8, 0.0  ;;  %v50_v14 = vld [vmem:[%s5086_s2] sm:$0xff] }
   0x6   :  { %3323 = vmatprep.subr.mxu0 %v52_v2  ;;  %v161_v11 = vadd.f32 %v160_v10, %v159_v9  ;;  %3381 = vmatprep.mubr.msk.f32.mxu1 %vm3871_vm1, %v3870_v5  ;;  %v170_v15 = vadd.f32 %v169_v13, %v168_v12 }
   0x7   :  { %3324 = vmatpush3.msra.mxu0 %v52_v2 }
   0x8   :  { %21 = vsyncpa [#allocation4], 0  ;;  %3325 = vmatprep.subr.mxu0 %v51_v6  ;;  %v162_v16 = vrot.slane %v161_v11, 4  ;;  %v171_v17 = vrot.slane %v170_v15, 4  ;;  %v182_v18 = vld [vmem:[%s5094_s10 + $0x18] sm:$0xff]  ;;  %v181_v21 = vld [vmem:[%s5094_s10 + $0x10] sm:$0xff]  ;;  %v369_v50 = vlaneseq }
   0x9   :  { %3326 = vmatpush3.msra.mxu0 %v51_v6  ;;  %v180_v24 = vld [vmem:[%s5094_s10 + $0x8] sm:$0xff]  ;;  %v179_v27 = vld [vmem:[%s5094_s10] sm:$0xff]  ;;  %vm192_vm2 = vcmask 1041409   ;;  %v4028_v35 = vld [vmem:[%s5088_s4 + $0x18] sm:$0xff]  ;;  %v3872_v47 = vmov 0   ;;  %vm456_vm3 = vcmask 130112  }
   0xa   :  { %3327 = vmatprep.subr.mxu0 %v50_v14  ;;  %v163_v19 = vadd.f32 %v162_v16, %v161_v11  ;;  %v172_v20 = vadd.f32 %v171_v17, %v170_v15  ;;  %v4033_v36 = vld [vmem:[%s5088_s4 + $0x10] sm:$0xff]  ;;  %v4042_v37 = vld [vmem:[%s5088_s4 + $0x8] sm:$0xff]  ;;  %v4049_v38 = vld [vmem:[%s5088_s4] sm:$0xff]  ;;  %3620 = vset.pattern.permute.xlu0 %v3872_v47  ;;  %v3873_v48 = vmov 1966171168   ;;  %v4070_v52 = vshrl.u32 %v369_v50, 7 }
   0xb   :  { %3328 = vmatpush3.msra.mxu0 %v50_v14  ;;  %v3143_v43 = vld [vmem:[%s5095_s11] ss:$0 sm:$0xff]  ;;  %3621 = vset.pattern.permute.xlu1 %v3872_v47  ;;  %v367_v49 = vunpack.c.l.s4 %v3873_v48  ;;  %vm469_vm4 = vcmask 123904   ;;  %s3874_s28 = smov 32   ;;  %s3875_s29 = smov 64   ;;  %vm605_vm5 = vcmask 523264  }
   0xc   :  { %3330 = vmatmul.mubr.msk.f32.vlgmr.msra.gmra.mxu0 %vm61_vm0, %v3965_v4  ;;  %3335 = vmatprep.subr.mxu0 %v3870_v5  ;;  %v164_v22 = vrot.slane %v163_v19, 2  ;;  %v173_v23 = vrot.slane %v172_v20, 2  ;;  %v4075_v53 = vld [vmem:[%s5089_s5] ss:$0 sm:$0xff]  ;;  %v4083_v59 = vsub.s32 0, %v4070_v52  ;;  %vm613_vm6 = vcmask 785408  }
   0xd   :  { %3336 = vmatpush3.msra.mxu0 %v182_v18  ;;  %3332 = vmatprep.mubr.msk.f32.mxu0 %vm61_vm0, %v3976_v7  ;;  %v368_v51 = vunpack.c.0.s8 %v367_v49  ;;  %v3138_v60 = vld [vmem:[%s5087_s3] ss:$0 sm:$0xff]  ;;  %vm715_vm7 = vcmask 254976   ;;  %s3876_s7 = smov 96  }
   0xe   :  { %3337 = vmatprep.subr.mxu0 %v3870_v5  ;;  %v165_v25 = vadd.f32 %v164_v22, %v163_v19  ;;  %v174_v26 = vadd.f32 %v173_v23, %v172_v20  ;;  %v4107_v15 = vld [vmem:[%s5090_s6] ss:$0 sm:$0xff] }
   0xf   :  { %3338 = vmatpush3.msra.mxu0 %v181_v21  ;;  %v4078_v54 = vsub.s32 %v368_v51, %v4070_v52 }
  0x10   :  { %3333 = vmatmul.mubr.msk.f32.gmra.mxu0 %vm61_vm0, %v3981_v8  ;;  %3339 = vmatprep.subr.mxu0 %v3870_v5  ;;  %v166_v28 = vrot.slane %v165_v25, 1  ;;  %v175_v29 = vrot.slane %v174_v26, 1 }
  0x11   :  { %3340 = vmatpush3.msra.mxu0 %v180_v24  ;;  %3343 = vmatprep.mubr.msk.f32.mxu0 %vm3871_vm1, %v3870_v5 }
  0x12   :  { %3341 = vmatprep.subr.mxu0 %v3870_v5  ;;  %v167_v30 = vadd.f32 %v166_v28, %v165_v25  ;;  %v176_v31 = vadd.f32 %v175_v29, %v174_v26  ;;  %v3148_v28 = vld [vmem:[#allocation2] ss:$0 sm:$0xff] }
  0x13   :  { %3342 = vmatpush3.msra.mxu0 %v179_v27 }
  0x14   :  { %v177_v32 = vmul.f32 0.0625, %v167_v30  ;;  %3346 = vmatprep.subr.mxu0 %v3870_v5  ;;  %v178_v33 = vmul.f32 0.0625, %v176_v31  ;;  %v446_v30 = vand.u32 127, %v369_v50 }
  0x16   :  { %v193_v34 = vsel %vm192_vm2, %v178_v33, %v177_v32  ;;  %v451_v32 = vadd.s32 4294967288, %v446_v30 }
  0x17   :  { %3344 = vmatmul.mubr.msk.f32.vlgmr.msra.gmra.mxu0 %vm61_vm0, %v193_v34  ;;  %v4118_v34 = vsub.s32 %v446_v30, %v4070_v52 }
  0x18   :  { %3354 = vmatprep.mubr.msk.f32.mxu0 %vm3871_vm1, %v3870_v5  ;;  %3347 = vmatpush3.msra.mxu0 %v4028_v35 }
  0x19   :  { %3348 = vmatprep.subr.mxu0 %v3870_v5 }
  0x1a   :  { %3349 = vmatpush3.msra.mxu0 %v4033_v36 }
  0x1b   :  { %3350 = vmatprep.subr.mxu0 %v3870_v5 }
  0x1c   :  { %3351 = vmatpush3.msra.mxu0 %v4042_v37 }
  0x1d   :  { %3352 = vmatprep.subr.mxu0 %v3870_v5 }
  0x1e   :  { %3353 = vmatpush3.msra.mxu0 %v4049_v38 }
  0x1f   :  { %3384 = vmatprep.subr.mxu0 %v3870_v5 }
  0xcc   :  { %v3331_v39 = vpop.f32.mrf.mxu0 }
  0xcd   :  { %v4089_v63 = vadd.f32 %v3331_v39, %v3138_v60  ;;  %v4121_v39 = vsub.s32 %v451_v32, %v4070_v52 }
  0xce   :  { %v140_v40 = vpop.f32.mrf.mxu0 }
  0xcf   :  { %v4091_v0 = vadd.f32 %v3138_v60, %v140_v40 }
  0xd0   :  { %v3334_v41 = vpop.f32.mrf.mxu0 }
  0xd1   :  { %v4095_v6 = vadd.f32 %v3334_v41, %v3138_v60 }
  0xd2   :  { %v150_v42 = vpop.f32.mrf.mxu0 }
  0xd3   :  { %v4097_v9 = vadd.f32 %v3138_v60, %v150_v42 }
  0xd7   :  { %v262_v44 = vpop.f32.mrf.mxu0 }
  0xd8   :  { %v4056_v45 = vadd.f32 %v3143_v43, %v262_v44 }
  0xd9   :  { %v3345_v46 = vpop.f32.mrf.mxu0 }
  0xda   :  { %3355 = vmatmul.mubr.msk.f32.vlgmr.msra.gmra.mxu0 %vm61_vm0, %v4056_v45 }
  0xdb   :  { %3385 = vmatpush3.msra.mxu0 %v4028_v35  ;;  %3392 = vmatprep.mubr.msk.f32.mxu0 %vm3871_vm1, %v3870_v5 }
  0xdc   :  { %3386 = vmatprep.subr.mxu0 %v3870_v5 }
  0xdd   :  { %3387 = vmatpush3.msra.mxu0 %v4033_v36 }
  0xde   :  { %3388 = vmatprep.subr.mxu0 %v3870_v5 }
  0xdf   :  { %3389 = vmatpush3.msra.mxu0 %v4042_v37 }
  0xe0   :  { %3390 = vmatprep.subr.mxu0 %v3870_v5 }
  0xe1   :  { %3391 = vmatpush3.msra.mxu0 %v4049_v38 }
  0xe2   :  { %3395 = vmatprep.subr.mxu0 %v3870_v5 }
 0x19a   :  { %v361_v55 = vpop.f32.mrf.mxu0 }
 0x19b   :  { %v362_v56 = vadd.f32 %v4075_v53, %v361_v55 }
 0x19c   :  { %v3356_v57 = vpop.f32.mrf.mxu0 }
 0x19d   :  { %v372_v58 = vrot.slane %v362_v56, %v4078_v54 }
 0x19f   :  { %v373_v61 = vcombine.high %v372_v58, %v372_v58  ;;  %v380_v62 = vrot.slane %v372_v58, %v4078_v54  ;;  %v4138_v58 = vsub.s32 1, %v4070_v52 }
 0x1a1   :  { %v387_v1 = vrot.slane %v373_v61, %v4078_v54  ;;  %v391_v2 = vrot.slane %v380_v62, %v4083_v59 }
 0x1a3   :  { %v395_v10 = vrot.slane %v387_v1, %v4083_v59  ;;  %v398_v11 = vadd.f32 %v391_v2, %v4091_v0  ;;  %v399_v12 = vadd.f32 %v391_v2, %v4089_v63 }
 0x1a5   :  { %v400_v13 = vadd.f32 %v395_v10, %v4097_v9  ;;  %v401_v14 = vadd.f32 %v395_v10, %v4095_v6  ;;  %3622 = vtanh.f32 %v398_v11 }
 0x1a6   :  { %3624 = vtanh.f32 %v399_v12 }
 0x1a7   :  { %3626 = vtanh.f32 %v400_v13 }
 0x1a8   :  { %3628 = vtanh.f32 %v401_v14 }
 0x1b2   :  { %v3623_v16 = vpop.eup %3622 }
 0x1b3   :  { %v3625_v17 = vpop.eup %3624  ;;  %v412_v18 = vmul.f32 %v3623_v16, %v4107_v15 }
 0x1b4   :  { %v3627_v19 = vpop.eup %3626  ;;  %v413_v23 = vmul.f32 %v3625_v17, %v4107_v15 }
 0x1b5   :  { %v3629_v20 = vpop.eup %3628  ;;  %v416_v21 = vsel %vm61_vm0, %v412_v18, 0.0  ;;  %v414_v22 = vmul.f32 %v3627_v19, %v4107_v15 }
 0x1b6   :  { %417 = vadd.xlane.f32.xlu0 %v416_v21  ;;  %v415_v25 = vmul.f32 %v3629_v20, %v4107_v15  ;;  %v419_v26 = vsel %vm61_vm0, %v413_v23, 0.0 }
 0x1b7   :  { %v422_v24 = vsel %vm61_vm0, %v414_v22, 0.0 }
 0x1b8   :  { %423 = vadd.xlane.f32.xlu1 %v422_v24  ;;  %v425_v27 = vsel %vm61_vm0, %v415_v25, 0.0 }
 0x1ba   :  { %420 = vadd.xlane.f32.xlu0 %v419_v26 }
 0x1bc   :  { %426 = vadd.xlane.f32.xlu1 %v425_v27 }
 0x1d0   :  { %434 = vperm.xlu0 %3620, %v3148_v28  }
 0x23f   :  { %v418_v29 = vpop.xlane.xlu0 %417 }
 0x241   :  { %v424_v31 = vpop.xlane.xlu1 %423 }
 0x243   :  { %v421_v33 = vpop.xlane.xlu0 %420 }
 0x245   :  { %v427_v40 = vpop.xlane.xlu1 %426 }
 0x24b   :  { %v4123_v41 = vpop.permute.xlu0 %434 }
 0x24c   :  { %v437_v42 = vadd.f32 %v4123_v41, %v418_v29  ;;  %v438_v43 = vadd.f32 %v4123_v41, %v421_v33  ;;  %v439_v44 = vadd.f32 %v4123_v41, %v424_v31  ;;  %v440_v46 = vadd.f32 %v4123_v41, %v427_v40 }
 0x24e   :  { %v450_v47 = vrot.slane %v437_v42, %v4118_v34  ;;  %v455_v48 = vrot.slane %v438_v43, %v4121_v39  ;;  %v461_v49 = vrot.slane %v439_v44, %v4118_v34  ;;  %v465_v50 = vrot.slane %v440_v46, %v4121_v39 }
 0x250   :  { %v457_v51 = vsel %vm456_vm3, %v455_v48, %v450_v47  ;;  %v466_v55 = vsel %vm456_vm3, %v465_v50, %v461_v49  ;;  %v4155_v49 = vld [vmem:[%s5092_s8 + $0x58] sm:$0xff]  ;;  %v4160_v50 = vld [vmem:[%s5092_s8 + $0x50] sm:$0xff] }
 0x251   :  { %v467_v56 = vsel %vm192_vm2, %v466_v55, %v457_v51  ;;  %3358 = vmatpush3.msra.mxu1 %v4155_v49  ;;  %v4167_v51 = vld [vmem:[%s5092_s8 + $0x48] sm:$0xff]  ;;  %v4174_v55 = vld [vmem:[%s5092_s8 + $0x40] sm:$0xff] }
 0x252   :  { %v470_v57 = vsel %vm469_vm4, %v467_v56, -inf  ;;  %3359 = vmatprep.subr.mxu1 %v3870_v5  ;;  %v4181_v56 = vld [vmem:[%s5092_s8 + $0x38] sm:$0xff] }
 0x253   :  { %471 = vmax.xlane.f32.xlu1 %v470_v57  ;;  %3360 = vmatpush3.msra.mxu1 %v4160_v50  ;;  %v4188_v57 = vld [vmem:[%s5092_s8 + $0x30] sm:$0xff] }
 0x254   :  { %3361 = vmatprep.subr.mxu1 %v3870_v5 }
 0x255   :  { %3362 = vmatpush3.msra.mxu1 %v4167_v51 }
 0x256   :  { %3363 = vmatprep.subr.mxu1 %v3870_v5 }
 0x257   :  { %3364 = vmatpush3.msra.mxu1 %v4174_v55 }
 0x258   :  { %3365 = vmatprep.subr.mxu1 %v3870_v5 }
 0x259   :  { %3366 = vmatpush3.msra.mxu1 %v4181_v56 }
 0x25a   :  { %3367 = vmatprep.subr.mxu1 %v3870_v5 }
 0x25b   :  { %3368 = vmatpush3.msra.mxu1 %v4188_v57 }
 0x25c   :  { %3369 = vmatprep.subr.mxu1 %v3870_v5 }
 0x2dc   :  { %v472_v60 = vpop.xlane.xlu1 %471 }
 0x2dd   :  { %v477_v61 = vrot.slane %v472_v60, %v4083_v59  ;;  %v481_v62 = vrot.slane %v472_v60, %v4138_v58  ;;  %v4195_v60 = vld [vmem:[%s5092_s8 + $0x28] sm:$0xff] }
 0x2de   :  { %3370 = vmatpush3.msra.mxu1 %v4195_v60 }
 0x2df   :  { %v484_v1 = vsub.f32 %v437_v42, %v477_v61  ;;  %v485_v2 = vsub.f32 %v438_v43, %v477_v61  ;;  %v486_v11 = vsub.f32 %v439_v44, %v481_v62  ;;  %v487_v13 = vsub.f32 %v440_v46, %v481_v62  ;;  %v4202_v61 = vld [vmem:[%s5092_s8 + $0x20] sm:$0xff]  ;;  %3371 = vmatprep.subr.mxu1 %v3870_v5  ;;  %v4209_v62 = vld [vmem:[%s5092_s8 + $0x18] sm:$0xff] }
 0x2e0   :  { %3372 = vmatpush3.msra.mxu1 %v4202_v61 }
 0x2e1   :  { %v488_v10 = vmul.f32 1.442695, %v484_v1  ;;  %v490_v12 = vmul.f32 1.442695, %v485_v2  ;;  %v492_v14 = vmul.f32 1.442695, %v486_v11  ;;  %3373 = vmatprep.subr.mxu1 %v3870_v5 }
 0x2e2   :  { %v494_v16 = vmul.f32 1.442695, %v487_v13  ;;  %3374 = vmatpush3.msra.mxu1 %v4209_v62 }
 0x2e3   :  { %3630 = vpow2.f32 %v488_v10  ;;  %3375 = vmatprep.subr.mxu1 %v3870_v5 }
 0x2e4   :  { %3632 = vpow2.f32 %v490_v12 }
 0x2e5   :  { %3634 = vpow2.f32 %v492_v14 }
 0x2e6   :  { %3636 = vpow2.f32 %v494_v16 }
 0x2f0   :  { %v3631_v17 = vpop.eup %3630 }
 0x2f1   :  { %501 = vperm.xlu1 %3621, %v3631_v17   ;;  %v3633_v52 = vpop.eup %3632 }
 0x2f2   :  { %v3635_v18 = vpop.eup %3634 }
 0x2f3   :  { %v3637_v19 = vpop.eup %3636 }
 0x2f5   :  { %504 = vperm.xlu1 %3621, %v3633_v52  }
 0x2f9   :  { %507 = vperm.xlu1 %3621, %v3635_v18  }
 0x2fd   :  { %510 = vperm.xlu1 %3621, %v3637_v19  }
 0x36c   :  { %v502_v20 = vpop.permute.xlu1 %501 }
 0x36d   :  { %v515_v25 = vrot.slane %v502_v20, %v4118_v34 }
 0x370   :  { %v505_v21 = vpop.permute.xlu1 %504 }
 0x371   :  { %v519_v23 = vrot.slane %v505_v21, %v4121_v39 }
 0x373   :  { %v520_v28 = vsel %vm456_vm3, %v519_v23, %v515_v25 }
 0x374   :  { %v508_v22 = vpop.permute.xlu1 %507 }
 0x375   :  { %v524_v26 = vrot.slane %v508_v22, %v4118_v34 }
 0x378   :  { %v511_v24 = vpop.permute.xlu1 %510 }
 0x379   :  { %v528_v27 = vrot.slane %v511_v24, %v4121_v39 }
 0x37b   :  { %v529_v29 = vsel %vm456_vm3, %v528_v27, %v524_v26  ;;  %v4226_v26 = vld [vmem:[%s5092_s8 + $0x10] sm:$0xff]  ;;  %v4231_v27 = vld [vmem:[%s5092_s8 + $0x8] sm:$0xff] }
 0x37c   :  { %v530_v30 = vsel %vm192_vm2, %v529_v29, %v520_v28  ;;  %3376 = vmatpush3.msra.mxu1 %v4226_v26 }
 0x37d   :  { %v532_v31 = vsel %vm469_vm4, %v530_v30, 0.0  ;;  %3377 = vmatprep.subr.mxu1 %v3870_v5 }
 0x37e   :  { %533 = vadd.xlane.f32.xlu1 %v532_v31  ;;  %3378 = vmatpush3.msra.mxu1 %v4231_v27  ;;  %v4240_v31 = vld [vmem:[%s5092_s8] sm:$0xff] }
 0x37f   :  { %3379 = vmatprep.subr.mxu1 %v3870_v5 }
 0x380   :  { %3380 = vmatpush3.msra.mxu1 %v4240_v31 }
 0x381   :  { %3422 = vmatprep.subr.mxu1 %v3870_v5 }
 0x407   :  { %v534_v32 = vpop.xlane.xlu1 %533 }
 0x408   :  { %v539_v33 = vrot.slane %v534_v32, %v4083_v59  ;;  %v543_v40 = vrot.slane %v534_v32, %v4138_v58 }
 0x40a   :  { %3638 = vrcp.f32 %v539_v33 }
 0x40b   :  { %3640 = vrcp.f32 %v543_v40 }
 0x417   :  { %v3639_v42 = vpop.eup %3638 }
 0x418   :  { %v547_v43 = vmul.f32 %v3639_v42, %v3631_v17  ;;  %v548_v44 = vmul.f32 %v3639_v42, %v3633_v52  ;;  %v3641_v46 = vpop.eup %3640 }
 0x419   :  { %v550_v47 = vmul.f32 %v3641_v46, %v3635_v18  ;;  %v551_v48 = vmul.f32 %v3641_v46, %v3637_v19 }
 0x41a   :  { %554 = vperm.xlu0 %3620, %v547_v43  }
 0x41e   :  { %559 = vperm.xlu0 %3620, %v548_v44  }
 0x422   :  { %564 = vperm.xlu0 %3620, %v550_v47   ;;  %v594_v47 = vld [vmem:[%s5085_s1] sm:$0x3] }
 0x426   :  { %569 = vperm.xlu0 %3620, %v551_v48  }
 0x495   :  { %v555_v1 = vpop.permute.xlu0 %554 }
 0x496   :  { %v572_v2 = vmul.f32 %v555_v1, %v3960_v3 }
 0x498   :  { %v576_v12 = vsel %vm61_vm0, %v572_v2, 0.0 }
 0x499   :  { %v560_v10 = vpop.permute.xlu0 %559 }
 0x49a   :  { %v573_v11 = vmul.f32 %v560_v10, %v3965_v4  ;;  %v4267_v10 = vld [vmem:[%s5093_s9] ss:$0 sm:$0xff] }
 0x49c   :  { %v577_v13 = vsel %vm61_vm0, %v573_v11, 0.0 }
 0x49d   :  { %v578_v14 = vadd.f32 %v577_v13, %v576_v12  ;;  %v565_v16 = vpop.permute.xlu0 %564 }
 0x49e   :  { %v574_v52 = vmul.f32 %v565_v16, %v3976_v7 }
 0x49f   :  { %v579_v17 = vrot.slane %v578_v14, 4 }
 0x4a0   :  { %v585_v21 = vsel %vm61_vm0, %v574_v52, 0.0 }
 0x4a1   :  { %v580_v18 = vadd.f32 %v579_v17, %v578_v14  ;;  %v570_v19 = vpop.permute.xlu0 %569 }
 0x4a2   :  { %v575_v20 = vmul.f32 %v570_v19, %v3981_v8 }
 0x4a3   :  { %v581_v23 = vrot.slane %v580_v18, 2 }
 0x4a4   :  { %v586_v22 = vsel %vm61_vm0, %v575_v20, 0.0 }
 0x4a5   :  { %v587_v24 = vadd.f32 %v586_v22, %v585_v21  ;;  %v582_v29 = vadd.f32 %v581_v23, %v580_v18 }
 0x4a7   :  { %v588_v25 = vrot.slane %v587_v24, 4  ;;  %v583_v32 = vrot.slane %v582_v29, 1 }
 0x4a9   :  { %v589_v28 = vadd.f32 %v588_v25, %v587_v24  ;;  %v584_v42 = vadd.f32 %v583_v32, %v582_v29 }
 0x4ab   :  { %v590_v30 = vrot.slane %v589_v28, 2 }
 0x4ad   :  { %v591_v33 = vadd.f32 %v590_v30, %v589_v28 }
 0x4af   :  { %v592_v40 = vrot.slane %v591_v33, 1 }
 0x4b1   :  { %v593_v43 = vadd.f32 %v592_v40, %v591_v33 }
 0x4b3   :  { %v597_v44 = vsel %vm192_vm2, %v593_v43, %v584_v42 }
 0x4b4   :  { %598 = vrot.lane.b32.xlu0 %v597_v44, %s3874_s28 }
 0x4b8   :  { %601 = vrot.lane.b32.xlu0 %v4056_v45, %s3875_s29 }
 0x526   :  { %v599_v46 = vpop.permute.xlu0 %598 }
 0x527   :  { %v604_v48 = vsel %vm61_vm0, %v594_v47, %v599_v46 }
 0x52a   :  { %v602_v1 = vpop.permute.xlu0 %601 }
 0x52b   :  { %v606_v2 = vsel %vm605_vm5, %v604_v48, %v602_v1 }
 0x52c   :  { %3382 = vmatmul.mubr.msk.f32.vlgmr.msra.gmra.mxu1 %vm613_vm6, %v606_v2 }
 0x52d   :  { %3423 = vmatpush3.msra.mxu1 %v4028_v35  ;;  %3430 = vmatprep.mubr.msk.f32.mxu1 %vm3871_vm1, %v3870_v5 }
 0x52e   :  { %3424 = vmatprep.subr.mxu1 %v3870_v5 }
 0x52f   :  { %3425 = vmatpush3.msra.mxu1 %v4033_v36 }
 0x530   :  { %3426 = vmatprep.subr.mxu1 %v3870_v5 }
 0x531   :  { %3427 = vmatpush3.msra.mxu1 %v4042_v37 }
 0x532   :  { %3428 = vmatprep.subr.mxu1 %v3870_v5 }
 0x533   :  { %3429 = vmatpush3.msra.mxu1 %v4049_v38 }
 0x534   :  { %3433 = vmatprep.subr.mxu1 %v3870_v5 }
 0x5ec   :  { %v683_v11 = vpop.f32.mrf.mxu1 }
 0x5ed   :  { %v684_v12 = vadd.f32 %v4267_v10, %v683_v11 }
 0x5ee   :  { %v3383_v13 = vpop.f32.mrf.mxu1 }
 0x5ef   :  { %3642 = vtanh.f32 %v684_v12  ;;  %v3151_v16 = vmul.f32 -1.442695, %v684_v12 }
 0x5f1   :  { %3644 = vpow2.f32 %v3151_v16 }
 0x5fc   :  { %v3643_v14 = vpop.eup %3642 }
 0x5fd   :  { %696 = vrot.lane.b32.xlu0 %v3643_v14, %s3875_s29 }
 0x5fe   :  { %v3645_v17 = vpop.eup %3644 }
 0x5ff   :  { %v690_v52 = vadd.f32 1.0, %v3645_v17 }
 0x601   :  { %3646 = vrcp.f32 %v690_v52 }
 0x60e   :  { %v3647_v18 = vpop.eup %3646 }
 0x60f   :  { %v694_v21 = vmul.f32 %v3647_v18, %v4056_v45 }
 0x66f   :  { %v697_v19 = vpop.permute.xlu0 %696 }
 0x670   :  { %v699_v20 = vmul.f32 %v3647_v18, %v697_v19 }
 0x672   :  { %701 = vrot.lane.b32.xlu1 %v699_v20, %s3874_s28 }
 0x6e4   :  { %v702_v22 = vpop.permute.xlu1 %701 }
 0x6e5   :  { %v4273_v23 = vadd.f32 %v702_v22, %v694_v21 }
 0x6e7   :  { %3648 = vtanh.f32 %v4273_v23 }
 0x6f4   :  { %v3649_v24 = vpop.eup %3648 }
 0x6f5   :  { %707 = vrot.lane.b32.xlu0 %v3649_v24, %s3875_s29 }
 0x767   :  { %v708_v25 = vpop.permute.xlu0 %707 }
 0x768   :  { %v4277_v28 = vmul.f32 %v3647_v18, %v708_v25 }
 0x76a   :  { %712 = vrot.lane.b32.xlu0 %v4277_v28, %s3874_s28 }
 0x7dc   :  { %v713_v29 = vpop.permute.xlu0 %712 }
 0x7dd   :  { %716 = vst.msk [vmem:[%s5096_s12] sm:$0x3] %vm715_vm7, %v713_v29  ;;  %3393 = vmatmul.mubr.msk.f32.vlgmr.msra.gmra.mxu0 %vm61_vm0, %v713_v29 }
 0x7de   :  { %3396 = vmatpush3.msra.mxu0 %v4155_v49  ;;  %3419 = vmatprep.mubr.msk.f32.mxu0 %vm3871_vm1, %v3870_v5 }
 0x7df   :  { %3397 = vmatprep.subr.mxu0 %v3870_v5 }
 0x7e0   :  { %3398 = vmatpush3.msra.mxu0 %v4160_v50 }
 0x7e1   :  { %3399 = vmatprep.subr.mxu0 %v3870_v5 }
 0x7e2   :  { %3400 = vmatpush3.msra.mxu0 %v4167_v51 }
 0x7e3   :  { %3401 = vmatprep.subr.mxu0 %v3870_v5 }
 0x7e4   :  { %3402 = vmatpush3.msra.mxu0 %v4174_v55 }
 0x7e5   :  { %3403 = vmatprep.subr.mxu0 %v3870_v5 }
 0x7e6   :  { %3404 = vmatpush3.msra.mxu0 %v4181_v56 }
 0x7e7   :  { %3405 = vmatprep.subr.mxu0 %v3870_v5 }
 0x7e8   :  { %3406 = vmatpush3.msra.mxu0 %v4188_v57 }
 0x7e9   :  { %3407 = vmatprep.subr.mxu0 %v3870_v5 }
 0x7ea   :  { %3408 = vmatpush3.msra.mxu0 %v4195_v60 }
 0x7eb   :  { %3409 = vmatprep.subr.mxu0 %v3870_v5 }
 0x7ec   :  { %3410 = vmatpush3.msra.mxu0 %v4202_v61 }
 0x7ed   :  { %3411 = vmatprep.subr.mxu0 %v3870_v5 }
 0x7ee   :  { %3412 = vmatpush3.msra.mxu0 %v4209_v62 }
 0x7ef   :  { %3413 = vmatprep.subr.mxu0 %v3870_v5 }
 0x7f0   :  { %3414 = vmatpush3.msra.mxu0 %v4226_v26 }
 0x7f1   :  { %3415 = vmatprep.subr.mxu0 %v3870_v5 }
 0x7f2   :  { %3416 = vmatpush3.msra.mxu0 %v4231_v27 }
 0x7f3   :  { %3417 = vmatprep.subr.mxu0 %v3870_v5 }
 0x7f4   :  { %3418 = vmatpush3.msra.mxu0 %v4240_v31 }
 0x7f5   :  { %3460 = vmatprep.subr.mxu0 %v3870_v5 }
 0x89d   :  { %v785_v45 = vpop.f32.mrf.mxu0 }
 0x89e   :  { %v786_v30 = vadd.f32 %v4075_v53, %v785_v45 }
 0x89f   :  { %v3394_v32 = vpop.f32.mrf.mxu0 }
 0x8a0   :  { %v796_v33 = vrot.slane %v786_v30, %v4078_v54 }
 0x8a2   :  { %v797_v40 = vcombine.high %v796_v33, %v796_v33  ;;  %v804_v42 = vrot.slane %v796_v33, %v4078_v54 }
 0x8a4   :  { %v811_v43 = vrot.slane %v797_v40, %v4078_v54  ;;  %v815_v44 = vrot.slane %v804_v42, %v4083_v59 }
 0x8a6   :  { %v819_v46 = vrot.slane %v811_v43, %v4083_v59  ;;  %v822_v47 = vadd.f32 %v815_v44, %v4091_v0  ;;  %v823_v48 = vadd.f32 %v815_v44, %v4089_v63 }
 0x8a8   :  { %v824_v1 = vadd.f32 %v819_v46, %v4097_v9  ;;  %v825_v2 = vadd.f32 %v819_v46, %v4095_v6  ;;  %3650 = vtanh.f32 %v822_v47 }
 0x8a9   :  { %3652 = vtanh.f32 %v823_v48 }
 0x8aa   :  { %3654 = vtanh.f32 %v824_v1 }
 0x8ab   :  { %3656 = vtanh.f32 %v825_v2 }
 0x8b5   :  { %v3651_v11 = vpop.eup %3650 }
 0x8b6   :  { %v3653_v12 = vpop.eup %3652  ;;  %v830_v13 = vmul.f32 %v3651_v11, %v4107_v15 }
 0x8b7   :  { %v3655_v14 = vpop.eup %3654  ;;  %v831_v16 = vmul.f32 %v3653_v12, %v4107_v15 }
 0x8b8   :  { %v834_v17 = vsel %vm61_vm0, %v830_v13, 0.0  ;;  %v832_v52 = vmul.f32 %v3655_v14, %v4107_v15  ;;  %v3657_v18 = vpop.eup %3656 }
 0x8b9   :  { %v837_v19 = vsel %vm61_vm0, %v831_v16, 0.0  ;;  %835 = vadd.xlane.f32.xlu0 %v834_v17  ;;  %v833_v21 = vmul.f32 %v3657_v18, %v4107_v15 }
 0x8ba   :  { %838 = vadd.xlane.f32.xlu1 %v837_v19  ;;  %v840_v20 = vsel %vm61_vm0, %v832_v52, 0.0 }
 0x8bb   :  { %v843_v22 = vsel %vm61_vm0, %v833_v21, 0.0 }
 0x8bd   :  { %841 = vadd.xlane.f32.xlu0 %v840_v20 }
 0x8c1   :  { %844 = vadd.xlane.f32.xlu0 %v843_v22 }
 0x942   :  { %v836_v24 = vpop.xlane.xlu0 %835 }
 0x943   :  { %v839_v25 = vpop.xlane.xlu1 %838  ;;  %v846_v30 = vadd.f32 %v836_v24, %v4123_v41 }
 0x944   :  { %v847_v45 = vadd.f32 %v839_v25, %v4123_v41 }
 0x945   :  { %v857_v42 = vrot.slane %v846_v30, %v4118_v34 }
 0x946   :  { %v842_v29 = vpop.xlane.xlu0 %841  ;;  %v861_v40 = vrot.slane %v847_v45, %v4121_v39 }
 0x947   :  { %v848_v32 = vadd.f32 %v842_v29, %v4123_v41 }
 0x948   :  { %v862_v47 = vsel %vm456_vm3, %v861_v40, %v857_v42 }
 0x949   :  { %v866_v44 = vrot.slane %v848_v32, %v4118_v34 }
 0x94a   :  { %v845_v33 = vpop.xlane.xlu0 %844 }
 0x94b   :  { %v849_v43 = vadd.f32 %v845_v33, %v4123_v41 }
 0x94d   :  { %v870_v46 = vrot.slane %v849_v43, %v4121_v39 }
 0x94f   :  { %v871_v48 = vsel %vm456_vm3, %v870_v46, %v866_v44 }
 0x950   :  { %v872_v1 = vsel %vm192_vm2, %v871_v48, %v862_v47 }
 0x951   :  { %v874_v2 = vsel %vm469_vm4, %v872_v1, -inf }
 0x952   :  { %875 = vmax.xlane.f32.xlu0 %v874_v2 }
 0x9db   :  { %v876_v11 = vpop.xlane.xlu0 %875 }
 0x9dc   :  { %v881_v12 = vrot.slane %v876_v11, %v4083_v59  ;;  %v885_v13 = vrot.slane %v876_v11, %v4138_v58 }
 0x9de   :  { %v888_v14 = vsub.f32 %v846_v30, %v881_v12  ;;  %v889_v16 = vsub.f32 %v847_v45, %v881_v12  ;;  %v890_v17 = vsub.f32 %v848_v32, %v885_v13  ;;  %v891_v19 = vsub.f32 %v849_v43, %v885_v13 }
 0x9e0   :  { %v892_v52 = vmul.f32 1.442695, %v888_v14  ;;  %v894_v18 = vmul.f32 1.442695, %v889_v16  ;;  %v896_v20 = vmul.f32 1.442695, %v890_v17 }
 0x9e1   :  { %v898_v21 = vmul.f32 1.442695, %v891_v19 }
 0x9e2   :  { %3658 = vpow2.f32 %v892_v52 }
 0x9e3   :  { %3660 = vpow2.f32 %v894_v18 }
 0x9e4   :  { %3662 = vpow2.f32 %v896_v20 }
 0x9e5   :  { %3664 = vpow2.f32 %v898_v21 }
 0x9ef   :  { %v3659_v22 = vpop.eup %3658 }
 0x9f0   :  { %v3661_v24 = vpop.eup %3660  ;;  %905 = vperm.xlu1 %3621, %v3659_v22  }
 0x9f1   :  { %908 = vperm.xlu0 %3620, %v3661_v24   ;;  %v3663_v25 = vpop.eup %3662 }
 0x9f2   :  { %v3665_v29 = vpop.eup %3664 }
 0x9f4   :  { %911 = vperm.xlu1 %3621, %v3663_v25  }
 0x9f8   :  { %914 = vperm.xlu1 %3621, %v3665_v29  }
 0xa6b   :  { %v906_v30 = vpop.permute.xlu1 %905 }
 0xa6c   :  { %v909_v45 = vpop.permute.xlu0 %908  ;;  %v919_v40 = vrot.slane %v906_v30, %v4118_v34 }
 0xa6d   :  { %v923_v33 = vrot.slane %v909_v45, %v4121_v39 }
 0xa6f   :  { %v912_v32 = vpop.permute.xlu1 %911  ;;  %v924_v46 = vsel %vm456_vm3, %v923_v33, %v919_v40 }
 0xa70   :  { %v928_v43 = vrot.slane %v912_v32, %v4118_v34 }
 0xa73   :  { %v915_v42 = vpop.permute.xlu1 %914 }
 0xa74   :  { %v932_v44 = vrot.slane %v915_v42, %v4121_v39 }
 0xa76   :  { %v933_v47 = vsel %vm456_vm3, %v932_v44, %v928_v43 }
 0xa77   :  { %v934_v48 = vsel %vm192_vm2, %v933_v47, %v924_v46 }
 0xa78   :  { %v936_v1 = vsel %vm469_vm4, %v934_v48, 0.0 }
 0xa79   :  { %937 = vadd.xlane.f32.xlu0 %v936_v1 }
 0xb02   :  { %v938_v2 = vpop.xlane.xlu0 %937 }
 0xb03   :  { %v943_v11 = vrot.slane %v938_v2, %v4083_v59  ;;  %v947_v12 = vrot.slane %v938_v2, %v4138_v58 }
 0xb05   :  { %3666 = vrcp.f32 %v943_v11 }
 0xb06   :  { %3668 = vrcp.f32 %v947_v12 }
 0xb12   :  { %v3667_v13 = vpop.eup %3666 }
 0xb13   :  { %v951_v14 = vmul.f32 %v3667_v13, %v3659_v22  ;;  %v952_v16 = vmul.f32 %v3667_v13, %v3661_v24  ;;  %v3669_v17 = vpop.eup %3668 }
 0xb14   :  { %v954_v52 = vmul.f32 %v3669_v17, %v3663_v25  ;;  %v955_v18 = vmul.f32 %v3669_v17, %v3665_v29 }
 0xb15   :  { %958 = vperm.xlu1 %3621, %v951_v14  }
 0xb19   :  { %963 = vperm.xlu1 %3621, %v952_v16   ;;  %v3153_v16 = vld [vmem:[%s5085_s1 + $0x2] sm:$0x3] }
 0xb1d   :  { %968 = vperm.xlu1 %3621, %v954_v52  }
 0xb21   :  { %973 = vperm.xlu1 %3621, %v955_v18  }
 0xb90   :  { %v959_v19 = vpop.permute.xlu1 %958 }
 0xb91   :  { %v976_v20 = vmul.f32 %v959_v19, %v3960_v3 }
 0xb93   :  { %v980_v45 = vsel %vm61_vm0, %v976_v20, 0.0 }
 0xb94   :  { %v964_v21 = vpop.permute.xlu1 %963 }
 0xb95   :  { %v977_v30 = vmul.f32 %v964_v21, %v3965_v4 }
 0xb97   :  { %v981_v32 = vsel %vm61_vm0, %v977_v30, 0.0 }
 0xb98   :  { %v982_v33 = vadd.f32 %v981_v32, %v980_v45  ;;  %v969_v22 = vpop.permute.xlu1 %968 }
 0xb99   :  { %v978_v24 = vmul.f32 %v969_v22, %v3976_v7 }
 0xb9a   :  { %v983_v40 = vrot.slane %v982_v33, 4 }
 0xb9b   :  { %v989_v43 = vsel %vm61_vm0, %v978_v24, 0.0 }
 0xb9c   :  { %v984_v42 = vadd.f32 %v983_v40, %v982_v33  ;;  %v974_v25 = vpop.permute.xlu1 %973 }
 0xb9d   :  { %v979_v29 = vmul.f32 %v974_v25, %v3981_v8 }
 0xb9e   :  { %v985_v44 = vrot.slane %v984_v42, 2 }
 0xb9f   :  { %v990_v3 = vsel %vm61_vm0, %v979_v29, 0.0 }
 0xba0   :  { %v991_v46 = vadd.f32 %v990_v3, %v989_v43  ;;  %v986_v48 = vadd.f32 %v985_v44, %v984_v42 }
 0xba2   :  { %v992_v4 = vrot.slane %v991_v46, 4  ;;  %v987_v2 = vrot.slane %v986_v48, 1 }
 0xba4   :  { %v993_v47 = vadd.f32 %v992_v4, %v991_v46  ;;  %v988_v13 = vadd.f32 %v987_v2, %v986_v48 }
 0xba6   :  { %v994_v1 = vrot.slane %v993_v47, 2 }
 0xba8   :  { %v995_v11 = vadd.f32 %v994_v1, %v993_v47 }
 0xbaa   :  { %v996_v12 = vrot.slane %v995_v11, 1 }
 0xbac   :  { %v997_v14 = vadd.f32 %v996_v12, %v995_v11 }
 0xbae   :  { %v1002_v7 = vsel %vm192_vm2, %v997_v14, %v988_v13 }
 0xbaf   :  { %1003 = vrot.lane.b32.xlu1 %v1002_v7, %s3874_s28 }
 0xbb3   :  { %1006 = vrot.lane.b32.xlu1 %v4277_v28, %s3876_s7 }
 0xc21   :  { %v1004_v8 = vpop.permute.xlu1 %1003 }
 0xc22   :  { %v1009_v17 = vsel %vm61_vm0, %v3153_v16, %v1004_v8 }
 0xc25   :  { %v1007_v52 = vpop.permute.xlu1 %1006 }
 0xc26   :  { %v1010_v18 = vsel %vm605_vm5, %v1009_v17, %v1007_v52 }
 0xc27   :  { %3420 = vmatmul.mubr.msk.f32.vlgmr.msra.gmra.mxu0 %vm613_vm6, %v1010_v18 }
 0xc28   :  { %3461 = vmatpush3.msra.mxu0 %v4028_v35  ;;  %3468 = vmatprep.mubr.msk.f32.mxu0 %vm3871_vm1, %v3870_v5 }
 0xc29   :  { %3462 = vmatprep.subr.mxu0 %v3870_v5 }
 0xc2a   :  { %3463 = vmatpush3.msra.mxu0 %v4033_v36 }
 0xc2b   :  { %3464 = vmatprep.subr.mxu0 %v3870_v5 }
 0xc2c   :  { %3465 = vmatpush3.msra.mxu0 %v4042_v37 }
 0xc2d   :  { %3466 = vmatprep.subr.mxu0 %v3870_v5 }
 0xc2e   :  { %3467 = vmatpush3.msra.mxu0 %v4049_v38 }
 0xc2f   :  { %3471 = vmatprep.subr.mxu0 %v3870_v5 }
 0xce7   :  { %v1080_v28 = vpop.f32.mrf.mxu0 }
 0xce8   :  { %v1081_v35 = vadd.f32 %v4267_v10, %v1080_v28 }
 0xce9   :  { %v3421_v19 = vpop.f32.mrf.mxu0 }
 0xcea   :  { %3670 = vtanh.f32 %v1081_v35  ;;  %v3155_v21 = vmul.f32 -1.442695, %v1081_v35 }
 0xcec   :  { %3672 = vpow2.f32 %v3155_v21 }
 0xcf7   :  { %v3671_v20 = vpop.eup %3670 }
 0xcf8   :  { %1093 = vrot.lane.b32.xlu1 %v3671_v20, %s3875_s29 }
 0xcf9   :  { %v3673_v36 = vpop.eup %3672 }
 0xcfa   :  { %v1087_v30 = vadd.f32 1.0, %v3673_v36 }
 0xcfc   :  { %3674 = vrcp.f32 %v1087_v30 }
 0xd09   :  { %v3675_v37 = vpop.eup %3674 }
 0xd0a   :  { %v1091_v38 = vmul.f32 %v3675_v37, %v4273_v23 }
 0xd6a   :  { %v1094_v45 = vpop.permute.xlu1 %1093 }
 0xd6b   :  { %v1096_v32 = vmul.f32 %v3675_v37, %v1094_v45 }
 0xd6d   :  { %1098 = vrot.lane.b32.xlu1 %v1096_v32, %s3874_s28 }
 0xddf   :  { %v1099_v33 = vpop.permute.xlu1 %1098 }
 0xde0   :  { %v4386_v22 = vadd.f32 %v1099_v33, %v1091_v38 }
 0xde2   :  { %3676 = vtanh.f32 %v4386_v22 }
 0xdef   :  { %v3677_v40 = vpop.eup %3676 }
 0xdf0   :  { %1104 = vrot.lane.b32.xlu0 %v3677_v40, %s3875_s29 }
 0xe62   :  { %v1105_v24 = vpop.permute.xlu0 %1104 }
 0xe63   :  { %v4390_v42 = vmul.f32 %v3675_v37, %v1105_v24 }
 0xe65   :  { %1109 = vrot.lane.b32.xlu1 %v4390_v42, %s3874_s28 }
 0xed7   :  { %v1110_v25 = vpop.permute.xlu1 %1109 }
 0xed8   :  { %3156 = vst.msk [vmem:[%s5096_s12 + $0x2] sm:$0x3] %vm715_vm7, %v1110_v25  ;;  %3431 = vmatmul.mubr.msk.f32.vlgmr.msra.gmra.mxu1 %vm61_vm0, %v1110_v25 }
 0xed9   :  { %3434 = vmatpush3.msra.mxu1 %v4155_v49  ;;  %3457 = vmatprep.mubr.msk.f32.mxu1 %vm3871_vm1, %v3870_v5 }
 0xeda   :  { %3435 = vmatprep.subr.mxu1 %v3870_v5 }
 0xedb   :  { %3436 = vmatpush3.msra.mxu1 %v4160_v50 }
 0xedc   :  { %3437 = vmatprep.subr.mxu1 %v3870_v5 }
 0xedd   :  { %3438 = vmatpush3.msra.mxu1 %v4167_v51 }
 0xede   :  { %3439 = vmatprep.subr.mxu1 %v3870_v5 }
 0xedf   :  { %3440 = vmatpush3.msra.mxu1 %v4174_v55 }
 0xee0   :  { %3441 = vmatprep.subr.mxu1 %v3870_v5 }
 0xee1   :  { %3442 = vmatpush3.msra.mxu1 %v4181_v56 }
 0xee2   :  { %3443 = vmatprep.subr.mxu1 %v3870_v5 }
 0xee3   :  { %3444 = vmatpush3.msra.mxu1 %v4188_v57 }
 0xee4   :  { %3445 = vmatprep.subr.mxu1 %v3870_v5 }
 0xee5   :  { %3446 = vmatpush3.msra.mxu1 %v4195_v60 }
 0xee6   :  { %3447 = vmatprep.subr.mxu1 %v3870_v5 }
 0xee7   :  { %3448 = vmatpush3.msra.mxu1 %v4202_v61 }
 0xee8   :  { %3449 = vmatprep.subr.mxu1 %v3870_v5 }
 0xee9   :  { %3450 = vmatpush3.msra.mxu1 %v4209_v62 }
 0xeea   :  { %3451 = vmatprep.subr.mxu1 %v3870_v5 }
 0xeeb   :  { %3452 = vmatpush3.msra.mxu1 %v4226_v26 }
 0xeec   :  { %3453 = vmatprep.subr.mxu1 %v3870_v5 }
 0xeed   :  { %3454 = vmatpush3.msra.mxu1 %v4231_v27 }
 0xeee   :  { %3455 = vmatprep.subr.mxu1 %v3870_v5 }
 0xeef   :  { %3456 = vmatpush3.msra.mxu1 %v4240_v31 }
 0xef0   :  { %3498 = vmatprep.subr.mxu1 %v3870_v5 }
 0xf98   :  { %v1182_v23 = vpop.f32.mrf.mxu1 }
 0xf99   :  { %v1183_v29 = vadd.f32 %v4075_v53, %v1182_v23 }
 0xf9a   :  { %v3432_v43 = vpop.f32.mrf.mxu1 }
 0xf9b   :  { %v1193_v3 = vrot.slane %v1183_v29, %v4078_v54 }
 0xf9d   :  { %v1194_v44 = vcombine.high %v1193_v3, %v1193_v3  ;;  %v1201_v46 = vrot.slane %v1193_v3, %v4078_v54 }
 0xf9f   :  { %v1208_v4 = vrot.slane %v1194_v44, %v4078_v54  ;;  %v1212_v47 = vrot.slane %v1201_v46, %v4083_v59 }
 0xfa1   :  { %v1216_v48 = vrot.slane %v1208_v4, %v4083_v59  ;;  %v1219_v1 = vadd.f32 %v1212_v47, %v4091_v0  ;;  %v1220_v2 = vadd.f32 %v1212_v47, %v4089_v63 }
 0xfa3   :  { %v1221_v11 = vadd.f32 %v1216_v48, %v4097_v9  ;;  %v1222_v53 = vadd.f32 %v1216_v48, %v4095_v6  ;;  %3678 = vtanh.f32 %v1219_v1 }
 0xfa4   :  { %3680 = vtanh.f32 %v1220_v2 }
 0xfa5   :  { %3682 = vtanh.f32 %v1221_v11 }
 0xfa6   :  { %3684 = vtanh.f32 %v1222_v53 }
 0xfb0   :  { %v3679_v12 = vpop.eup %3678 }
 0xfb1   :  { %v3681_v13 = vpop.eup %3680  ;;  %v1227_v14 = vmul.f32 %v3679_v12, %v4107_v15 }
 0xfb2   :  { %v3683_v7 = vpop.eup %3682  ;;  %v1228_v8 = vmul.f32 %v3681_v13, %v4107_v15 }
 0xfb3   :  { %v1231_v16 = vsel %vm61_vm0, %v1227_v14, 0.0  ;;  %v1229_v17 = vmul.f32 %v3683_v7, %v4107_v15  ;;  %v3685_v52 = vpop.eup %3684 }
 0xfb4   :  { %v1234_v18 = vsel %vm61_vm0, %v1228_v8, 0.0  ;;  %1232 = vadd.xlane.f32.xlu1 %v1231_v16  ;;  %v1230_v35 = vmul.f32 %v3685_v52, %v4107_v15 }
 0xfb5   :  { %1235 = vadd.xlane.f32.xlu0 %v1234_v18  ;;  %v1237_v28 = vsel %vm61_vm0, %v1229_v17, 0.0 }
 0xfb6   :  { %v1240_v19 = vsel %vm61_vm0, %v1230_v35, 0.0 }
 0xfb8   :  { %1238 = vadd.xlane.f32.xlu1 %v1237_v28 }
 0xfbc   :  { %1241 = vadd.xlane.f32.xlu1 %v1240_v19 }
0x103d   :  { %v1233_v20 = vpop.xlane.xlu1 %1232 }
0x103e   :  { %v1236_v21 = vpop.xlane.xlu0 %1235  ;;  %v1243_v37 = vadd.f32 %v1233_v20, %v4123_v41 }
0x103f   :  { %v1244_v30 = vadd.f32 %v1236_v21, %v4123_v41 }
0x1040   :  { %v1254_v33 = vrot.slane %v1243_v37, %v4118_v34 }
0x1041   :  { %v1239_v36 = vpop.xlane.xlu1 %1238  ;;  %v1258_v38 = vrot.slane %v1244_v30, %v4121_v39 }
0x1042   :  { %v1245_v45 = vadd.f32 %v1239_v36, %v4123_v41 }
0x1043   :  { %v1259_v25 = vsel %vm456_vm3, %v1258_v38, %v1254_v33 }
0x1044   :  { %v1263_v40 = vrot.slane %v1245_v45, %v4118_v34 }
0x1045   :  { %v1242_v32 = vpop.xlane.xlu1 %1241 }
0x1046   :  { %v1246_v15 = vadd.f32 %v1242_v32, %v4123_v41 }
0x1048   :  { %v1267_v24 = vrot.slane %v1246_v15, %v4121_v39 }
0x104a   :  { %v1268_v23 = vsel %vm456_vm3, %v1267_v24, %v1263_v40 }
0x104b   :  { %v1269_v29 = vsel %vm192_vm2, %v1268_v23, %v1259_v25 }
0x104c   :  { %v1271_v43 = vsel %vm469_vm4, %v1269_v29, -inf }
0x104d   :  { %1272 = vmax.xlane.f32.xlu1 %v1271_v43  ;;  %v4470_v43 = vld [vmem:[%s5084_s0] sm:$0xff] }
0x10d6   :  { %v1273_v3 = vpop.xlane.xlu1 %1272 }
0x10d7   :  { %v1278_v44 = vrot.slane %v1273_v3, %v4083_v59  ;;  %v1282_v46 = vrot.slane %v1273_v3, %v4138_v58 }
0x10d9   :  { %v1285_v4 = vsub.f32 %v1243_v37, %v1278_v44  ;;  %v1286_v47 = vsub.f32 %v1244_v30, %v1278_v44  ;;  %v1288_v48 = vsub.f32 %v1246_v15, %v1282_v46  ;;  %v1287_v1 = vsub.f32 %v1245_v45, %v1282_v46  ;;  %v4476_v46 = vld [vmem:[%s5084_s0 + $0x8] sm:$0xff] }
0x10db   :  { %v1289_v2 = vmul.f32 1.442695, %v1285_v4  ;;  %v1291_v11 = vmul.f32 1.442695, %v1286_v47  ;;  %v1295_v53 = vmul.f32 1.442695, %v1288_v48 }
0x10dc   :  { %v1293_v12 = vmul.f32 1.442695, %v1287_v1 }
0x10dd   :  { %3686 = vpow2.f32 %v1289_v2 }
0x10de   :  { %3688 = vpow2.f32 %v1291_v11 }
0x10df   :  { %3690 = vpow2.f32 %v1295_v53  ;;  %v4484_v53 = vld [vmem:[%s5084_s0 + $0x10] sm:$0xff] }
0x10e0   :  { %3692 = vpow2.f32 %v1293_v12 }
0x10ea   :  { %v3687_v13 = vpop.eup %3686 }
0x10eb   :  { %v3689_v14 = vpop.eup %3688  ;;  %1302 = vperm.xlu0 %3620, %v3687_v13  }
0x10ec   :  { %1305 = vperm.xlu1 %3621, %v3689_v14   ;;  %v3691_v7 = vpop.eup %3690 }
0x10ed   :  { %v3693_v8 = vpop.eup %3692 }
0x10ef   :  { %1311 = vperm.xlu0 %3620, %v3691_v7  }
0x10f0   :  { %1308 = vperm.xlu1 %3621, %v3693_v8  }
0x1166   :  { %v1303_v16 = vpop.permute.xlu0 %1302 }
0x1167   :  { %v1306_v17 = vpop.permute.xlu1 %1305  ;;  %v1316_v18 = vrot.slane %v1303_v16, %v4118_v34 }
0x1168   :  { %v1320_v52 = vrot.slane %v1306_v17, %v4121_v39 }
0x116a   :  { %v1312_v28 = vpop.permute.xlu0 %1311  ;;  %v1321_v21 = vsel %vm456_vm3, %v1320_v52, %v1316_v18 }
0x116b   :  { %v1309_v35 = vpop.permute.xlu1 %1308  ;;  %v1329_v19 = vrot.slane %v1312_v28, %v4121_v39 }
0x116c   :  { %v1325_v20 = vrot.slane %v1309_v35, %v4118_v34 }
0x116e   :  { %v1330_v36 = vsel %vm456_vm3, %v1329_v19, %v1325_v20 }
0x116f   :  { %v1331_v30 = vsel %vm192_vm2, %v1330_v36, %v1321_v21 }
0x1170   :  { %v1333_v37 = vsel %vm469_vm4, %v1331_v30, 0.0 }
0x1171   :  { %1334 = vadd.xlane.f32.xlu1 %v1333_v37 }
0x11fa   :  { %v1335_v45 = vpop.xlane.xlu1 %1334 }
0x11fb   :  { %v1340_v32 = vrot.slane %v1335_v45, %v4083_v59  ;;  %v1344_v38 = vrot.slane %v1335_v45, %v4138_v58 }
0x11fd   :  { %3694 = vrcp.f32 %v1340_v32 }
0x11fe   :  { %3696 = vrcp.f32 %v1344_v38 }
0x120a   :  { %v3695_v33 = vpop.eup %3694 }
0x120b   :  { %v1348_v15 = vmul.f32 %v3695_v33, %v3687_v13  ;;  %v1349_v40 = vmul.f32 %v3695_v33, %v3689_v14  ;;  %v3697_v24 = vpop.eup %3696  ;;  %v3158_v33 = vld [vmem:[%s5085_s1 + $0x4] sm:$0x3] }
0x120c   :  { %v1351_v25 = vmul.f32 %v3697_v24, %v3693_v8  ;;  %v1352_v23 = vmul.f32 %v3697_v24, %v3691_v7  ;;  %v4490_v7 = vld [vmem:[%s5084_s0 + $0x18] sm:$0xff] }
0x120d   :  { %1355 = vperm.xlu0 %3620, %v1348_v15  }
0x1211   :  { %1360 = vperm.xlu0 %3620, %v1349_v40  }
0x1215   :  { %1365 = vperm.xlu0 %3620, %v1351_v25   ;;  %v4508_v25 = vld [vmem:[%s5088_s4 + $0x18] sm:$0xff] }
0x1219   :  { %1370 = vperm.xlu0 %3620, %v1352_v23   ;;  %v4524_v23 = vld [vmem:[%s5088_s4 + $0x8] sm:$0xff] }
0x1288   :  { %v1356_v29 = vpop.permute.xlu0 %1355 }
0x1289   :  { %v1373_v3 = vmul.f32 %v4470_v43, %v1356_v29  ;;  %v4531_v29 = vld [vmem:[%s5088_s4] sm:$0xff] }
0x128b   :  { %v1377_v47 = vsel %vm61_vm0, %v1373_v3, 0.0 }
0x128c   :  { %v1361_v44 = vpop.permute.xlu0 %1360 }
0x128d   :  { %v1374_v4 = vmul.f32 %v4476_v46, %v1361_v44 }
0x128f   :  { %v1378_v48 = vsel %vm61_vm0, %v1374_v4, 0.0 }
0x1290   :  { %v1379_v1 = vadd.f32 %v1378_v48, %v1377_v47  ;;  %v1366_v2 = vpop.permute.xlu0 %1365 }
0x1291   :  { %v1375_v12 = vmul.f32 %v4484_v53, %v1366_v2 }
0x1292   :  { %v1380_v11 = vrot.slane %v1379_v1, 4 }
0x1293   :  { %v1386_v16 = vsel %vm61_vm0, %v1375_v12, 0.0 }
0x1294   :  { %v1381_v13 = vadd.f32 %v1380_v11, %v1379_v1  ;;  %v1371_v14 = vpop.permute.xlu0 %1370 }
0x1295   :  { %v1376_v8 = vmul.f32 %v4490_v7, %v1371_v14 }
0x1296   :  { %v1382_v52 = vrot.slane %v1381_v13, 2 }
0x1297   :  { %v1387_v17 = vsel %vm61_vm0, %v1376_v8, 0.0 }
0x1298   :  { %v1388_v18 = vadd.f32 %v1387_v17, %v1386_v16  ;;  %v1383_v35 = vadd.f32 %v1382_v52, %v1381_v13 }
0x129a   :  { %v1389_v28 = vrot.slane %v1388_v18, 4  ;;  %v1384_v36 = vrot.slane %v1383_v35, 1 }
0x129c   :  { %v1390_v19 = vadd.f32 %v1389_v28, %v1388_v18  ;;  %v1385_v37 = vadd.f32 %v1384_v36, %v1383_v35 }
0x129e   :  { %v1391_v20 = vrot.slane %v1390_v19, 2 }
0x12a0   :  { %v1392_v21 = vadd.f32 %v1391_v20, %v1390_v19  ;;  %v4596_v20 = vld [vmem:[%s5090_s6] ss:$0 sm:$0xff] }
0x12a2   :  { %v1393_v30 = vrot.slane %v1392_v21, 1 }
0x12a4   :  { %v1394_v45 = vadd.f32 %v1393_v30, %v1392_v21 }
0x12a6   :  { %v1399_v32 = vsel %vm192_vm2, %v1394_v45, %v1385_v37 }
0x12a7   :  { %1400 = vrot.lane.b32.xlu0 %v1399_v32, %s3874_s28 }
0x12ab   :  { %1403 = vrot.lane.b32.xlu0 %v4390_v42, %s3876_s7  ;;  %v4517_v42 = vld [vmem:[%s5088_s4 + $0x10] sm:$0xff] }
0x1319   :  { %v1401_v38 = vpop.permute.xlu0 %1400 }
0x131a   :  { %v1406_v15 = vsel %vm61_vm0, %v3158_v33, %v1401_v38 }
0x131d   :  { %v1404_v40 = vpop.permute.xlu0 %1403 }
0x131e   :  { %v1407_v24 = vsel %vm605_vm5, %v1406_v15, %v1404_v40 }
0x131f   :  { %3458 = vmatmul.mubr.msk.f32.vlgmr.msra.gmra.mxu1 %vm613_vm6, %v1407_v24 }
0x1320   :  { %3499 = vmatpush3.msra.mxu1 %v4508_v25  ;;  %3506 = vmatprep.mubr.msk.f32.mxu1 %vm3871_vm1, %v3870_v5 }
0x1321   :  { %3500 = vmatprep.subr.mxu1 %v3870_v5 }
0x1322   :  { %3501 = vmatpush3.msra.mxu1 %v4517_v42 }
0x1323   :  { %3502 = vmatprep.subr.mxu1 %v3870_v5 }
0x1324   :  { %3503 = vmatpush3.msra.mxu1 %v4524_v23 }
0x1325   :  { %3504 = vmatprep.subr.mxu1 %v3870_v5 }
0x1326   :  { %3505 = vmatpush3.msra.mxu1 %v4531_v29 }
0x1327   :  { %3509 = vmatprep.subr.mxu1 %v3870_v5 }
0x13df   :  { %v1477_v3 = vpop.f32.mrf.mxu1 }
0x13e0   :  { %v1478_v44 = vadd.f32 %v4267_v10, %v1477_v3 }
0x13e1   :  { %v3459_v4 = vpop.f32.mrf.mxu1 }
0x13e2   :  { %3698 = vtanh.f32 %v1478_v44  ;;  %v3160_v48 = vmul.f32 -1.442695, %v1478_v44 }
0x13e4   :  { %3700 = vpow2.f32 %v3160_v48 }
0x13ef   :  { %v3699_v47 = vpop.eup %3698 }
0x13f0   :  { %1490 = vrot.lane.b32.xlu0 %v3699_v47, %s3875_s29 }
0x13f1   :  { %v3701_v1 = vpop.eup %3700 }
0x13f2   :  { %v1484_v2 = vadd.f32 1.0, %v3701_v1 }
0x13f4   :  { %3702 = vrcp.f32 %v1484_v2 }
0x1401   :  { %v3703_v11 = vpop.eup %3702 }
0x1402   :  { %v1488_v14 = vmul.f32 %v3703_v11, %v4386_v22 }
0x1462   :  { %v1491_v12 = vpop.permute.xlu0 %1490 }
0x1463   :  { %v1493_v13 = vmul.f32 %v3703_v11, %v1491_v12 }
0x1465   :  { %1495 = vrot.lane.b32.xlu0 %v1493_v13, %s3874_s28 }
0x14d7   :  { %v1496_v8 = vpop.permute.xlu0 %1495 }
0x14d8   :  { %v4539_v16 = vadd.f32 %v1496_v8, %v1488_v14 }
0x14da   :  { %3704 = vtanh.f32 %v4539_v16 }
0x14e7   :  { %v3705_v10 = vpop.eup %3704 }
0x14e8   :  { %1501 = vrot.lane.b32.xlu0 %v3705_v10, %s3875_s29 }
0x155a   :  { %v1502_v17 = vpop.permute.xlu0 %1501 }
0x155b   :  { %v4543_v52 = vmul.f32 %v3703_v11, %v1502_v17 }
0x155d   :  { %1506 = vrot.lane.b32.xlu1 %v4543_v52, %s3874_s28 }
0x15cf   :  { %v1507_v18 = vpop.permute.xlu1 %1506 }
0x15d0   :  { %3161 = vst.msk [vmem:[%s5096_s12 + $0x4] sm:$0x3] %vm715_vm7, %v1507_v18  ;;  %3469 = vmatmul.mubr.msk.f32.vlgmr.msra.gmra.mxu0 %vm61_vm0, %v1507_v18 }
0x15d1   :  { %3472 = vmatpush3.msra.mxu0 %v4155_v49  ;;  %3495 = vmatprep.mubr.msk.f32.mxu0 %vm3871_vm1, %v3870_v5 }
0x15d2   :  { %3473 = vmatprep.subr.mxu0 %v3870_v5 }
0x15d3   :  { %3474 = vmatpush3.msra.mxu0 %v4160_v50  ;;  %v4581_v50 = vld [vmem:[%s5089_s5] ss:$0 sm:$0xff] }
0x15d4   :  { %3475 = vmatprep.subr.mxu0 %v3870_v5 }
0x15d5   :  { %3476 = vmatpush3.msra.mxu0 %v4167_v51 }
0x15d6   :  { %3477 = vmatprep.subr.mxu0 %v3870_v5 }
0x15d7   :  { %3478 = vmatpush3.msra.mxu0 %v4174_v55 }
0x15d8   :  { %3479 = vmatprep.subr.mxu0 %v3870_v5 }
0x15d9   :  { %3480 = vmatpush3.msra.mxu0 %v4181_v56 }
0x15da   :  { %3481 = vmatprep.subr.mxu0 %v3870_v5 }
0x15db   :  { %3482 = vmatpush3.msra.mxu0 %v4188_v57 }
0x15dc   :  { %3483 = vmatprep.subr.mxu0 %v3870_v5 }
0x15dd   :  { %3484 = vmatpush3.msra.mxu0 %v4195_v60 }
0x15de   :  { %3485 = vmatprep.subr.mxu0 %v3870_v5 }
0x15df   :  { %3486 = vmatpush3.msra.mxu0 %v4202_v61 }
0x15e0   :  { %3487 = vmatprep.subr.mxu0 %v3870_v5 }
0x15e1   :  { %3488 = vmatpush3.msra.mxu0 %v4209_v62 }
0x15e2   :  { %3489 = vmatprep.subr.mxu0 %v3870_v5 }
0x15e3   :  { %3490 = vmatpush3.msra.mxu0 %v4226_v26 }
0x15e4   :  { %3491 = vmatprep.subr.mxu0 %v3870_v5 }
0x15e5   :  { %3492 = vmatpush3.msra.mxu0 %v4231_v27 }
0x15e6   :  { %3493 = vmatprep.subr.mxu0 %v3870_v5 }
0x15e7   :  { %3494 = vmatpush3.msra.mxu0 %v4240_v31 }
0x15e8   :  { %3536 = vmatprep.subr.mxu0 %v3870_v5 }
0x1690   :  { %v1579_v49 = vpop.f32.mrf.mxu0 }
0x1691   :  { %v1580_v51 = vadd.f32 %v4581_v50, %v1579_v49 }
0x1692   :  { %v3470_v55 = vpop.f32.mrf.mxu0 }
0x1693   :  { %v1590_v56 = vrot.slane %v1580_v51, %v4078_v54 }
0x1695   :  { %v1591_v57 = vcombine.high %v1590_v56, %v1590_v56  ;;  %v1598_v60 = vrot.slane %v1590_v56, %v4078_v54 }
0x1697   :  { %v1605_v61 = vrot.slane %v1591_v57, %v4078_v54  ;;  %v1609_v62 = vrot.slane %v1598_v60, %v4083_v59 }
0x1699   :  { %v1613_v26 = vrot.slane %v1605_v61, %v4083_v59  ;;  %v1616_v27 = vadd.f32 %v1609_v62, %v4091_v0  ;;  %v1617_v31 = vadd.f32 %v1609_v62, %v4089_v63 }
0x169b   :  { %v1618_v22 = vadd.f32 %v1613_v26, %v4097_v9  ;;  %v1619_v28 = vadd.f32 %v1613_v26, %v4095_v6  ;;  %3706 = vtanh.f32 %v1616_v27 }
0x169c   :  { %3708 = vtanh.f32 %v1617_v31 }
0x169d   :  { %3710 = vtanh.f32 %v1618_v22 }
0x169e   :  { %3712 = vtanh.f32 %v1619_v28 }
0x16a8   :  { %v3707_v35 = vpop.eup %3706 }
0x16a9   :  { %v3709_v19 = vpop.eup %3708  ;;  %v1624_v21 = vmul.f32 %v4596_v20, %v3707_v35 }
0x16aa   :  { %v3711_v36 = vpop.eup %3710  ;;  %v1625_v30 = vmul.f32 %v4596_v20, %v3709_v19 }
0x16ab   :  { %v1628_v37 = vsel %vm61_vm0, %v1624_v21, 0.0  ;;  %v1626_v45 = vmul.f32 %v4596_v20, %v3711_v36  ;;  %v3713_v32 = vpop.eup %3712 }
0x16ac   :  { %v1631_v38 = vsel %vm61_vm0, %v1625_v30, 0.0  ;;  %1629 = vadd.xlane.f32.xlu0 %v1628_v37  ;;  %v1627_v15 = vmul.f32 %v4596_v20, %v3713_v32 }
0x16ad   :  { %1632 = vadd.xlane.f32.xlu1 %v1631_v38  ;;  %v1634_v33 = vsel %vm61_vm0, %v1626_v45, 0.0 }
0x16ae   :  { %v1637_v40 = vsel %vm61_vm0, %v1627_v15, 0.0 }
0x16b0   :  { %1635 = vadd.xlane.f32.xlu0 %v1634_v33 }
0x16b4   :  { %1638 = vadd.xlane.f32.xlu0 %v1637_v40 }
0x1735   :  { %v1630_v24 = vpop.xlane.xlu0 %1629 }
0x1736   :  { %v1633_v3 = vpop.xlane.xlu1 %1632  ;;  %v1640_v47 = vadd.f32 %v1630_v24, %v4123_v41 }
0x1737   :  { %v1641_v4 = vadd.f32 %v1633_v3, %v4123_v41 }
0x1738   :  { %v1651_v11 = vrot.slane %v1640_v47, %v4118_v34 }
0x1739   :  { %v1636_v44 = vpop.xlane.xlu0 %1635  ;;  %v1655_v2 = vrot.slane %v1641_v4, %v4121_v39 }
0x173a   :  { %v1642_v48 = vadd.f32 %v1636_v44, %v4123_v41 }
0x173b   :  { %v1656_v8 = vsel %vm456_vm3, %v1655_v2, %v1651_v11 }
0x173c   :  { %v1660_v13 = vrot.slane %v1642_v48, %v4118_v34 }
0x173d   :  { %v1639_v1 = vpop.xlane.xlu0 %1638 }
0x173e   :  { %v1643_v12 = vadd.f32 %v1639_v1, %v4123_v41 }
0x1740   :  { %v1664_v14 = vrot.slane %v1643_v12, %v4121_v39 }
0x1742   :  { %v1665_v10 = vsel %vm456_vm3, %v1664_v14, %v1660_v13 }
0x1743   :  { %v1666_v17 = vsel %vm192_vm2, %v1665_v10, %v1656_v8 }
0x1744   :  { %v1668_v18 = vsel %vm469_vm4, %v1666_v17, -inf }
0x1745   :  { %1669 = vmax.xlane.f32.xlu0 %v1668_v18 }
0x17ce   :  { %v1670_v49 = vpop.xlane.xlu0 %1669 }
0x17cf   :  { %v1675_v51 = vrot.slane %v1670_v49, %v4083_v59  ;;  %v1679_v55 = vrot.slane %v1670_v49, %v4138_v58 }
0x17d1   :  { %v1682_v56 = vsub.f32 %v1640_v47, %v1675_v51  ;;  %v1683_v57 = vsub.f32 %v1641_v4, %v1675_v51  ;;  %v1684_v60 = vsub.f32 %v1642_v48, %v1679_v55  ;;  %v1685_v61 = vsub.f32 %v1643_v12, %v1679_v55 }
0x17d3   :  { %v1686_v62 = vmul.f32 1.442695, %v1682_v56  ;;  %v1688_v26 = vmul.f32 1.442695, %v1683_v57  ;;  %v1690_v27 = vmul.f32 1.442695, %v1684_v60 }
0x17d4   :  { %v1692_v31 = vmul.f32 1.442695, %v1685_v61 }
0x17d5   :  { %3714 = vpow2.f32 %v1686_v62 }
0x17d6   :  { %3716 = vpow2.f32 %v1688_v26 }
0x17d7   :  { %3718 = vpow2.f32 %v1690_v27 }
0x17d8   :  { %3720 = vpow2.f32 %v1692_v31 }
0x17e2   :  { %v3715_v22 = vpop.eup %3714 }
0x17e3   :  { %v3717_v28 = vpop.eup %3716  ;;  %1699 = vperm.xlu0 %3620, %v3715_v22  }
0x17e4   :  { %1702 = vperm.xlu1 %3621, %v3717_v28   ;;  %v3719_v35 = vpop.eup %3718 }
0x17e5   :  { %v3721_v19 = vpop.eup %3720 }
0x17e7   :  { %1705 = vperm.xlu0 %3620, %v3719_v35  }
0x17e8   :  { %1708 = vperm.xlu1 %3621, %v3721_v19  }
0x185e   :  { %v1700_v21 = vpop.permute.xlu0 %1699 }
0x185f   :  { %v1703_v36 = vpop.permute.xlu1 %1702  ;;  %v1713_v37 = vrot.slane %v1700_v21, %v4118_v34 }
0x1860   :  { %v1717_v30 = vrot.slane %v1703_v36, %v4121_v39 }
0x1862   :  { %v1706_v45 = vpop.permute.xlu0 %1705  ;;  %v1718_v15 = vsel %vm456_vm3, %v1717_v30, %v1713_v37 }
0x1863   :  { %v1709_v32 = vpop.permute.xlu1 %1708  ;;  %v1722_v38 = vrot.slane %v1706_v45, %v4118_v34 }
0x1864   :  { %v1726_v33 = vrot.slane %v1709_v32, %v4121_v39 }
0x1866   :  { %v1727_v40 = vsel %vm456_vm3, %v1726_v33, %v1722_v38 }
0x1867   :  { %v1728_v24 = vsel %vm192_vm2, %v1727_v40, %v1718_v15  ;;  %v3163_v15 = vld [vmem:[%s5085_s1 + $0x6] sm:$0x3] }
0x1868   :  { %v1730_v3 = vsel %vm469_vm4, %v1728_v24, 0.0 }
0x1869   :  { %1731 = vadd.xlane.f32.xlu0 %v1730_v3 }
0x18f2   :  { %v1732_v44 = vpop.xlane.xlu0 %1731 }
0x18f3   :  { %v1737_v4 = vrot.slane %v1732_v44, %v4083_v59  ;;  %v1741_v47 = vrot.slane %v1732_v44, %v4138_v58  ;;  %v4661_v44 = vld [vmem:[%s5093_s9] ss:$0 sm:$0xff] }
0x18f5   :  { %3722 = vrcp.f32 %v1737_v4 }
0x18f6   :  { %3724 = vrcp.f32 %v1741_v47 }
0x1902   :  { %v3723_v48 = vpop.eup %3722 }
0x1903   :  { %v1745_v1 = vmul.f32 %v3723_v48, %v3715_v22  ;;  %v1746_v2 = vmul.f32 %v3723_v48, %v3717_v28  ;;  %v3725_v11 = vpop.eup %3724 }
0x1904   :  { %v1748_v12 = vmul.f32 %v3725_v11, %v3719_v35  ;;  %v1749_v13 = vmul.f32 %v3725_v11, %v3721_v19 }
0x1905   :  { %1752 = vperm.xlu1 %3621, %v1745_v1  }
0x1909   :  { %1757 = vperm.xlu1 %3621, %v1746_v2  }
0x190d   :  { %1762 = vperm.xlu1 %3621, %v1748_v12  }
0x1911   :  { %1767 = vperm.xlu1 %3621, %v1749_v13  }
0x1980   :  { %v1753_v14 = vpop.permute.xlu1 %1752 }
0x1981   :  { %v1770_v8 = vmul.f32 %v4470_v43, %v1753_v14 }
0x1983   :  { %v1774_v18 = vsel %vm61_vm0, %v1770_v8, 0.0 }
0x1984   :  { %v1758_v10 = vpop.permute.xlu1 %1757 }
0x1985   :  { %v1771_v17 = vmul.f32 %v4476_v46, %v1758_v10 }
0x1987   :  { %v1775_v49 = vsel %vm61_vm0, %v1771_v17, 0.0 }
0x1988   :  { %v1776_v51 = vadd.f32 %v1775_v49, %v1774_v18  ;;  %v1763_v55 = vpop.permute.xlu1 %1762 }
0x1989   :  { %v1772_v57 = vmul.f32 %v4484_v53, %v1763_v55 }
0x198a   :  { %v1777_v56 = vrot.slane %v1776_v51, 4 }
0x198b   :  { %v1783_v26 = vsel %vm61_vm0, %v1772_v57, 0.0  ;;  %v4699_v57 = vld [vmem:[%s5092_s8 + $0x48] sm:$0xff] }
0x198c   :  { %v1778_v60 = vadd.f32 %v1777_v56, %v1776_v51  ;;  %v1768_v61 = vpop.permute.xlu1 %1767  ;;  %v4692_v56 = vld [vmem:[%s5092_s8 + $0x50] sm:$0xff] }
0x198d   :  { %v1773_v62 = vmul.f32 %v4490_v7, %v1768_v61  ;;  %v4713_v61 = vld [vmem:[%s5092_s8 + $0x38] sm:$0xff] }
0x198e   :  { %v1779_v31 = vrot.slane %v1778_v60, 2 }
0x198f   :  { %v1784_v27 = vsel %vm61_vm0, %v1773_v62, 0.0  ;;  %v4720_v62 = vld [vmem:[%s5092_s8 + $0x30] sm:$0xff] }
0x1990   :  { %v1785_v22 = vadd.f32 %v1784_v27, %v1783_v26  ;;  %v1780_v35 = vadd.f32 %v1779_v31, %v1778_v60  ;;  %v4706_v60 = vld [vmem:[%s5092_s8 + $0x40] sm:$0xff]  ;;  %v4727_v26 = vld [vmem:[%s5092_s8 + $0x28] sm:$0xff]  ;;  %v4741_v31 = vld [vmem:[%s5092_s8 + $0x18] sm:$0xff] }
0x1991   :  { %v4734_v27 = vld [vmem:[%s5092_s8 + $0x20] sm:$0xff] }
0x1992   :  { %v1786_v28 = vrot.slane %v1785_v22, 4  ;;  %v1781_v30 = vrot.slane %v1780_v35, 1 }
0x1994   :  { %v1787_v19 = vadd.f32 %v1786_v28, %v1785_v22  ;;  %v1782_v45 = vadd.f32 %v1781_v30, %v1780_v35  ;;  %v4748_v22 = vld [vmem:[%s5092_s8 + $0x10] sm:$0xff]  ;;  %v4755_v28 = vld [vmem:[%s5092_s8 + $0x8] sm:$0xff]  ;;  %v4762_v35 = vld [vmem:[%s5092_s8] sm:$0xff] }
0x1996   :  { %v1788_v21 = vrot.slane %v1787_v19, 2 }
0x1998   :  { %v1789_v36 = vadd.f32 %v1788_v21, %v1787_v19 }
0x199a   :  { %v1790_v37 = vrot.slane %v1789_v36, 1 }
0x199c   :  { %v1791_v32 = vadd.f32 %v1790_v37, %v1789_v36 }
0x199e   :  { %v1796_v38 = vsel %vm192_vm2, %v1791_v32, %v1782_v45 }
0x199f   :  { %1797 = vrot.lane.b32.xlu1 %v1796_v38, %s3874_s28 }
0x19a3   :  { %1800 = vrot.lane.b32.xlu1 %v4543_v52, %s3876_s7 }
0x1a11   :  { %v1798_v33 = vpop.permute.xlu1 %1797 }
0x1a12   :  { %v1803_v40 = vsel %vm61_vm0, %v3163_v15, %v1798_v33 }
0x1a15   :  { %v1801_v24 = vpop.permute.xlu1 %1800 }
0x1a16   :  { %v1804_v3 = vsel %vm605_vm5, %v1803_v40, %v1801_v24 }
0x1a17   :  { %3496 = vmatmul.mubr.msk.f32.vlgmr.msra.gmra.mxu0 %vm613_vm6, %v1804_v3 }
0x1a18   :  { %3537 = vmatpush3.msra.mxu0 %v4508_v25  ;;  %3544 = vmatprep.mubr.msk.f32.mxu0 %vm3871_vm1, %v3870_v5 }
0x1a19   :  { %3538 = vmatprep.subr.mxu0 %v3870_v5 }
0x1a1a   :  { %3539 = vmatpush3.msra.mxu0 %v4517_v42 }
0x1a1b   :  { %3540 = vmatprep.subr.mxu0 %v3870_v5 }
0x1a1c   :  { %3541 = vmatpush3.msra.mxu0 %v4524_v23 }
0x1a1d   :  { %3542 = vmatprep.subr.mxu0 %v3870_v5 }
0x1a1e   :  { %3543 = vmatpush3.msra.mxu0 %v4531_v29 }
0x1a1f   :  { %3547 = vmatprep.subr.mxu0 %v3870_v5 }
0x1ad7   :  { %v1874_v52 = vpop.f32.mrf.mxu0 }
0x1ad8   :  { %v1875_v4 = vadd.f32 %v4661_v44, %v1874_v52 }
0x1ad9   :  { %v3497_v47 = vpop.f32.mrf.mxu0 }
0x1ada   :  { %3726 = vtanh.f32 %v1875_v4  ;;  %v3165_v1 = vmul.f32 -1.442695, %v1875_v4 }
0x1adc   :  { %3728 = vpow2.f32 %v3165_v1 }
0x1ae7   :  { %v3727_v48 = vpop.eup %3726 }
0x1ae8   :  { %1887 = vrot.lane.b32.xlu1 %v3727_v48, %s3875_s29 }
0x1ae9   :  { %v3729_v2 = vpop.eup %3728 }
0x1aea   :  { %v1881_v11 = vadd.f32 1.0, %v3729_v2 }
0x1aec   :  { %3730 = vrcp.f32 %v1881_v11 }
0x1af9   :  { %v3731_v12 = vpop.eup %3730 }
0x1afa   :  { %v1885_v8 = vmul.f32 %v3731_v12, %v4539_v16  ;;  %v4683_v16 = vld [vmem:[%s5092_s8 + $0x58] sm:$0xff] }
0x1b5a   :  { %v1888_v13 = vpop.permute.xlu1 %1887 }
0x1b5b   :  { %v1890_v14 = vmul.f32 %v3731_v12, %v1888_v13 }
0x1b5d   :  { %1892 = vrot.lane.b32.xlu1 %v1890_v14, %s3874_s28 }
0x1bcf   :  { %v1893_v10 = vpop.permute.xlu1 %1892 }
0x1bd0   :  { %v4667_v17 = vadd.f32 %v1893_v10, %v1885_v8 }
0x1bd2   :  { %3732 = vtanh.f32 %v4667_v17 }
0x1bdf   :  { %v3733_v18 = vpop.eup %3732 }
0x1be0   :  { %1898 = vrot.lane.b32.xlu0 %v3733_v18, %s3875_s29 }
0x1c52   :  { %v1899_v49 = vpop.permute.xlu0 %1898 }
0x1c53   :  { %v4671_v51 = vmul.f32 %v3731_v12, %v1899_v49 }
0x1c55   :  { %1903 = vrot.lane.b32.xlu1 %v4671_v51, %s3874_s28 }
0x1cc7   :  { %v1904_v55 = vpop.permute.xlu1 %1903 }
0x1cc8   :  { %3166 = vst.msk [vmem:[%s5096_s12 + $0x6] sm:$0x3] %vm715_vm7, %v1904_v55  ;;  %3507 = vmatmul.mubr.msk.f32.vlgmr.msra.gmra.mxu1 %vm61_vm0, %v1904_v55 }
0x1cc9   :  { %3510 = vmatpush3.msra.mxu1 %v4683_v16  ;;  %3533 = vmatprep.mubr.msk.f32.mxu1 %vm3871_vm1, %v3870_v5 }
0x1cca   :  { %3511 = vmatprep.subr.mxu1 %v3870_v5 }
0x1ccb   :  { %3512 = vmatpush3.msra.mxu1 %v4692_v56 }
0x1ccc   :  { %3513 = vmatprep.subr.mxu1 %v3870_v5 }
0x1ccd   :  { %3514 = vmatpush3.msra.mxu1 %v4699_v57 }
0x1cce   :  { %3515 = vmatprep.subr.mxu1 %v3870_v5 }
0x1ccf   :  { %3516 = vmatpush3.msra.mxu1 %v4706_v60 }
0x1cd0   :  { %3517 = vmatprep.subr.mxu1 %v3870_v5 }
0x1cd1   :  { %3518 = vmatpush3.msra.mxu1 %v4713_v61 }
0x1cd2   :  { %3519 = vmatprep.subr.mxu1 %v3870_v5 }
0x1cd3   :  { %3520 = vmatpush3.msra.mxu1 %v4720_v62 }
0x1cd4   :  { %3521 = vmatprep.subr.mxu1 %v3870_v5 }
0x1cd5   :  { %3522 = vmatpush3.msra.mxu1 %v4727_v26 }
0x1cd6   :  { %3523 = vmatprep.subr.mxu1 %v3870_v5 }
0x1cd7   :  { %3524 = vmatpush3.msra.mxu1 %v4734_v27 }
0x1cd8   :  { %3525 = vmatprep.subr.mxu1 %v3870_v5 }
0x1cd9   :  { %3526 = vmatpush3.msra.mxu1 %v4741_v31 }
0x1cda   :  { %3527 = vmatprep.subr.mxu1 %v3870_v5 }
0x1cdb   :  { %3528 = vmatpush3.msra.mxu1 %v4748_v22 }
0x1cdc   :  { %3529 = vmatprep.subr.mxu1 %v3870_v5 }
0x1cdd   :  { %3530 = vmatpush3.msra.mxu1 %v4755_v28 }
0x1cde   :  { %3531 = vmatprep.subr.mxu1 %v3870_v5 }
0x1cdf   :  { %3532 = vmatpush3.msra.mxu1 %v4762_v35 }
0x1ce0   :  { %3574 = vmatprep.subr.mxu1 %v3870_v5 }
0x1d88   :  { %v1976_v19 = vpop.f32.mrf.mxu1 }
0x1d89   :  { %v1977_v21 = vadd.f32 %v4581_v50, %v1976_v19 }
0x1d8a   :  { %v3508_v36 = vpop.f32.mrf.mxu1 }
0x1d8b   :  { %v1987_v30 = vrot.slane %v1977_v21, %v4078_v54 }
0x1d8d   :  { %v1988_v37 = vcombine.high %v1987_v30, %v1987_v30  ;;  %v1995_v45 = vrot.slane %v1987_v30, %v4078_v54 }
0x1d8f   :  { %v2002_v32 = vrot.slane %v1988_v37, %v4078_v54  ;;  %v2006_v38 = vrot.slane %v1995_v45, %v4083_v59 }
0x1d91   :  { %v2010_v33 = vrot.slane %v2002_v32, %v4083_v59  ;;  %v2013_v15 = vadd.f32 %v2006_v38, %v4091_v0  ;;  %v2014_v40 = vadd.f32 %v2006_v38, %v4089_v63 }
0x1d93   :  { %v2015_v24 = vadd.f32 %v2010_v33, %v4097_v9  ;;  %v2016_v3 = vadd.f32 %v2010_v33, %v4095_v6  ;;  %3734 = vtanh.f32 %v2013_v15 }
0x1d94   :  { %3736 = vtanh.f32 %v2014_v40 }
0x1d95   :  { %3738 = vtanh.f32 %v2015_v24 }
0x1d96   :  { %3740 = vtanh.f32 %v2016_v3 }
0x1da0   :  { %v3735_v52 = vpop.eup %3734 }
0x1da1   :  { %v3737_v4 = vpop.eup %3736  ;;  %v2021_v47 = vmul.f32 %v4596_v20, %v3735_v52 }
0x1da2   :  { %v3739_v48 = vpop.eup %3738  ;;  %v2022_v1 = vmul.f32 %v4596_v20, %v3737_v4 }
0x1da3   :  { %v2025_v2 = vsel %vm61_vm0, %v2021_v47, 0.0  ;;  %v2023_v11 = vmul.f32 %v4596_v20, %v3739_v48  ;;  %v3741_v12 = vpop.eup %3740 }
0x1da4   :  { %v2028_v13 = vsel %vm61_vm0, %v2022_v1, 0.0  ;;  %2026 = vadd.xlane.f32.xlu1 %v2025_v2  ;;  %v2024_v8 = vmul.f32 %v4596_v20, %v3741_v12 }
0x1da5   :  { %2029 = vadd.xlane.f32.xlu0 %v2028_v13  ;;  %v2031_v14 = vsel %vm61_vm0, %v2023_v11, 0.0 }
0x1da6   :  { %v2034_v10 = vsel %vm61_vm0, %v2024_v8, 0.0 }
0x1da8   :  { %2032 = vadd.xlane.f32.xlu1 %v2031_v14 }
0x1dac   :  { %2035 = vadd.xlane.f32.xlu1 %v2034_v10 }
0x1e2d   :  { %v2027_v18 = vpop.xlane.xlu1 %2026 }
0x1e2e   :  { %v2030_v49 = vpop.xlane.xlu0 %2029  ;;  %v2037_v21 = vadd.f32 %v2027_v18, %v4123_v41 }
0x1e2f   :  { %v2038_v19 = vadd.f32 %v2030_v49, %v4123_v41 }
0x1e30   :  { %v2048_v45 = vrot.slane %v2037_v21, %v4118_v34 }
0x1e31   :  { %v2033_v55 = vpop.xlane.xlu1 %2032  ;;  %v2052_v37 = vrot.slane %v2038_v19, %v4121_v39 }
0x1e32   :  { %v2039_v36 = vadd.f32 %v2033_v55, %v4123_v41 }
0x1e33   :  { %v2053_v15 = vsel %vm456_vm3, %v2052_v37, %v2048_v45 }
0x1e34   :  { %v2057_v38 = vrot.slane %v2039_v36, %v4118_v34 }
0x1e35   :  { %v2036_v30 = vpop.xlane.xlu1 %2035 }
0x1e36   :  { %v2040_v32 = vadd.f32 %v2036_v30, %v4123_v41 }
0x1e38   :  { %v2061_v33 = vrot.slane %v2040_v32, %v4121_v39 }
0x1e3a   :  { %v2062_v40 = vsel %vm456_vm3, %v2061_v33, %v2057_v38 }
0x1e3b   :  { %v2063_v24 = vsel %vm192_vm2, %v2062_v40, %v2053_v15 }
0x1e3c   :  { %v2065_v3 = vsel %vm469_vm4, %v2063_v24, -inf }
0x1e3d   :  { %2066 = vmax.xlane.f32.xlu1 %v2065_v3 }
0x1ec6   :  { %v2067_v52 = vpop.xlane.xlu1 %2066 }
0x1ec7   :  { %v2072_v4 = vrot.slane %v2067_v52, %v4083_v59  ;;  %v2076_v47 = vrot.slane %v2067_v52, %v4138_v58 }
0x1ec9   :  { %v2079_v48 = vsub.f32 %v2037_v21, %v2072_v4  ;;  %v2080_v1 = vsub.f32 %v2038_v19, %v2072_v4  ;;  %v2082_v2 = vsub.f32 %v2040_v32, %v2076_v47  ;;  %v2081_v11 = vsub.f32 %v2039_v36, %v2076_v47 }
0x1ecb   :  { %v2083_v12 = vmul.f32 1.442695, %v2079_v48  ;;  %v2085_v13 = vmul.f32 1.442695, %v2080_v1  ;;  %v2089_v14 = vmul.f32 1.442695, %v2082_v2 }
0x1ecc   :  { %v2087_v8 = vmul.f32 1.442695, %v2081_v11 }
0x1ecd   :  { %3742 = vpow2.f32 %v2083_v12 }
0x1ece   :  { %3744 = vpow2.f32 %v2085_v13 }
0x1ecf   :  { %3746 = vpow2.f32 %v2089_v14 }
0x1ed0   :  { %3748 = vpow2.f32 %v2087_v8 }
0x1eda   :  { %v3743_v10 = vpop.eup %3742 }
0x1edb   :  { %v3745_v18 = vpop.eup %3744  ;;  %2096 = vperm.xlu0 %3620, %v3743_v10  }
0x1edc   :  { %2099 = vperm.xlu1 %3621, %v3745_v18   ;;  %v3747_v49 = vpop.eup %3746 }
0x1edd   :  { %v3749_v55 = vpop.eup %3748 }
0x1edf   :  { %2105 = vperm.xlu0 %3620, %v3747_v49  }
0x1ee0   :  { %2102 = vperm.xlu1 %3621, %v3749_v55  }
0x1f56   :  { %v2097_v21 = vpop.permute.xlu0 %2096 }
0x1f57   :  { %v2100_v19 = vpop.permute.xlu1 %2099  ;;  %v2110_v30 = vrot.slane %v2097_v21, %v4118_v34 }
0x1f58   :  { %v2114_v36 = vrot.slane %v2100_v19, %v4121_v39 }
0x1f5a   :  { %v2106_v37 = vpop.permute.xlu0 %2105  ;;  %v2115_v33 = vsel %vm456_vm3, %v2114_v36, %v2110_v30 }
0x1f5b   :  { %v2103_v45 = vpop.permute.xlu1 %2102  ;;  %v2123_v32 = vrot.slane %v2106_v37, %v4121_v39 }
0x1f5c   :  { %v2119_v38 = vrot.slane %v2103_v45, %v4118_v34 }
0x1f5e   :  { %v2124_v15 = vsel %vm456_vm3, %v2123_v32, %v2119_v38 }
0x1f5f   :  { %v2125_v40 = vsel %vm192_vm2, %v2124_v15, %v2115_v33 }
0x1f60   :  { %v2127_v24 = vsel %vm469_vm4, %v2125_v40, 0.0 }
0x1f61   :  { %2128 = vadd.xlane.f32.xlu1 %v2127_v24 }
0x1fea   :  { %v2129_v3 = vpop.xlane.xlu1 %2128 }
0x1feb   :  { %v2134_v52 = vrot.slane %v2129_v3, %v4083_v59  ;;  %v2138_v4 = vrot.slane %v2129_v3, %v4138_v58 }
0x1fed   :  { %3750 = vrcp.f32 %v2134_v52 }
0x1fee   :  { %3752 = vrcp.f32 %v2138_v4 }
0x1ffa   :  { %v3751_v47 = vpop.eup %3750 }
0x1ffb   :  { %v2142_v48 = vmul.f32 %v3751_v47, %v3743_v10  ;;  %v2143_v1 = vmul.f32 %v3751_v47, %v3745_v18  ;;  %v3753_v2 = vpop.eup %3752 }
0x1ffc   :  { %v2145_v11 = vmul.f32 %v3753_v2, %v3749_v55  ;;  %v2146_v12 = vmul.f32 %v3753_v2, %v3747_v49 }
0x1ffd   :  { %2149 = vperm.xlu0 %3620, %v2142_v48  }
0x2001   :  { %2154 = vperm.xlu0 %3620, %v2143_v1   ;;  %v3168_v1 = vld [vmem:[%s5085_s1 + $0x8] sm:$0x3] }
0x2005   :  { %2159 = vperm.xlu0 %3620, %v2145_v11  }
0x2009   :  { %2164 = vperm.xlu0 %3620, %v2146_v12  }
0x2078   :  { %v2150_v13 = vpop.permute.xlu0 %2149 }
0x2079   :  { %v2167_v14 = vmul.f32 %v4470_v43, %v2150_v13 }
0x207b   :  { %v2171_v19 = vsel %vm61_vm0, %v2167_v14, 0.0 }
0x207c   :  { %v2155_v8 = vpop.permute.xlu0 %2154 }
0x207d   :  { %v2168_v21 = vmul.f32 %v4476_v46, %v2155_v8 }
0x207f   :  { %v2172_v36 = vsel %vm61_vm0, %v2168_v21, 0.0 }
0x2080   :  { %v2173_v30 = vadd.f32 %v2172_v36, %v2171_v19  ;;  %v2160_v10 = vpop.permute.xlu0 %2159 }
0x2081   :  { %v2169_v18 = vmul.f32 %v4484_v53, %v2160_v10 }
0x2082   :  { %v2174_v37 = vrot.slane %v2173_v30, 4 }
0x2083   :  { %v2180_v32 = vsel %vm61_vm0, %v2169_v18, 0.0 }
0x2084   :  { %v2175_v45 = vadd.f32 %v2174_v37, %v2173_v30  ;;  %v2165_v55 = vpop.permute.xlu0 %2164 }
0x2085   :  { %v2170_v49 = vmul.f32 %v4490_v7, %v2165_v55 }
0x2086   :  { %v2176_v38 = vrot.slane %v2175_v45, 2 }
0x2087   :  { %v2181_v43 = vsel %vm61_vm0, %v2170_v49, 0.0 }
0x2088   :  { %v2182_v33 = vadd.f32 %v2181_v43, %v2180_v32  ;;  %v2177_v15 = vadd.f32 %v2176_v38, %v2175_v45 }
0x208a   :  { %v2183_v46 = vrot.slane %v2182_v33, 4  ;;  %v2178_v52 = vrot.slane %v2177_v15, 1 }
0x208c   :  { %v2184_v40 = vadd.f32 %v2183_v46, %v2182_v33  ;;  %v2179_v47 = vadd.f32 %v2178_v52, %v2177_v15 }
0x208e   :  { %v2185_v24 = vrot.slane %v2184_v40, 2 }
0x2090   :  { %v2186_v3 = vadd.f32 %v2185_v24, %v2184_v40 }
0x2092   :  { %v2187_v4 = vrot.slane %v2186_v3, 1 }
0x2094   :  { %v2188_v48 = vadd.f32 %v2187_v4, %v2186_v3 }
0x2096   :  { %v2193_v53 = vsel %vm192_vm2, %v2188_v48, %v2179_v47 }
0x2097   :  { %2194 = vrot.lane.b32.xlu0 %v2193_v53, %s3874_s28 }
0x209b   :  { %2197 = vrot.lane.b32.xlu0 %v4671_v51, %s3876_s7 }
0x2109   :  { %v2195_v7 = vpop.permute.xlu0 %2194 }
0x210a   :  { %v2200_v2 = vsel %vm61_vm0, %v3168_v1, %v2195_v7 }
0x210d   :  { %v2198_v11 = vpop.permute.xlu0 %2197 }
0x210e   :  { %v2201_v12 = vsel %vm605_vm5, %v2200_v2, %v2198_v11 }
0x210f   :  { %3534 = vmatmul.mubr.msk.f32.vlgmr.msra.gmra.mxu1 %vm613_vm6, %v2201_v12 }
0x2110   :  { %3575 = vmatpush3.msra.mxu1 %v4508_v25  ;;  %3582 = vmatprep.mubr.msk.f32.mxu1 %vm3871_vm1, %v3870_v5 }
0x2111   :  { %3576 = vmatprep.subr.mxu1 %v3870_v5 }
0x2112   :  { %3577 = vmatpush3.msra.mxu1 %v4517_v42 }
0x2113   :  { %3578 = vmatprep.subr.mxu1 %v3870_v5 }
0x2114   :  { %3579 = vmatpush3.msra.mxu1 %v4524_v23 }
0x2115   :  { %3580 = vmatprep.subr.mxu1 %v3870_v5 }
0x2116   :  { %3581 = vmatpush3.msra.mxu1 %v4531_v29 }
0x2117   :  { %3585 = vmatprep.subr.mxu1 %v3870_v5 }
0x21cf   :  { %v2271_v51 = vpop.f32.mrf.mxu1 }
0x21d0   :  { %v2272_v25 = vadd.f32 %v4661_v44, %v2271_v51 }
0x21d1   :  { %v3535_v13 = vpop.f32.mrf.mxu1 }
0x21d2   :  { %3754 = vtanh.f32 %v2272_v25  ;;  %v3170_v8 = vmul.f32 -1.442695, %v2272_v25 }
0x21d4   :  { %3756 = vpow2.f32 %v3170_v8 }
0x21df   :  { %v3755_v14 = vpop.eup %3754 }
0x21e0   :  { %2284 = vrot.lane.b32.xlu0 %v3755_v14, %s3875_s29 }
0x21e1   :  { %v3757_v42 = vpop.eup %3756 }
0x21e2   :  { %v2278_v21 = vadd.f32 1.0, %v3757_v42 }
0x21e4   :  { %3758 = vrcp.f32 %v2278_v21 }
0x21f1   :  { %v3759_v23 = vpop.eup %3758 }
0x21f2   :  { %v2282_v29 = vmul.f32 %v3759_v23, %v4667_v17 }
0x2252   :  { %v2285_v19 = vpop.permute.xlu0 %2284 }
0x2253   :  { %v2287_v36 = vmul.f32 %v3759_v23, %v2285_v19 }
0x2255   :  { %2289 = vrot.lane.b32.xlu0 %v2287_v36, %s3874_s28 }
0x22c7   :  { %v2290_v30 = vpop.permute.xlu0 %2289 }
0x22c8   :  { %v4840_v10 = vadd.f32 %v2290_v30, %v2282_v29 }
0x22ca   :  { %3760 = vtanh.f32 %v4840_v10 }
0x22d7   :  { %v3761_v37 = vpop.eup %3760 }
0x22d8   :  { %2295 = vrot.lane.b32.xlu0 %v3761_v37, %s3875_s29 }
0x234a   :  { %v2296_v18 = vpop.permute.xlu0 %2295 }
0x234b   :  { %v4844_v45 = vmul.f32 %v3759_v23, %v2296_v18 }
0x234d   :  { %2300 = vrot.lane.b32.xlu1 %v4844_v45, %s3874_s28 }
0x23bf   :  { %v2301_v55 = vpop.permute.xlu1 %2300 }
0x23c0   :  { %3171 = vst.msk [vmem:[%s5096_s12 + $0x8] sm:$0x3] %vm715_vm7, %v2301_v55  ;;  %3545 = vmatmul.mubr.msk.f32.vlgmr.msra.gmra.mxu0 %vm61_vm0, %v2301_v55 }
0x23c1   :  { %3548 = vmatpush3.msra.mxu0 %v4683_v16  ;;  %3571 = vmatprep.mubr.msk.f32.mxu0 %vm3871_vm1, %v3870_v5 }
0x23c2   :  { %3549 = vmatprep.subr.mxu0 %v3870_v5 }
0x23c3   :  { %3550 = vmatpush3.msra.mxu0 %v4692_v56 }
0x23c4   :  { %3551 = vmatprep.subr.mxu0 %v3870_v5 }
0x23c5   :  { %3552 = vmatpush3.msra.mxu0 %v4699_v57 }
0x23c6   :  { %3553 = vmatprep.subr.mxu0 %v3870_v5 }
0x23c7   :  { %3554 = vmatpush3.msra.mxu0 %v4706_v60 }
0x23c8   :  { %3555 = vmatprep.subr.mxu0 %v3870_v5 }
0x23c9   :  { %3556 = vmatpush3.msra.mxu0 %v4713_v61 }
0x23ca   :  { %3557 = vmatprep.subr.mxu0 %v3870_v5 }
0x23cb   :  { %3558 = vmatpush3.msra.mxu0 %v4720_v62 }
0x23cc   :  { %3559 = vmatprep.subr.mxu0 %v3870_v5 }
0x23cd   :  { %3560 = vmatpush3.msra.mxu0 %v4727_v26 }
0x23ce   :  { %3561 = vmatprep.subr.mxu0 %v3870_v5 }
0x23cf   :  { %3562 = vmatpush3.msra.mxu0 %v4734_v27 }
0x23d0   :  { %3563 = vmatprep.subr.mxu0 %v3870_v5 }
0x23d1   :  { %3564 = vmatpush3.msra.mxu0 %v4741_v31 }
0x23d2   :  { %3565 = vmatprep.subr.mxu0 %v3870_v5 }
0x23d3   :  { %3566 = vmatpush3.msra.mxu0 %v4748_v22 }
0x23d4   :  { %3567 = vmatprep.subr.mxu0 %v3870_v5 }
0x23d5   :  { %3568 = vmatpush3.msra.mxu0 %v4755_v28 }
0x23d6   :  { %3569 = vmatprep.subr.mxu0 %v3870_v5 }
0x23d7   :  { %3570 = vmatpush3.msra.mxu0 %v4762_v35 }
0x2480   :  { %v2373_v17 = vpop.f32.mrf.mxu0 }
0x2481   :  { %v2374_v49 = vadd.f32 %v4581_v50, %v2373_v17 }
0x2482   :  { %v3546_v32 = vpop.f32.mrf.mxu0 }
0x2483   :  { %v2384_v43 = vrot.slane %v2374_v49, %v4078_v54 }
0x2485   :  { %v2385_v38 = vcombine.high %v2384_v43, %v2384_v43  ;;  %v2392_v33 = vrot.slane %v2384_v43, %v4078_v54 }
0x2487   :  { %v2399_v46 = vrot.slane %v2385_v38, %v4078_v54  ;;  %v2403_v15 = vrot.slane %v2392_v33, %v4083_v59 }
0x2489   :  { %v2407_v40 = vrot.slane %v2399_v46, %v4083_v59  ;;  %v2410_v24 = vadd.f32 %v2403_v15, %v4091_v0  ;;  %v2411_v3 = vadd.f32 %v2403_v15, %v4089_v63 }
0x248b   :  { %v2412_v52 = vadd.f32 %v2407_v40, %v4097_v9  ;;  %v2413_v50 = vadd.f32 %v2407_v40, %v4095_v6  ;;  %3762 = vtanh.f32 %v2410_v24 }
0x248c   :  { %3764 = vtanh.f32 %v2411_v3 }
0x248d   :  { %3766 = vtanh.f32 %v2412_v52 }
0x248e   :  { %3768 = vtanh.f32 %v2413_v50 }
0x2498   :  { %v3763_v4 = vpop.eup %3762 }
0x2499   :  { %v3765_v47 = vpop.eup %3764  ;;  %v2418_v48 = vmul.f32 %v4596_v20, %v3763_v4 }
0x249a   :  { %v3767_v53 = vpop.eup %3766  ;;  %v2419_v7 = vmul.f32 %v4596_v20, %v3765_v47 }
0x249b   :  { %v2422_v1 = vsel %vm61_vm0, %v2418_v48, 0.0  ;;  %v2420_v2 = vmul.f32 %v4596_v20, %v3767_v53  ;;  %v3769_v11 = vpop.eup %3768 }
0x249c   :  { %v2425_v12 = vsel %vm61_vm0, %v2419_v7, 0.0  ;;  %2423 = vadd.xlane.f32.xlu0 %v2422_v1  ;;  %v2421_v25 = vmul.f32 %v4596_v20, %v3769_v11 }
0x249d   :  { %2426 = vadd.xlane.f32.xlu1 %v2425_v12  ;;  %v2428_v51 = vsel %vm61_vm0, %v2420_v2, 0.0 }
0x249e   :  { %v2431_v13 = vsel %vm61_vm0, %v2421_v25, 0.0 }
0x24a0   :  { %2429 = vadd.xlane.f32.xlu0 %v2428_v51 }
0x24a4   :  { %2432 = vadd.xlane.f32.xlu0 %v2431_v13 }
0x2525   :  { %v2424_v14 = vpop.xlane.xlu0 %2423 }
0x2526   :  { %v2427_v8 = vpop.xlane.xlu1 %2426  ;;  %v2434_v23 = vadd.f32 %v2424_v14, %v4123_v41 }
0x2527   :  { %v2435_v21 = vadd.f32 %v2427_v8, %v4123_v41 }
0x2528   :  { %v2445_v30 = vrot.slane %v2434_v23, %v4118_v34 }
0x2529   :  { %v2430_v42 = vpop.xlane.xlu0 %2429  ;;  %v2449_v29 = vrot.slane %v2435_v21, %v4121_v39 }
0x252a   :  { %v2436_v19 = vadd.f32 %v2430_v42, %v4123_v41 }
0x252b   :  { %v2450_v55 = vsel %vm456_vm3, %v2449_v29, %v2445_v30 }
0x252c   :  { %v2454_v37 = vrot.slane %v2436_v19, %v4118_v34 }
0x252d   :  { %v2433_v36 = vpop.xlane.xlu0 %2432 }
0x252e   :  { %v2437_v20 = vadd.f32 %v2433_v36, %v4123_v41 }
0x2530   :  { %v2458_v18 = vrot.slane %v2437_v20, %v4121_v39 }
0x2532   :  { %v2459_v17 = vsel %vm456_vm3, %v2458_v18, %v2454_v37 }
0x2533   :  { %v2460_v49 = vsel %vm192_vm2, %v2459_v17, %v2450_v55 }
0x2534   :  { %v2462_v32 = vsel %vm469_vm4, %v2460_v49, -inf }
0x2535   :  { %2463 = vmax.xlane.f32.xlu0 %v2462_v32  ;;  %v4923_v32 = vld [vmem:[%s5084_s0] sm:$0xff] }
0x25be   :  { %v2464_v43 = vpop.xlane.xlu0 %2463 }
0x25bf   :  { %v2469_v38 = vrot.slane %v2464_v43, %v4083_v59  ;;  %v2473_v33 = vrot.slane %v2464_v43, %v4138_v58 }
0x25c1   :  { %v2476_v46 = vsub.f32 %v2434_v23, %v2469_v38  ;;  %v2477_v15 = vsub.f32 %v2435_v21, %v2469_v38  ;;  %v2478_v40 = vsub.f32 %v2436_v19, %v2473_v33  ;;  %v2479_v24 = vsub.f32 %v2437_v20, %v2473_v33  ;;  %v4929_v33 = vld [vmem:[%s5084_s0 + $0x8] sm:$0xff] }
0x25c3   :  { %v2480_v3 = vmul.f32 1.442695, %v2476_v46  ;;  %v2482_v52 = vmul.f32 1.442695, %v2477_v15  ;;  %v2484_v50 = vmul.f32 1.442695, %v2478_v40 }
0x25c4   :  { %v2486_v4 = vmul.f32 1.442695, %v2479_v24 }
0x25c5   :  { %3770 = vpow2.f32 %v2480_v3 }
0x25c6   :  { %3772 = vpow2.f32 %v2482_v52 }
0x25c7   :  { %3774 = vpow2.f32 %v2484_v50  ;;  %v4937_v50 = vld [vmem:[%s5084_s0 + $0x10] sm:$0xff] }
0x25c8   :  { %3776 = vpow2.f32 %v2486_v4 }
0x25d2   :  { %v3771_v47 = vpop.eup %3770 }
0x25d3   :  { %v3773_v48 = vpop.eup %3772  ;;  %2493 = vperm.xlu0 %3620, %v3771_v47  }
0x25d4   :  { %2496 = vperm.xlu1 %3621, %v3773_v48   ;;  %v3775_v53 = vpop.eup %3774 }
0x25d5   :  { %v3777_v7 = vpop.eup %3776 }
0x25d7   :  { %2499 = vperm.xlu0 %3620, %v3775_v53  }
0x25d8   :  { %2502 = vperm.xlu1 %3621, %v3777_v7  }
0x264e   :  { %v2494_v1 = vpop.permute.xlu0 %2493 }
0x264f   :  { %v2497_v2 = vpop.permute.xlu1 %2496  ;;  %v2507_v12 = vrot.slane %v2494_v1, %v4118_v34 }
0x2650   :  { %v2511_v11 = vrot.slane %v2497_v2, %v4121_v39 }
0x2652   :  { %v2500_v51 = vpop.permute.xlu0 %2499  ;;  %v2512_v8 = vsel %vm456_vm3, %v2511_v11, %v2507_v12 }
0x2653   :  { %v2503_v25 = vpop.permute.xlu1 %2502  ;;  %v2516_v13 = vrot.slane %v2500_v51, %v4118_v34 }
0x2654   :  { %v2520_v14 = vrot.slane %v2503_v25, %v4121_v39 }
0x2656   :  { %v2521_v42 = vsel %vm456_vm3, %v2520_v14, %v2516_v13 }
0x2657   :  { %v2522_v21 = vsel %vm192_vm2, %v2521_v42, %v2512_v8 }
0x2658   :  { %v2524_v23 = vsel %vm469_vm4, %v2522_v21, 0.0 }
0x2659   :  { %2525 = vadd.xlane.f32.xlu0 %v2524_v23 }
0x26e2   :  { %v2526_v19 = vpop.xlane.xlu0 %2525 }
0x26e3   :  { %v2531_v36 = vrot.slane %v2526_v19, %v4083_v59  ;;  %v2535_v29 = vrot.slane %v2526_v19, %v4138_v58 }
0x26e5   :  { %3778 = vrcp.f32 %v2531_v36 }
0x26e6   :  { %3780 = vrcp.f32 %v2535_v29 }
0x26f2   :  { %v3779_v30 = vpop.eup %3778 }
0x26f3   :  { %v2539_v20 = vmul.f32 %v3779_v30, %v3771_v47  ;;  %v2540_v37 = vmul.f32 %v3779_v30, %v3773_v48  ;;  %v3781_v18 = vpop.eup %3780  ;;  %v3173_v30 = vld [vmem:[%s5085_s1 + $0xa] sm:$0x3] }
0x26f4   :  { %v2542_v55 = vmul.f32 %v3781_v18, %v3775_v53  ;;  %v2543_v17 = vmul.f32 %v3781_v18, %v3777_v7  ;;  %v4943_v53 = vld [vmem:[%s5084_s0 + $0x18] sm:$0xff] }
0x26f5   :  { %2546 = vperm.xlu1 %3621, %v2539_v20  }
0x26f9   :  { %2551 = vperm.xlu1 %3621, %v2540_v37  }
0x26fd   :  { %2556 = vperm.xlu1 %3621, %v2542_v55  }
0x2701   :  { %2561 = vperm.xlu1 %3621, %v2543_v17  }
0x2770   :  { %v2547_v49 = vpop.permute.xlu1 %2546 }
0x2771   :  { %v2564_v43 = vmul.f32 %v4923_v32, %v2547_v49 }
0x2773   :  { %v2568_v15 = vsel %vm61_vm0, %v2564_v43, 0.0 }
0x2774   :  { %v2552_v38 = vpop.permute.xlu1 %2551 }
0x2775   :  { %v2565_v46 = vmul.f32 %v4929_v33, %v2552_v38 }
0x2777   :  { %v2569_v40 = vsel %vm61_vm0, %v2565_v46, 0.0 }
0x2778   :  { %v2570_v24 = vadd.f32 %v2569_v40, %v2568_v15  ;;  %v2557_v3 = vpop.permute.xlu1 %2556 }
0x2779   :  { %v2566_v4 = vmul.f32 %v4937_v50, %v2557_v3 }
0x277a   :  { %v2571_v52 = vrot.slane %v2570_v24, 4 }
0x277b   :  { %v2577_v1 = vsel %vm61_vm0, %v2566_v4, 0.0 }
0x277c   :  { %v2572_v47 = vadd.f32 %v2571_v52, %v2570_v24  ;;  %v2562_v48 = vpop.permute.xlu1 %2561 }
0x277d   :  { %v2567_v7 = vmul.f32 %v4943_v53, %v2562_v48 }
0x277e   :  { %v2573_v11 = vrot.slane %v2572_v47, 2 }
0x277f   :  { %v2578_v2 = vsel %vm61_vm0, %v2567_v7, 0.0 }
0x2780   :  { %v2579_v12 = vadd.f32 %v2578_v2, %v2577_v1  ;;  %v2574_v25 = vadd.f32 %v2573_v11, %v2572_v47 }
0x2782   :  { %v2580_v51 = vrot.slane %v2579_v12, 4  ;;  %v2575_v8 = vrot.slane %v2574_v25, 1 }
0x2784   :  { %v2581_v13 = vadd.f32 %v2580_v51, %v2579_v12  ;;  %v2576_v23 = vadd.f32 %v2575_v8, %v2574_v25 }
0x2786   :  { %v2582_v14 = vrot.slane %v2581_v13, 2 }
0x2788   :  { %v2583_v42 = vadd.f32 %v2582_v14, %v2581_v13 }
0x278a   :  { %v2584_v21 = vrot.slane %v2583_v42, 1 }
0x278c   :  { %v2585_v19 = vadd.f32 %v2584_v21, %v2583_v42 }
0x278e   :  { %v2590_v36 = vsel %vm192_vm2, %v2585_v19, %v2576_v23 }
0x278f   :  { %2591 = vrot.lane.b32.xlu1 %v2590_v36, %s3874_s28 }
0x2793   :  { %2594 = vrot.lane.b32.xlu1 %v4844_v45, %s3876_s7 }
0x2801   :  { %v2592_v29 = vpop.permute.xlu1 %2591 }
0x2802   :  { %v2597_v20 = vsel %vm61_vm0, %v3173_v30, %v2592_v29 }
0x2805   :  { %v2595_v37 = vpop.permute.xlu1 %2594 }
0x2806   :  { %v2598_v18 = vsel %vm605_vm5, %v2597_v20, %v2595_v37 }
0x2807   :  { %3572 = vmatmul.mubr.msk.f32.vlgmr.msra.gmra.mxu0 %vm613_vm6, %v2598_v18 }
0x28c7   :  { %v2668_v55 = vpop.f32.mrf.mxu0 }
0x28c8   :  { %v2669_v17 = vadd.f32 %v4661_v44, %v2668_v55 }
0x28c9   :  { %v3573_v49 = vpop.f32.mrf.mxu0 }
0x28ca   :  { %3782 = vtanh.f32 %v2669_v17  ;;  %v3175_v45 = vmul.f32 -1.442695, %v2669_v17 }
0x28cc   :  { %3784 = vpow2.f32 %v3175_v45 }
0x28d7   :  { %v3783_v43 = vpop.eup %3782 }
0x28d8   :  { %2681 = vrot.lane.b32.xlu1 %v3783_v43, %s3875_s29 }
0x28d9   :  { %v3785_v38 = vpop.eup %3784 }
0x28da   :  { %v2675_v46 = vadd.f32 1.0, %v3785_v38 }
0x28dc   :  { %3786 = vrcp.f32 %v2675_v46 }
0x28e9   :  { %v3787_v15 = vpop.eup %3786 }
0x28ea   :  { %v2679_v3 = vmul.f32 %v3787_v15, %v4840_v10 }
0x294a   :  { %v2682_v40 = vpop.permute.xlu1 %2681 }
0x294b   :  { %v2684_v24 = vmul.f32 %v3787_v15, %v2682_v40 }
0x294d   :  { %2686 = vrot.lane.b32.xlu1 %v2684_v24, %s3874_s28 }
0x29bf   :  { %v2687_v52 = vpop.permute.xlu1 %2686 }
0x29c0   :  { %v4962_v4 = vadd.f32 %v2687_v52, %v2679_v3 }
0x29c2   :  { %3788 = vtanh.f32 %v4962_v4 }
0x29cf   :  { %v3789_v44 = vpop.eup %3788 }
0x29d0   :  { %2692 = vrot.lane.b32.xlu0 %v3789_v44, %s3875_s29 }
0x2a42   :  { %v2693_v47 = vpop.permute.xlu0 %2692 }
0x2a43   :  { %v4966_v48 = vmul.f32 %v3787_v15, %v2693_v47 }
0x2a45   :  { %2697 = vrot.lane.b32.xlu1 %v4966_v48, %s3874_s28 }
0x2ab7   :  { %v2698_v7 = vpop.permute.xlu1 %2697 }
0x2ab8   :  { %3176 = vst.msk [vmem:[%s5096_s12 + $0xa] sm:$0x3] %vm715_vm7, %v2698_v7  ;;  %3583 = vmatmul.mubr.msk.f32.vlgmr.msra.gmra.mxu1 %vm61_vm0, %v2698_v7 }
0x2ab9   :  { %3586 = vmatpush3.msra.mxu1 %v4683_v16  ;;  %3609 = vmatprep.mubr.msk.f32.mxu1 %vm3871_vm1, %v3870_v5 }
0x2aba   :  { %3587 = vmatprep.subr.mxu1 %v3870_v5 }
0x2abb   :  { %3588 = vmatpush3.msra.mxu1 %v4692_v56  ;;  %v3845_v56 = vld [vmem:[%s5089_s5] ss:$0 sm:$0xff] }
0x2abc   :  { %3589 = vmatprep.subr.mxu1 %v3870_v5 }
0x2abd   :  { %3590 = vmatpush3.msra.mxu1 %v4699_v57 }
0x2abe   :  { %3591 = vmatprep.subr.mxu1 %v3870_v5 }
0x2abf   :  { %3592 = vmatpush3.msra.mxu1 %v4706_v60 }
0x2ac0   :  { %3593 = vmatprep.subr.mxu1 %v3870_v5 }
0x2ac1   :  { %3594 = vmatpush3.msra.mxu1 %v4713_v61 }
0x2ac2   :  { %3595 = vmatprep.subr.mxu1 %v3870_v5 }
0x2ac3   :  { %3596 = vmatpush3.msra.mxu1 %v4720_v62 }
0x2ac4   :  { %3597 = vmatprep.subr.mxu1 %v3870_v5 }
0x2ac5   :  { %3598 = vmatpush3.msra.mxu1 %v4727_v26 }
0x2ac6   :  { %3599 = vmatprep.subr.mxu1 %v3870_v5 }
0x2ac7   :  { %3600 = vmatpush3.msra.mxu1 %v4734_v27 }
0x2ac8   :  { %3601 = vmatprep.subr.mxu1 %v3870_v5 }
0x2ac9   :  { %3602 = vmatpush3.msra.mxu1 %v4741_v31 }
0x2aca   :  { %3603 = vmatprep.subr.mxu1 %v3870_v5 }
0x2acb   :  { %3604 = vmatpush3.msra.mxu1 %v4748_v22 }
0x2acc   :  { %3605 = vmatprep.subr.mxu1 %v3870_v5 }
0x2acd   :  { %3606 = vmatpush3.msra.mxu1 %v4755_v28 }
0x2ace   :  { %3607 = vmatprep.subr.mxu1 %v3870_v5 }
0x2acf   :  { %3608 = vmatpush3.msra.mxu1 %v4762_v35 }
0x2b78   :  { %v2770_v16 = vpop.f32.mrf.mxu1 }
0x2b79   :  { %v2771_v57 = vadd.f32 %v3845_v56, %v2770_v16 }
0x2b7a   :  { %v3584_v60 = vpop.f32.mrf.mxu1 }
0x2b7b   :  { %v2781_v61 = vrot.slane %v2771_v57, %v4078_v54 }
0x2b7d   :  { %v2782_v62 = vcombine.high %v2781_v61, %v2781_v61  ;;  %v2789_v26 = vrot.slane %v2781_v61, %v4078_v54 }
0x2b7f   :  { %v2796_v27 = vrot.slane %v2782_v62, %v4078_v54  ;;  %v2800_v31 = vrot.slane %v2789_v26, %v4083_v59  ;;  %v3846_v54 = vld [vmem:[%s5090_s6] ss:$0 sm:$0xff] }
0x2b81   :  { %v2804_v5 = vrot.slane %v2796_v27, %v4083_v59  ;;  %v2807_v22 = vadd.f32 %v2800_v31, %v4091_v0  ;;  %v2808_v28 = vadd.f32 %v2800_v31, %v4089_v63 }
0x2b83   :  { %v2809_v35 = vadd.f32 %v2804_v5, %v4097_v9  ;;  %v2810_v10 = vadd.f32 %v2804_v5, %v4095_v6  ;;  %3790 = vtanh.f32 %v2807_v22 }
0x2b84   :  { %3792 = vtanh.f32 %v2808_v28 }
0x2b85   :  { %3794 = vtanh.f32 %v2809_v35 }
0x2b86   :  { %3796 = vtanh.f32 %v2810_v10 }
0x2b90   :  { %v3791_v1 = vpop.eup %3790 }
0x2b91   :  { %v3793_v2 = vpop.eup %3792  ;;  %v2815_v11 = vmul.f32 %v3846_v54, %v3791_v1 }
0x2b92   :  { %v3795_v12 = vpop.eup %3794  ;;  %v2816_v51 = vmul.f32 %v3846_v54, %v3793_v2 }
0x2b93   :  { %v2819_v0 = vsel %vm61_vm0, %v2815_v11, 0.0  ;;  %v2817_v63 = vmul.f32 %v3846_v54, %v3795_v12  ;;  %v3797_v25 = vpop.eup %3796 }
0x2b94   :  { %v2822_v9 = vsel %vm61_vm0, %v2816_v51, 0.0  ;;  %2820 = vadd.xlane.f32.xlu1 %v2819_v0  ;;  %v2818_v13 = vmul.f32 %v3846_v54, %v3797_v25 }
0x2b95   :  { %2823 = vadd.xlane.f32.xlu0 %v2822_v9  ;;  %v2825_v6 = vsel %vm61_vm0, %v2817_v63, 0.0 }
0x2b96   :  { %v2828_v14 = vsel %vm61_vm0, %v2818_v13, 0.0 }
0x2b98   :  { %2826 = vadd.xlane.f32.xlu1 %v2825_v6 }
0x2b9c   :  { %2829 = vadd.xlane.f32.xlu1 %v2828_v14 }
0x2c1d   :  { %v2821_v8 = vpop.xlane.xlu1 %2820 }
0x2c1e   :  { %v2824_v42 = vpop.xlane.xlu0 %2823  ;;  %v2831_v19 = vadd.f32 %v2821_v8, %v4123_v41 }
0x2c1f   :  { %v2832_v23 = vadd.f32 %v2824_v42, %v4123_v41 }
0x2c20   :  { %v2842_v20 = vrot.slane %v2831_v19, %v4118_v34 }
0x2c21   :  { %v2827_v21 = vpop.xlane.xlu1 %2826  ;;  %v2846_v30 = vrot.slane %v2832_v23, %v4121_v39 }
0x2c22   :  { %v2833_v36 = vadd.f32 %v2827_v21, %v4123_v41 }
0x2c23   :  { %v2847_v17 = vsel %vm456_vm3, %v2846_v30, %v2842_v20 }
0x2c24   :  { %v2851_v18 = vrot.slane %v2833_v36, %v4118_v34 }
0x2c25   :  { %v2830_v29 = vpop.xlane.xlu1 %2829 }
0x2c26   :  { %v2834_v37 = vadd.f32 %v2830_v29, %v4123_v41 }
0x2c28   :  { %v2855_v55 = vrot.slane %v2834_v37, %v4121_v39 }
0x2c2a   :  { %v2856_v49 = vsel %vm456_vm3, %v2855_v55, %v2851_v18 }
0x2c2b   :  { %v2857_v43 = vsel %vm192_vm2, %v2856_v49, %v2847_v17 }
0x2c2c   :  { %v2859_v45 = vsel %vm469_vm4, %v2857_v43, -inf }
0x2c2d   :  { %2860 = vmax.xlane.f32.xlu1 %v2859_v45 }
0x2cb6   :  { %v2861_v38 = vpop.xlane.xlu1 %2860 }
0x2cb7   :  { %v2866_v46 = vrot.slane %v2861_v38, %v4083_v59  ;;  %v2870_v15 = vrot.slane %v2861_v38, %v4138_v58 }
0x2cb9   :  { %v2873_v40 = vsub.f32 %v2831_v19, %v2866_v46  ;;  %v2874_v41 = vsub.f32 %v2832_v23, %v2866_v46  ;;  %v2876_v24 = vsub.f32 %v2834_v37, %v2870_v15  ;;  %v2875_v3 = vsub.f32 %v2833_v36, %v2870_v15 }
0x2cbb   :  { %v2877_v52 = vmul.f32 1.442695, %v2873_v40  ;;  %v2879_v44 = vmul.f32 1.442695, %v2874_v41  ;;  %v2883_v47 = vmul.f32 1.442695, %v2876_v24 }
0x2cbc   :  { %v2881_v7 = vmul.f32 1.442695, %v2875_v3 }
0x2cbd   :  { %3798 = vpow2.f32 %v2877_v52 }
0x2cbe   :  { %3800 = vpow2.f32 %v2879_v44 }
0x2cbf   :  { %3802 = vpow2.f32 %v2883_v47  ;;  %v3178_v47 = vld [vmem:[%s5085_s1 + $0xc] sm:$0x3]  ;;  %s3877_s1 = smov [#allocation3]  }
0x2cc0   :  { %3804 = vpow2.f32 %v2881_v7 }
0x2cca   :  { %v3799_v16 = vpop.eup %3798 }
0x2ccb   :  { %v3801_v56 = vpop.eup %3800  ;;  %2890 = vperm.xlu0 %3620, %v3799_v16  }
0x2ccc   :  { %2893 = vperm.xlu1 %3621, %v3801_v56   ;;  %v3803_v57 = vpop.eup %3802 }
0x2ccd   :  { %v3805_v60 = vpop.eup %3804 }
0x2ccf   :  { %2899 = vperm.xlu0 %3620, %v3803_v57  }
0x2cd0   :  { %2896 = vperm.xlu1 %3621, %v3805_v60  }
0x2d46   :  { %v2891_v61 = vpop.permute.xlu0 %2890 }
0x2d47   :  { %v2894_v62 = vpop.permute.xlu1 %2893  ;;  %v2904_v27 = vrot.slane %v2891_v61, %v4118_v34 }
0x2d48   :  { %v2908_v26 = vrot.slane %v2894_v62, %v4121_v39 }
0x2d4a   :  { %v2900_v31 = vpop.permute.xlu0 %2899  ;;  %v2909_v35 = vsel %vm456_vm3, %v2908_v26, %v2904_v27 }
0x2d4b   :  { %v2897_v5 = vpop.permute.xlu1 %2896  ;;  %v2917_v22 = vrot.slane %v2900_v31, %v4121_v39 }
0x2d4c   :  { %v2913_v28 = vrot.slane %v2897_v5, %v4118_v34 }
0x2d4e   :  { %v2918_v10 = vsel %vm456_vm3, %v2917_v22, %v2913_v28 }
0x2d4f   :  { %v2919_v1 = vsel %vm192_vm2, %v2918_v10, %v2909_v35 }
0x2d50   :  { %v2921_v2 = vsel %vm469_vm4, %v2919_v1, 0.0 }
0x2d51   :  { %2922 = vadd.xlane.f32.xlu1 %v2921_v2 }
0x2dda   :  { %v2923_v54 = vpop.xlane.xlu1 %2922 }
0x2ddb   :  { %v2928_v11 = vrot.slane %v2923_v54, %v4083_v59  ;;  %v2932_v12 = vrot.slane %v2923_v54, %v4138_v58 }
0x2ddd   :  { %3806 = vrcp.f32 %v2928_v11 }
0x2dde   :  { %3808 = vrcp.f32 %v2932_v12 }
0x2dea   :  { %v3807_v51 = vpop.eup %3806 }
0x2deb   :  { %v2936_v0 = vmul.f32 %v3807_v51, %v3799_v16  ;;  %v2937_v63 = vmul.f32 %v3807_v51, %v3801_v56  ;;  %v3809_v25 = vpop.eup %3808 }
0x2dec   :  { %v2939_v9 = vmul.f32 %v3809_v25, %v3805_v60  ;;  %v2940_v6 = vmul.f32 %v3809_v25, %v3803_v57  ;;  %v3847_v60 = vld [vmem:[%s5093_s9] ss:$0 sm:$0xff]  ;;  %s3128_s9 = sshll.u32 %s3877_s1, 4  ;;  %s3129_s9 = int_to_ptr.vmem [resolvable:$true] %s3128_s9 }
0x2ded   :  { %2943 = vperm.xlu0 %3620, %v2936_v0   ;;  %p3853_p1 = scmp.lt.s32.totalorder %s3129_s9, %s3129_s9 }
0x2df1   :  { %2948 = vperm.xlu0 %3620, %v2937_v63  }
0x2df5   :  { %2953 = vperm.xlu0 %3620, %v2939_v9  }
0x2df9   :  { %2958 = vperm.xlu0 %3620, %v2940_v6  }
0x2e68   :  { %v2944_v13 = vpop.permute.xlu0 %2943 }
0x2e69   :  { %v2961_v14 = vmul.f32 %v4923_v32, %v2944_v13  ;;  %v3102_v37 = vrot.slane %v2944_v13, %v4118_v34 }
0x2e6b   :  { %v2965_v42 = vsel %vm61_vm0, %v2961_v14, 0.0 }
0x2e6c   :  { %v2949_v8 = vpop.permute.xlu0 %2948 }
0x2e6d   :  { %v2962_v59 = vmul.f32 %v4929_v33, %v2949_v8  ;;  %v3106_v36 = vrot.slane %v2949_v8, %v4121_v39 }
0x2e6f   :  { %v2966_v58 = vsel %vm61_vm0, %v2962_v59, 0.0  ;;  %v3107_v49 = vsel %vm456_vm3, %v3106_v36, %v3102_v37 }
0x2e70   :  { %v2967_v21 = vadd.f32 %v2966_v58, %v2965_v42  ;;  %v2954_v23 = vpop.permute.xlu0 %2953 }
0x2e71   :  { %v2963_v29 = vmul.f32 %v4937_v50, %v2954_v23  ;;  %v3111_v32 = vrot.slane %v2954_v23, %v4118_v34 }
0x2e72   :  { %v2968_v19 = vrot.slane %v2967_v21, 4 }
0x2e73   :  { %v2974_v55 = vsel %vm61_vm0, %v2963_v29, 0.0 }
0x2e74   :  { %v2969_v30 = vadd.f32 %v2968_v19, %v2967_v21  ;;  %v2959_v20 = vpop.permute.xlu0 %2958 }
0x2e75   :  { %v2964_v18 = vmul.f32 %v4943_v53, %v2959_v20  ;;  %v3115_v33 = vrot.slane %v2959_v20, %v4121_v39 }
0x2e76   :  { %v2970_v45 = vrot.slane %v2969_v30, 2 }
0x2e77   :  { %v2975_v17 = vsel %vm61_vm0, %v2964_v18, 0.0  ;;  %v3116_v43 = vsel %vm456_vm3, %v3115_v33, %v3111_v32 }
0x2e78   :  { %v2976_v50 = vadd.f32 %v2975_v17, %v2974_v55  ;;  %v3117_v38 = vsel %vm192_vm2, %v3116_v43, %v3107_v49  ;;  %v2971_v34 = vadd.f32 %v2970_v45, %v2969_v30 }
0x2e79   :  { %3119 = vst.msk [vmem:[#allocation3] sm:$0x3] %vm469_vm4, %v3117_v38 }
0x2e7a   :  { %v2977_v46 = vrot.slane %v2976_v50, 4  ;;  %v2972_v39 = vrot.slane %v2971_v34, 1 }
0x2e7c   :  { %v2978_v15 = vadd.f32 %v2977_v46, %v2976_v50  ;;  %v2973_v24 = vadd.f32 %v2972_v39, %v2971_v34 }
0x2e7e   :  { %v2979_v53 = vrot.slane %v2978_v15, 2 }
0x2e80   :  { %v2980_v40 = vadd.f32 %v2979_v53, %v2978_v15 }
0x2e82   :  { %v2981_v41 = vrot.slane %v2980_v40, 1 }
0x2e84   :  { %v2982_v3 = vadd.f32 %v2981_v41, %v2980_v40 }
0x2e86   :  { %v2987_v52 = vsel %vm192_vm2, %v2982_v3, %v2973_v24 }
0x2e87   :  { %2988 = vrot.lane.b32.xlu0 %v2987_v52, %s3874_s28 }
0x2e8b   :  { %2991 = vrot.lane.b32.xlu0 %v4966_v48, %s3876_s7  ;;  %s3848_s7 = scalar_lea.vmem %s3129_s9, 32 }
0x2e8c   :  { %p3849_p0 = scmp.ne.s32.totalorder %s3129_s9, %s3848_s7  ;;  %p3854_p2 = scmp.lt.s32.totalorder %s3848_s7, %s3848_s7 }
0x2e8e   :  { %p3855_p3 = por %p3854_p2, %p3853_p1 }
0x2e90   :  { %p3856_p4 = pnand %p3855_p3, %p3849_p0 }
0x2ef9   :  { %v2989_v44 = vpop.permute.xlu0 %2988 }
0x2efa   :  { %v2994_v7 = vsel %vm61_vm0, %v3178_v47, %v2989_v44 }
0x2efd   :  { %v2992_v16 = vpop.permute.xlu0 %2991 }
0x2efe   :  { %v2995_v56 = vsel %vm605_vm5, %v2994_v7, %v2992_v16 }
0x2eff   :  { %3610 = vmatmul.mubr.msk.f32.vlgmr.msra.gmra.mxu1 %vm613_vm6, %v2995_v56 }
0x2fbf   :  { %v3065_v57 = vpop.f32.mrf.mxu1 }
0x2fc0   :  { %v3066_v61 = vadd.f32 %v3847_v60, %v3065_v57 }
0x2fc1   :  { %v3611_v62 = vpop.f32.mrf.mxu1 }
0x2fc2   :  { %3810 = vtanh.f32 %v3066_v61  ;;  %v3180_v26 = vmul.f32 -1.442695, %v3066_v61 }
0x2fc4   :  { %3812 = vpow2.f32 %v3180_v26 }
0x2fcf   :  { %v3811_v48 = vpop.eup %3810 }
0x2fd0   :  { %3078 = vrot.lane.b32.xlu0 %v3811_v48, %s3875_s29 }
0x2fd1   :  { %v3813_v27 = vpop.eup %3812 }
0x2fd2   :  { %v3072_v31 = vadd.f32 1.0, %v3813_v27 }
0x2fd4   :  { %3814 = vrcp.f32 %v3072_v31 }
0x2fe1   :  { %v3815_v5 = vpop.eup %3814 }
0x2fe2   :  { %v3076_v35 = vmul.f32 %v3815_v5, %v4962_v4 }
0x3042   :  { %v3079_v22 = vpop.permute.xlu0 %3078 }
0x3043   :  { %v3081_v28 = vmul.f32 %v3815_v5, %v3079_v22 }
0x3045   :  { %3083 = vrot.lane.b32.xlu0 %v3081_v28, %s3874_s28 }
0x30b7   :  { %v3084_v10 = vpop.permute.xlu0 %3083 }
0x30b8   :  { %v3086_v1 = vadd.f32 %v3084_v10, %v3076_v35 }
0x30ba   :  { %3816 = vtanh.f32 %v3086_v1 }
0x30c7   :  { %v3817_v2 = vpop.eup %3816 }
0x30c8   :  { %3089 = vrot.lane.b32.xlu0 %v3817_v2, %s3875_s29 }
0x30c9   :  { %3859 = shalt.err (!%p3856_p4)
}
0x30ca   :  { %3131 = dma.vmem_to_hbm [thread:$0]  %s3129_s9, 32, %s5097_s13, [#allocation4]  }
0x313a   :  { %v3090_v4 = vpop.permute.xlu0 %3089 }
0x313b   :  { %v3092_v54 = vmul.f32 %v3815_v5, %v3090_v4 }
0x313d   :  { %3094 = vrot.lane.b32.xlu1 %v3092_v54, %s3874_s28 }
0x31af   :  { %v3095_v11 = vpop.permute.xlu1 %3094 }
0x31b0   :  { %3181 = vst.msk [vmem:[%s5096_s12 + $0xc] sm:$0x3] %vm715_vm7, %v3095_v11 }
0x31b1   :  { %3868 = dma.done.wait [#allocation4], 32  }
0x31b2   :  { %3869 = vsyncadd [#allocation4], 4294967264 }
0x31b3   :  { %3137 = vsyncpa [#allocation4], 1 }

</bundles_post_ra>
